<compile_context>
chip_gen: v7x
topology: tpu7x:2x2x1
jax: 0.10.0
libtpu: 0.0.40
codegen_flags: <defaults>
</compile_context>

<pallas_src>
import jax
import jax.numpy as jnp
from jax.experimental import pallas as pl
from jax.experimental.pallas import tpu as pltpu

D = 32                 # hidden width = hidden_dims[0] = hidden_dims[1] = hidden_dims[2]
LAYERS_PER_NET = 2     # len(hidden_dims) - 1
LN_EPS = 1e-5
B = 256                # example batch (small, deterministic)
TB = 128               # batch tile -> grid of 2 parallel steps

PACK1 = 4 * D          # 128 lanes: [obs | outc | intents | intents]
PACK2 = 2 * D          # 64 lanes:  [z | z] through duplicated T_net


def _gelu_exact(x):
    # nn.GELU default = exact (erf-based) GELU
    return 0.5 * x * (1.0 + jax.lax.erf(x * jnp.float32(0.7071067811865476)))


def _packed_ln_mlp(h, W_ref, b_ref, g_ref, beta_ref, M_ref):
    """(Linear -> GELU -> per-32-lane-segment LayerNorm) x LAYERS_PER_NET with
    block-diagonal packed weights.  M broadcasts each 32-lane segment mean."""
    M = M_ref[...]
    for l in range(LAYERS_PER_NET):
        h = jnp.dot(h, W_ref[l], preferred_element_type=jnp.float32) + b_ref[l]
        h = _gelu_exact(h)
        mu = jnp.dot(h, M, preferred_element_type=jnp.float32)          # segment mean
        d = h - mu
        var = jnp.dot(d * d, M, preferred_element_type=jnp.float32)     # segment biased var
        h = d * jax.lax.rsqrt(var + LN_EPS)
        h = h * g_ref[l] + beta_ref[l]
    return h


def multilinear_vf_kernel(x_ref,
                          W1_ref, b1_ref, g1_ref, be1_ref, M1_ref,
                          W2_ref, b2_ref, g2_ref, be2_ref, M2_ref,
                          WH_ref, bH_ref,
                          v_ref):
    x = x_ref[...]                                            # (tb, 128)

    # Stage 1: phi_net / psi_net / psi_net packed -> [phi | psi | z | z]
    h1 = _packed_ln_mlp(x, W1_ref, b1_ref, g1_ref, be1_ref, M1_ref)

    # Stage 2: T_net on the duplicated z slice -> [Tz | Tz]
    zz = h1[:, 2 * D:4 * D]                                   # (tb, 64)
    Tz2 = _packed_ln_mlp(zz, W2_ref, b2_ref, g2_ref, be2_ref, M2_ref)

    # Bilinear head: [Tz*phi | Tz*psi] @ blockdiag(A, B) + [Ab | Bb]
    uw = h1[:, 0:2 * D] * Tz2                                 # (tb, 64)
    head = jnp.dot(uw, WH_ref[...], preferred_element_type=jnp.float32) + bH_ref[...]

    prod = head[:, 0:D] * head[:, D:2 * D]                    # (tb, 32)
    v_col = jnp.sum(prod, axis=-1, keepdims=True)             # (tb, 1)
    v_ref[...] = jnp.transpose(v_col, (1, 0))                 # lane-dense (1, tb) slab


def _blockdiag(blocks):
    d = blocks[0].shape[0]
    n = len(blocks)
    out = jnp.zeros((n * d, n * d), jnp.float32)
    for k, blk in enumerate(blocks):
        out = out.at[k * d:(k + 1) * d, k * d:(k + 1) * d].set(blk)
    return out


def _segment_mean_matrix(width, seg):
    idx = jnp.arange(width)
    same = (idx[:, None] // seg) == (idx[None, :] // seg)
    return same.astype(jnp.float32) / jnp.float32(seg)


def pack_params(params):
    """Convert per-net params (PyTorch layout, weights pre-transposed to [in,out])
    into the lane-packed block-diagonal layout consumed by the kernel.
    Net order in Ws/bs/gs/betas: [phi0, phi1, psi0, psi1, T0, T1]."""
    Ws, bs, gs, betas, AW, Ab, BW, Bb = params

    def idx(net, l):
        return net * LAYERS_PER_NET + l

    # Stage 1: segments (phi, psi, psi, psi) applied to [obs | outc | int | int]
    W1 = jnp.stack([_blockdiag([Ws[idx(0, l)], Ws[idx(1, l)], Ws[idx(1, l)], Ws[idx(1, l)]])
                    for l in range(LAYERS_PER_NET)])                       # (2, 128, 128)

    def cat1(a, l):
        return jnp.concatenate([a[idx(0, l)], a[idx(1, l)], a[idx(1, l)], a[idx(1, l)]], axis=-1)

    b1 = jnp.stack([cat1(bs, l) for l in range(LAYERS_PER_NET)])           # (2, 1, 128)
    g1 = jnp.stack([cat1(gs, l) for l in range(LAYERS_PER_NET)])
    be1 = jnp.stack([cat1(betas, l) for l in range(LAYERS_PER_NET)])

    # Stage 2: duplicated T_net on [z | z]
    W2 = jnp.stack([_blockdiag([Ws[idx(2, l)], Ws[idx(2, l)]])
                    for l in range(LAYERS_PER_NET)])                       # (2, 64, 64)

    def cat2(a, l):
        return jnp.concatenate([a[idx(2, l)], a[idx(2, l)]], axis=-1)

    b2 = jnp.stack([cat2(bs, l) for l in range(LAYERS_PER_NET)])           # (2, 1, 64)
    g2 = jnp.stack([cat2(gs, l) for l in range(LAYERS_PER_NET)])
    be2 = jnp.stack([cat2(betas, l) for l in range(LAYERS_PER_NET)])

    # Head: [Tz*phi | Tz*psi] @ blockdiag(AW, BW) + [Ab | Bb]
    WH = _blockdiag([AW, BW])                                              # (64, 64)
    bH = jnp.concatenate([Ab, Bb], axis=-1)                                # (1, 64)

    M1 = _segment_mean_matrix(PACK1, D)                                    # (128, 128)
    M2 = _segment_mean_matrix(PACK2, D)                                    # (64, 64)
    return (W1, b1, g1, be1, M1, W2, b2, g2, be2, M2, WH, bH)


def multilinear_vf(obs, outcomes, intents, packed, tb=TB):
    batch, d = obs.shape
    assert d == D
    W1, b1, g1, be1, M1, W2, b2, g2, be2, M2, WH, bH = packed

    # Lane-pack the three branches (intents duplicated so [z|z] is contiguous).
    x = jnp.concatenate([obs, outcomes, intents, intents], axis=-1)        # (batch, 128)

    padded = pl.cdiv(batch, tb) * tb
    if padded != batch:
        x = jnp.pad(x, ((0, padded - batch), (0, 0)))

    def rep(a):
        nd = a.ndim
        return pl.BlockSpec(a.shape, lambda i, _nd=nd: (0,) * _nd)

    weight_args = (W1, b1, g1, be1, M1, W2, b2, g2, be2, M2, WH, bH)

    v2d = pl.pallas_call(
        multilinear_vf_kernel,
        out_shape=jax.ShapeDtypeStruct((1, padded), jnp.float32),
        grid=(padded // tb,),
        in_specs=[pl.BlockSpec((tb, PACK1), lambda i: (i, 0))]
                 + [rep(a) for a in weight_args],
        out_specs=pl.BlockSpec((1, tb), lambda i: (0, i)),
        compiler_params=pltpu.CompilerParams(dimension_semantics=("parallel",)),
    )(x, *weight_args)
    return v2d.reshape(padded)[:batch]


def reference_jax(obs, outc, intents, params):
    """Pure-JAX reference matching the PyTorch forward (for sanity check)."""
    Ws, bs, gs, betas, AW, Ab, BW, Bb = params

    def mlp(x, net_idx):
        h = x
        for l in range(LAYERS_PER_NET):
            i = net_idx * LAYERS_PER_NET + l
            h = h @ Ws[i] + bs[i]
            h = 0.5 * h * (1.0 + jax.scipy.special.erf(h / jnp.sqrt(2.0)))
            mu = h.mean(-1, keepdims=True)
            var = ((h - mu) ** 2).mean(-1, keepdims=True)
            h = (h - mu) / jnp.sqrt(var + LN_EPS)
            h = h * gs[i] + betas[i]
        return h

    phi = mlp(obs, 0)
    psi = mlp(outc, 1)
    z = mlp(intents, 1)
    Tz = mlp(z, 2)
    phi_z = (Tz * phi) @ AW + Ab
    psi_z = (Tz * psi) @ BW + Bb
    return jnp.sum(phi_z * psi_z, axis=-1)


def init_params(key):
    """Deterministic init mimicking PyTorch defaults (uniform +-1/sqrt(fan_in);
    LayerNorm gamma=1, beta=0). Linear weights are stored pre-transposed [in, out].
    Net order: [phi0, phi1, psi0, psi1, T0, T1]."""
    n_layers = 3 * LAYERS_PER_NET
    bound = 1.0 / jnp.sqrt(jnp.float32(D))
    keys = jax.random.split(key, 2 * n_layers + 4)

    Ws = jnp.stack([jax.random.uniform(keys[i], (D, D), jnp.float32, -bound, bound)
                    for i in range(n_layers)])                         # (6, D, D)
    bs = jnp.stack([jax.random.uniform(keys[n_layers + i], (1, D), jnp.float32, -bound, bound)
                    for i in range(n_layers)])                         # (6, 1, D)
    gs = jnp.ones((n_layers, 1, D), jnp.float32)                       # LayerNorm gamma
    betas = jnp.zeros((n_layers, 1, D), jnp.float32)                   # LayerNorm beta

    AW = jax.random.uniform(keys[2 * n_layers + 0], (D, D), jnp.float32, -bound, bound)
    Ab = jax.random.uniform(keys[2 * n_layers + 1], (1, D), jnp.float32, -bound, bound)
    BW = jax.random.uniform(keys[2 * n_layers + 2], (D, D), jnp.float32, -bound, bound)
    Bb = jax.random.uniform(keys[2 * n_layers + 3], (1, D), jnp.float32, -bound, bound)
    return Ws, bs, gs, betas, AW, Ab, BW, Bb


if __name__ == "__main__":
    key = jax.random.PRNGKey(0)
    k_obs, k_out, k_int, k_param = jax.random.split(key, 4)

    observations = jax.random.normal(k_obs, (B, D), jnp.float32)
    outcomes = jax.random.normal(k_out, (B, D), jnp.float32)
    intents = jax.random.normal(k_int, (B, D), jnp.float32)

    params = init_params(k_param)
    packed = pack_params(params)

    v = multilinear_vf(observations, outcomes, intents, packed)
    v = jax.block_until_ready(v)

    v_ref = reference_jax(observations, outcomes, intents, params)
    assert v.shape == (B,)
    assert jnp.allclose(v, v_ref, atol=1e-4, rtol=1e-4), (v[:8], v_ref[:8])

    print("KERNEL_OK")
</pallas_src>

<mosaic_0001>
module attributes {stable_mosaic.version = 11 : i64} {
  func.func @multilinear_vf_kernel(%arg0: i32, %arg1: memref<128x128xf32, #tpu.memory_space<vmem>>, %arg2: memref<2x128x128xf32, #tpu.memory_space<vmem>>, %arg3: memref<2x1x128xf32, #tpu.memory_space<vmem>>, %arg4: memref<2x1x128xf32, #tpu.memory_space<vmem>>, %arg5: memref<2x1x128xf32, #tpu.memory_space<vmem>>, %arg6: memref<128x128xf32, #tpu.memory_space<vmem>>, %arg7: memref<2x64x64xf32, #tpu.memory_space<vmem>>, %arg8: memref<2x1x64xf32, #tpu.memory_space<vmem>>, %arg9: memref<2x1x64xf32, #tpu.memory_space<vmem>>, %arg10: memref<2x1x64xf32, #tpu.memory_space<vmem>>, %arg11: memref<64x64xf32, #tpu.memory_space<vmem>>, %arg12: memref<64x64xf32, #tpu.memory_space<vmem>>, %arg13: memref<1x64xf32, #tpu.memory_space<vmem>>, %arg14: memref<1x128xf32, #tpu.memory_space<vmem>>) attributes {dimension_semantics = [#tpu.dimension_semantics<parallel>], iteration_bounds = array<i64: 2>, scalar_prefetch = 0 : i64, scratch_operands = 0 : i64, tpu.core_type = #tpu.core_type<tc>, window_params = [{transform_indices = @transform_0, window_bounds = array<i64: 128, 128>}, {pipeline_mode = #tpu.pipeline_mode<synchronous>, transform_indices = @transform_1, window_bounds = array<i64: 2, 128, 128>}, {pipeline_mode = #tpu.pipeline_mode<synchronous>, transform_indices = @transform_2, window_bounds = array<i64: 2, 1, 128>}, {pipeline_mode = #tpu.pipeline_mode<synchronous>, transform_indices = @transform_3, window_bounds = array<i64: 2, 1, 128>}, {pipeline_mode = #tpu.pipeline_mode<synchronous>, transform_indices = @transform_4, window_bounds = array<i64: 2, 1, 128>}, {pipeline_mode = #tpu.pipeline_mode<synchronous>, transform_indices = @transform_5, window_bounds = array<i64: 128, 128>}, {pipeline_mode = #tpu.pipeline_mode<synchronous>, transform_indices = @transform_6, window_bounds = array<i64: 2, 64, 64>}, {pipeline_mode = #tpu.pipeline_mode<synchronous>, transform_indices = @transform_7, window_bounds = array<i64: 2, 1, 64>}, {pipeline_mode = #tpu.pipeline_mode<synchronous>, transform_indices = @transform_8, window_bounds = array<i64: 2, 1, 64>}, {pipeline_mode = #tpu.pipeline_mode<synchronous>, transform_indices = @transform_9, window_bounds = array<i64: 2, 1, 64>}, {pipeline_mode = #tpu.pipeline_mode<synchronous>, transform_indices = @transform_10, window_bounds = array<i64: 64, 64>}, {pipeline_mode = #tpu.pipeline_mode<synchronous>, transform_indices = @transform_11, window_bounds = array<i64: 64, 64>}, {pipeline_mode = #tpu.pipeline_mode<synchronous>, transform_indices = @transform_12, window_bounds = array<i64: 1, 64>}, {transform_indices = @transform_13, window_bounds = array<i64: 1, 128>}]} {
    %c0 = arith.constant 0 : index
    %c0_0 = arith.constant 0 : index
    %0 = vector.load %arg1[%c0, %c0_0] : memref<128x128xf32, #tpu.memory_space<vmem>>, vector<128x128xf32>
    %c0_1 = arith.constant 0 : index
    %c0_2 = arith.constant 0 : index
    %1 = vector.load %arg6[%c0_1, %c0_2] : memref<128x128xf32, #tpu.memory_space<vmem>>, vector<128x128xf32>
    %c0_3 = arith.constant 0 : index
    %c0_4 = arith.constant 0 : index
    %c0_5 = arith.constant 0 : index
    %2 = vector.load %arg2[%c0_3, %c0_4, %c0_5] : memref<2x128x128xf32, #tpu.memory_space<vmem>>, vector<1x128x128xf32>
    %3 = vector.shape_cast %2 : vector<1x128x128xf32> to vector<128x128xf32>
    %cst = arith.constant dense<0.000000e+00> : vector<128x128xf32>
    %4 = tpu.matmul %0, %3, %cst {dimension_numbers = #tpu.dot_dimension_numbers<[1], [0], [0], [1], [0, 0, 1, 1], [], []>} : vector<128x128xf32>, vector<128x128xf32>, vector<128x128xf32> -> vector<128x128xf32>
    %c0_6 = arith.constant 0 : index
    %c0_7 = arith.constant 0 : index
    %c0_8 = arith.constant 0 : index
    %5 = vector.load %arg3[%c0_6, %c0_7, %c0_8] : memref<2x1x128xf32, #tpu.memory_space<vmem>>, vector<1x1x128xf32>
    %6 = vector.shape_cast %5 : vector<1x1x128xf32> to vector<1x128xf32>
    %7 = vector.broadcast %6 : vector<1x128xf32> to vector<128x128xf32>
    %8 = arith.addf %4, %7 : vector<128x128xf32>
    %cst_9 = arith.constant 5.000000e-01 : f32
    %9 = vector.broadcast %cst_9 : f32 to vector<128x128xf32>
    %10 = arith.mulf %9, %8 : vector<128x128xf32>
    %cst_10 = arith.constant 0.707106769 : f32
    %11 = vector.broadcast %cst_10 : f32 to vector<128x128xf32>
    %12 = arith.mulf %8, %11 : vector<128x128xf32>
    %13 = math.erf %12 : vector<128x128xf32>
    %cst_11 = arith.constant 1.000000e+00 : f32
    %14 = vector.broadcast %cst_11 : f32 to vector<128x128xf32>
    %15 = arith.addf %14, %13 : vector<128x128xf32>
    %16 = arith.mulf %10, %15 : vector<128x128xf32>
    %cst_12 = arith.constant dense<0.000000e+00> : vector<128x128xf32>
    %17 = tpu.matmul %16, %1, %cst_12 {dimension_numbers = #tpu.dot_dimension_numbers<[1], [0], [0], [1], [0, 0, 1, 1], [], []>} : vector<128x128xf32>, vector<128x128xf32>, vector<128x128xf32> -> vector<128x128xf32>
    %18 = arith.subf %16, %17 : vector<128x128xf32>
    %19 = arith.mulf %18, %18 : vector<128x128xf32>
    %cst_13 = arith.constant dense<0.000000e+00> : vector<128x128xf32>
    %20 = tpu.matmul %19, %1, %cst_13 {dimension_numbers = #tpu.dot_dimension_numbers<[1], [0], [0], [1], [0, 0, 1, 1], [], []>} : vector<128x128xf32>, vector<128x128xf32>, vector<128x128xf32> -> vector<128x128xf32>
    %cst_14 = arith.constant 9.99999974E-6 : f32
    %21 = vector.broadcast %cst_14 : f32 to vector<128x128xf32>
    %22 = arith.addf %20, %21 : vector<128x128xf32>
    %23 = math.rsqrt %22 : vector<128x128xf32>
    %24 = arith.mulf %18, %23 : vector<128x128xf32>
    %c0_15 = arith.constant 0 : index
    %c0_16 = arith.constant 0 : index
    %c0_17 = arith.constant 0 : index
    %25 = vector.load %arg4[%c0_15, %c0_16, %c0_17] : memref<2x1x128xf32, #tpu.memory_space<vmem>>, vector<1x1x128xf32>
    %26 = vector.shape_cast %25 : vector<1x1x128xf32> to vector<1x128xf32>
    %27 = vector.broadcast %26 : vector<1x128xf32> to vector<128x128xf32>
    %28 = arith.mulf %24, %27 : vector<128x128xf32>
    %c0_18 = arith.constant 0 : index
    %c0_19 = arith.constant 0 : index
    %c0_20 = arith.constant 0 : index
    %29 = vector.load %arg5[%c0_18, %c0_19, %c0_20] : memref<2x1x128xf32, #tpu.memory_space<vmem>>, vector<1x1x128xf32>
    %30 = vector.shape_cast %29 : vector<1x1x128xf32> to vector<1x128xf32>
    %31 = vector.broadcast %30 : vector<1x128xf32> to vector<128x128xf32>
    %32 = arith.addf %28, %31 : vector<128x128xf32>
    %c1 = arith.constant 1 : index
    %c0_21 = arith.constant 0 : index
    %c0_22 = arith.constant 0 : index
    %33 = vector.load %arg2[%c1, %c0_21, %c0_22] : memref<2x128x128xf32, #tpu.memory_space<vmem>>, vector<1x128x128xf32>
    %34 = vector.shape_cast %33 : vector<1x128x128xf32> to vector<128x128xf32>
    %cst_23 = arith.constant dense<0.000000e+00> : vector<128x128xf32>
    %35 = tpu.matmul %32, %34, %cst_23 {dimension_numbers = #tpu.dot_dimension_numbers<[1], [0], [0], [1], [0, 0, 1, 1], [], []>} : vector<128x128xf32>, vector<128x128xf32>, vector<128x128xf32> -> vector<128x128xf32>
    %c1_24 = arith.constant 1 : index
    %c0_25 = arith.constant 0 : index
    %c0_26 = arith.constant 0 : index
    %36 = vector.load %arg3[%c1_24, %c0_25, %c0_26] : memref<2x1x128xf32, #tpu.memory_space<vmem>>, vector<1x1x128xf32>
    %37 = vector.shape_cast %36 : vector<1x1x128xf32> to vector<1x128xf32>
    %38 = vector.broadcast %37 : vector<1x128xf32> to vector<128x128xf32>
    %39 = arith.addf %35, %38 : vector<128x128xf32>
    %cst_27 = arith.constant 5.000000e-01 : f32
    %40 = vector.broadcast %cst_27 : f32 to vector<128x128xf32>
    %41 = arith.mulf %40, %39 : vector<128x128xf32>
    %cst_28 = arith.constant 0.707106769 : f32
    %42 = vector.broadcast %cst_28 : f32 to vector<128x128xf32>
    %43 = arith.mulf %39, %42 : vector<128x128xf32>
    %44 = math.erf %43 : vector<128x128xf32>
    %cst_29 = arith.constant 1.000000e+00 : f32
    %45 = vector.broadcast %cst_29 : f32 to vector<128x128xf32>
    %46 = arith.addf %45, %44 : vector<128x128xf32>
    %47 = arith.mulf %41, %46 : vector<128x128xf32>
    %cst_30 = arith.constant dense<0.000000e+00> : vector<128x128xf32>
    %48 = tpu.matmul %47, %1, %cst_30 {dimension_numbers = #tpu.dot_dimension_numbers<[1], [0], [0], [1], [0, 0, 1, 1], [], []>} : vector<128x128xf32>, vector<128x128xf32>, vector<128x128xf32> -> vector<128x128xf32>
    %49 = arith.subf %47, %48 : vector<128x128xf32>
    %50 = arith.mulf %49, %49 : vector<128x128xf32>
    %cst_31 = arith.constant dense<0.000000e+00> : vector<128x128xf32>
    %51 = tpu.matmul %50, %1, %cst_31 {dimension_numbers = #tpu.dot_dimension_numbers<[1], [0], [0], [1], [0, 0, 1, 1], [], []>} : vector<128x128xf32>, vector<128x128xf32>, vector<128x128xf32> -> vector<128x128xf32>
    %cst_32 = arith.constant 9.99999974E-6 : f32
    %52 = vector.broadcast %cst_32 : f32 to vector<128x128xf32>
    %53 = arith.addf %51, %52 : vector<128x128xf32>
    %54 = math.rsqrt %53 : vector<128x128xf32>
    %55 = arith.mulf %49, %54 : vector<128x128xf32>
    %c1_33 = arith.constant 1 : index
    %c0_34 = arith.constant 0 : index
    %c0_35 = arith.constant 0 : index
    %56 = vector.load %arg4[%c1_33, %c0_34, %c0_35] : memref<2x1x128xf32, #tpu.memory_space<vmem>>, vector<1x1x128xf32>
    %57 = vector.shape_cast %56 : vector<1x1x128xf32> to vector<1x128xf32>
    %58 = vector.broadcast %57 : vector<1x128xf32> to vector<128x128xf32>
    %59 = arith.mulf %55, %58 : vector<128x128xf32>
    %c1_36 = arith.constant 1 : index
    %c0_37 = arith.constant 0 : index
    %c0_38 = arith.constant 0 : index
    %60 = vector.load %arg5[%c1_36, %c0_37, %c0_38] : memref<2x1x128xf32, #tpu.memory_space<vmem>>, vector<1x1x128xf32>
    %61 = vector.shape_cast %60 : vector<1x1x128xf32> to vector<1x128xf32>
    %62 = vector.broadcast %61 : vector<1x128xf32> to vector<128x128xf32>
    %63 = arith.addf %59, %62 : vector<128x128xf32>
    %64 = vector.extract_strided_slice %63 {offsets = [0, 64], sizes = [128, 64], strides = [1, 1]} : vector<128x128xf32> to vector<128x64xf32>
    %c0_39 = arith.constant 0 : index
    %c0_40 = arith.constant 0 : index
    %65 = vector.load %arg11[%c0_39, %c0_40] : memref<64x64xf32, #tpu.memory_space<vmem>>, vector<64x64xf32>
    %c0_41 = arith.constant 0 : index
    %c0_42 = arith.constant 0 : index
    %c0_43 = arith.constant 0 : index
    %66 = vector.load %arg7[%c0_41, %c0_42, %c0_43] : memref<2x64x64xf32, #tpu.memory_space<vmem>>, vector<1x64x64xf32>
    %67 = vector.shape_cast %66 : vector<1x64x64xf32> to vector<64x64xf32>
    %cst_44 = arith.constant dense<0.000000e+00> : vector<128x64xf32>
    %68 = tpu.matmul %64, %67, %cst_44 {dimension_numbers = #tpu.dot_dimension_numbers<[1], [0], [0], [1], [0, 0, 1, 1], [], []>} : vector<128x64xf32>, vector<64x64xf32>, vector<128x64xf32> -> vector<128x64xf32>
    %c0_45 = arith.constant 0 : index
    %c0_46 = arith.constant 0 : index
    %c0_47 = arith.constant 0 : index
    %69 = vector.load %arg8[%c0_45, %c0_46, %c0_47] : memref<2x1x64xf32, #tpu.memory_space<vmem>>, vector<1x1x64xf32>
    %70 = vector.shape_cast %69 : vector<1x1x64xf32> to vector<1x64xf32>
    %71 = vector.broadcast %70 : vector<1x64xf32> to vector<128x64xf32>
    %72 = arith.addf %68, %71 : vector<128x64xf32>
    %cst_48 = arith.constant 5.000000e-01 : f32
    %73 = vector.broadcast %cst_48 : f32 to vector<128x64xf32>
    %74 = arith.mulf %73, %72 : vector<128x64xf32>
    %cst_49 = arith.constant 0.707106769 : f32
    %75 = vector.broadcast %cst_49 : f32 to vector<128x64xf32>
    %76 = arith.mulf %72, %75 : vector<128x64xf32>
    %77 = math.erf %76 : vector<128x64xf32>
    %cst_50 = arith.constant 1.000000e+00 : f32
    %78 = vector.broadcast %cst_50 : f32 to vector<128x64xf32>
    %79 = arith.addf %78, %77 : vector<128x64xf32>
    %80 = arith.mulf %74, %79 : vector<128x64xf32>
    %cst_51 = arith.constant dense<0.000000e+00> : vector<128x64xf32>
    %81 = tpu.matmul %80, %65, %cst_51 {dimension_numbers = #tpu.dot_dimension_numbers<[1], [0], [0], [1], [0, 0, 1, 1], [], []>} : vector<128x64xf32>, vector<64x64xf32>, vector<128x64xf32> -> vector<128x64xf32>
    %82 = arith.subf %80, %81 : vector<128x64xf32>
    %83 = arith.mulf %82, %82 : vector<128x64xf32>
    %cst_52 = arith.constant dense<0.000000e+00> : vector<128x64xf32>
    %84 = tpu.matmul %83, %65, %cst_52 {dimension_numbers = #tpu.dot_dimension_numbers<[1], [0], [0], [1], [0, 0, 1, 1], [], []>} : vector<128x64xf32>, vector<64x64xf32>, vector<128x64xf32> -> vector<128x64xf32>
    %cst_53 = arith.constant 9.99999974E-6 : f32
    %85 = vector.broadcast %cst_53 : f32 to vector<128x64xf32>
    %86 = arith.addf %84, %85 : vector<128x64xf32>
    %87 = math.rsqrt %86 : vector<128x64xf32>
    %88 = arith.mulf %82, %87 : vector<128x64xf32>
    %c0_54 = arith.constant 0 : index
    %c0_55 = arith.constant 0 : index
    %c0_56 = arith.constant 0 : index
    %89 = vector.load %arg9[%c0_54, %c0_55, %c0_56] : memref<2x1x64xf32, #tpu.memory_space<vmem>>, vector<1x1x64xf32>
    %90 = vector.shape_cast %89 : vector<1x1x64xf32> to vector<1x64xf32>
    %91 = vector.broadcast %90 : vector<1x64xf32> to vector<128x64xf32>
    %92 = arith.mulf %88, %91 : vector<128x64xf32>
    %c0_57 = arith.constant 0 : index
    %c0_58 = arith.constant 0 : index
    %c0_59 = arith.constant 0 : index
    %93 = vector.load %arg10[%c0_57, %c0_58, %c0_59] : memref<2x1x64xf32, #tpu.memory_space<vmem>>, vector<1x1x64xf32>
    %94 = vector.shape_cast %93 : vector<1x1x64xf32> to vector<1x64xf32>
    %95 = vector.broadcast %94 : vector<1x64xf32> to vector<128x64xf32>
    %96 = arith.addf %92, %95 : vector<128x64xf32>
    %c1_60 = arith.constant 1 : index
    %c0_61 = arith.constant 0 : index
    %c0_62 = arith.constant 0 : index
    %97 = vector.load %arg7[%c1_60, %c0_61, %c0_62] : memref<2x64x64xf32, #tpu.memory_space<vmem>>, vector<1x64x64xf32>
    %98 = vector.shape_cast %97 : vector<1x64x64xf32> to vector<64x64xf32>
    %cst_63 = arith.constant dense<0.000000e+00> : vector<128x64xf32>
    %99 = tpu.matmul %96, %98, %cst_63 {dimension_numbers = #tpu.dot_dimension_numbers<[1], [0], [0], [1], [0, 0, 1, 1], [], []>} : vector<128x64xf32>, vector<64x64xf32>, vector<128x64xf32> -> vector<128x64xf32>
    %c1_64 = arith.constant 1 : index
    %c0_65 = arith.constant 0 : index
    %c0_66 = arith.constant 0 : index
    %100 = vector.load %arg8[%c1_64, %c0_65, %c0_66] : memref<2x1x64xf32, #tpu.memory_space<vmem>>, vector<1x1x64xf32>
    %101 = vector.shape_cast %100 : vector<1x1x64xf32> to vector<1x64xf32>
    %102 = vector.broadcast %101 : vector<1x64xf32> to vector<128x64xf32>
    %103 = arith.addf %99, %102 : vector<128x64xf32>
    %cst_67 = arith.constant 5.000000e-01 : f32
    %104 = vector.broadcast %cst_67 : f32 to vector<128x64xf32>
    %105 = arith.mulf %104, %103 : vector<128x64xf32>
    %cst_68 = arith.constant 0.707106769 : f32
    %106 = vector.broadcast %cst_68 : f32 to vector<128x64xf32>
    %107 = arith.mulf %103, %106 : vector<128x64xf32>
    %108 = math.erf %107 : vector<128x64xf32>
    %cst_69 = arith.constant 1.000000e+00 : f32
    %109 = vector.broadcast %cst_69 : f32 to vector<128x64xf32>
    %110 = arith.addf %109, %108 : vector<128x64xf32>
    %111 = arith.mulf %105, %110 : vector<128x64xf32>
    %cst_70 = arith.constant dense<0.000000e+00> : vector<128x64xf32>
    %112 = tpu.matmul %111, %65, %cst_70 {dimension_numbers = #tpu.dot_dimension_numbers<[1], [0], [0], [1], [0, 0, 1, 1], [], []>} : vector<128x64xf32>, vector<64x64xf32>, vector<128x64xf32> -> vector<128x64xf32>
    %113 = arith.subf %111, %112 : vector<128x64xf32>
    %114 = arith.mulf %113, %113 : vector<128x64xf32>
    %cst_71 = arith.constant dense<0.000000e+00> : vector<128x64xf32>
    %115 = tpu.matmul %114, %65, %cst_71 {dimension_numbers = #tpu.dot_dimension_numbers<[1], [0], [0], [1], [0, 0, 1, 1], [], []>} : vector<128x64xf32>, vector<64x64xf32>, vector<128x64xf32> -> vector<128x64xf32>
    %cst_72 = arith.constant 9.99999974E-6 : f32
    %116 = vector.broadcast %cst_72 : f32 to vector<128x64xf32>
    %117 = arith.addf %115, %116 : vector<128x64xf32>
    %118 = math.rsqrt %117 : vector<128x64xf32>
    %119 = arith.mulf %113, %118 : vector<128x64xf32>
    %c1_73 = arith.constant 1 : index
    %c0_74 = arith.constant 0 : index
    %c0_75 = arith.constant 0 : index
    %120 = vector.load %arg9[%c1_73, %c0_74, %c0_75] : memref<2x1x64xf32, #tpu.memory_space<vmem>>, vector<1x1x64xf32>
    %121 = vector.shape_cast %120 : vector<1x1x64xf32> to vector<1x64xf32>
    %122 = vector.broadcast %121 : vector<1x64xf32> to vector<128x64xf32>
    %123 = arith.mulf %119, %122 : vector<128x64xf32>
    %c1_76 = arith.constant 1 : index
    %c0_77 = arith.constant 0 : index
    %c0_78 = arith.constant 0 : index
    %124 = vector.load %arg10[%c1_76, %c0_77, %c0_78] : memref<2x1x64xf32, #tpu.memory_space<vmem>>, vector<1x1x64xf32>
    %125 = vector.shape_cast %124 : vector<1x1x64xf32> to vector<1x64xf32>
    %126 = vector.broadcast %125 : vector<1x64xf32> to vector<128x64xf32>
    %127 = arith.addf %123, %126 : vector<128x64xf32>
    %128 = vector.extract_strided_slice %63 {offsets = [0, 0], sizes = [128, 64], strides = [1, 1]} : vector<128x128xf32> to vector<128x64xf32>
    %129 = arith.mulf %128, %127 : vector<128x64xf32>
    %c0_79 = arith.constant 0 : index
    %c0_80 = arith.constant 0 : index
    %130 = vector.load %arg12[%c0_79, %c0_80] : memref<64x64xf32, #tpu.memory_space<vmem>>, vector<64x64xf32>
    %cst_81 = arith.constant dense<0.000000e+00> : vector<128x64xf32>
    %131 = tpu.matmul %129, %130, %cst_81 {dimension_numbers = #tpu.dot_dimension_numbers<[1], [0], [0], [1], [0, 0, 1, 1], [], []>} : vector<128x64xf32>, vector<64x64xf32>, vector<128x64xf32> -> vector<128x64xf32>
    %c0_82 = arith.constant 0 : index
    %c0_83 = arith.constant 0 : index
    %132 = vector.load %arg13[%c0_82, %c0_83] : memref<1x64xf32, #tpu.memory_space<vmem>>, vector<1x64xf32>
    %133 = vector.broadcast %132 : vector<1x64xf32> to vector<128x64xf32>
    %134 = arith.addf %131, %133 : vector<128x64xf32>
    %135 = vector.extract_strided_slice %134 {offsets = [0, 0], sizes = [128, 32], strides = [1, 1]} : vector<128x64xf32> to vector<128x32xf32>
    %136 = vector.extract_strided_slice %134 {offsets = [0, 32], sizes = [128, 32], strides = [1, 1]} : vector<128x64xf32> to vector<128x32xf32>
    %137 = arith.mulf %135, %136 : vector<128x32xf32>
    %cst_84 = arith.constant dense<0.000000e+00> : vector<128xf32>
    %138 = vector.multi_reduction <add>, %137, %cst_84 [1] : vector<128x32xf32> to vector<128xf32>
    %139 = vector.shape_cast %138 : vector<128xf32> to vector<128x1xf32>
    %140 = tpu.transpose %139, [1, 0] : vector<128x1xf32> -> vector<1x128xf32>
    %c0_85 = arith.constant 0 : index
    %c0_86 = arith.constant 0 : index
    %141 = vector.load %arg14[%c0_85, %c0_86] : memref<1x128xf32, #tpu.memory_space<vmem>>, vector<1x128xf32>
    tpu.vector_store %arg14[%c0_85, %c0_86], %140 {strides = array<i32>} : memref<1x128xf32, #tpu.memory_space<vmem>>, vector<1x128xf32>,
    return
  }
  func.func @transform_0(%arg0: i32) -> (i32, i32) {
    %c0_i32 = arith.constant 0 : i32
    %c0_i32_0 = arith.constant 0 : i32
    return %arg0, %c0_i32 : i32, i32
  }
  func.func @transform_1(%arg0: i32) -> (i32, i32, i32) {
    %c0_i32 = arith.constant 0 : i32
    %c0_i32_0 = arith.constant 0 : i32
    %c0_i32_1 = arith.constant 0 : i32
    %c0_i32_2 = arith.constant 0 : i32
    return %c0_i32, %c0_i32_0, %c0_i32_1 : i32, i32, i32
  }
  func.func @transform_2(%arg0: i32) -> (i32, i32, i32) {
    %c0_i32 = arith.constant 0 : i32
    %c0_i32_0 = arith.constant 0 : i32
    %c0_i32_1 = arith.constant 0 : i32
    %c0_i32_2 = arith.constant 0 : i32
    return %c0_i32, %c0_i32_0, %c0_i32_1 : i32, i32, i32
  }
  func.func @transform_3(%arg0: i32) -> (i32, i32, i32) {
    %c0_i32 = arith.constant 0 : i32
    %c0_i32_0 = arith.constant 0 : i32
    %c0_i32_1 = arith.constant 0 : i32
    %c0_i32_2 = arith.constant 0 : i32
    return %c0_i32, %c0_i32_0, %c0_i32_1 : i32, i32, i32
  }
  func.func @transform_4(%arg0: i32) -> (i32, i32, i32) {
    %c0_i32 = arith.constant 0 : i32
    %c0_i32_0 = arith.constant 0 : i32
    %c0_i32_1 = arith.constant 0 : i32
    %c0_i32_2 = arith.constant 0 : i32
    return %c0_i32, %c0_i32_0, %c0_i32_1 : i32, i32, i32
  }
  func.func @transform_5(%arg0: i32) -> (i32, i32) {
    %c0_i32 = arith.constant 0 : i32
    %c0_i32_0 = arith.constant 0 : i32
    %c0_i32_1 = arith.constant 0 : i32
    return %c0_i32, %c0_i32_0 : i32, i32
  }
  func.func @transform_6(%arg0: i32) -> (i32, i32, i32) {
    %c0_i32 = arith.constant 0 : i32
    %c0_i32_0 = arith.constant 0 : i32
    %c0_i32_1 = arith.constant 0 : i32
    %c0_i32_2 = arith.constant 0 : i32
    return %c0_i32, %c0_i32_0, %c0_i32_1 : i32, i32, i32
  }
  func.func @transform_7(%arg0: i32) -> (i32, i32, i32) {
    %c0_i32 = arith.constant 0 : i32
    %c0_i32_0 = arith.constant 0 : i32
    %c0_i32_1 = arith.constant 0 : i32
    %c0_i32_2 = arith.constant 0 : i32
    return %c0_i32, %c0_i32_0, %c0_i32_1 : i32, i32, i32
  }
  func.func @transform_8(%arg0: i32) -> (i32, i32, i32) {
    %c0_i32 = arith.constant 0 : i32
    %c0_i32_0 = arith.constant 0 : i32
    %c0_i32_1 = arith.constant 0 : i32
    %c0_i32_2 = arith.constant 0 : i32
    return %c0_i32, %c0_i32_0, %c0_i32_1 : i32, i32, i32
  }
  func.func @transform_9(%arg0: i32) -> (i32, i32, i32) {
    %c0_i32 = arith.constant 0 : i32
    %c0_i32_0 = arith.constant 0 : i32
    %c0_i32_1 = arith.constant 0 : i32
    %c0_i32_2 = arith.constant 0 : i32
    return %c0_i32, %c0_i32_0, %c0_i32_1 : i32, i32, i32
  }
  func.func @transform_10(%arg0: i32) -> (i32, i32) {
    %c0_i32 = arith.constant 0 : i32
    %c0_i32_0 = arith.constant 0 : i32
    %c0_i32_1 = arith.constant 0 : i32
    return %c0_i32, %c0_i32_0 : i32, i32
  }
  func.func @transform_11(%arg0: i32) -> (i32, i32) {
    %c0_i32 = arith.constant 0 : i32
    %c0_i32_0 = arith.constant 0 : i32
    %c0_i32_1 = arith.constant 0 : i32
    return %c0_i32, %c0_i32_0 : i32, i32
  }
  func.func @transform_12(%arg0: i32) -> (i32, i32) {
    %c0_i32 = arith.constant 0 : i32
    %c0_i32_0 = arith.constant 0 : i32
    %c0_i32_1 = arith.constant 0 : i32
    return %c0_i32, %c0_i32_0 : i32, i32
  }
  func.func @transform_13(%arg0: i32) -> (i32, i32) {
    %c0_i32 = arith.constant 0 : i32
    %c0_i32_0 = arith.constant 0 : i32
    return %c0_i32, %arg0 : i32, i32
  }
}

</mosaic_0001>

<bundles_post_ra>
// kernel: tpu_custom_call.1
= control target key start
LH: loop header
LB: loop body
LE: loop exit
PB: predicated region body
PF: predicated region fallthrough
CT: control target
= control target key end

     0   :  { %s7646_s0 = inlined_call_operand.hbm [shape: f32[256,128], index: 0, kind: input, shape index: {}]   ;;  %s7647_s1 = inlined_call_operand.hbm [shape: f32[2,128,128], index: 1, kind: input, shape index: {}]   ;;  %s7648_s2 = inlined_call_operand.vmem [shape: f32[2,1,128], index: 2, kind: input, shape index: {}]   ;;  %s7649_s3 = inlined_call_operand.vmem [shape: f32[2,1,128], index: 3, kind: input, shape index: {}]   ;;  %s7650_s4 = inlined_call_operand.vmem [shape: f32[2,1,128], index: 4, kind: input, shape index: {}]   ;;  %s7651_s5 = inlined_call_operand.hbm [shape: f32[128,128], index: 5, kind: input, shape index: {}]   ;;  %s7652_s6 = inlined_call_operand.hbm [shape: f32[2,64,64], index: 6, kind: input, shape index: {}]   ;;  %s7653_s7 = inlined_call_operand.vmem [shape: f32[2,1,64], index: 7, kind: input, shape index: {}]   ;;  %s7654_s8 = inlined_call_operand.vmem [shape: f32[2,1,64], index: 8, kind: input, shape index: {}]   ;;  %s7655_s9 = inlined_call_operand.vmem [shape: f32[2,1,64], index: 9, kind: input, shape index: {}]   ;;  %s7656_s10 = inlined_call_operand.hbm [shape: f32[64,64], index: 10, kind: input, shape index: {}]   ;;  %s7657_s11 = inlined_call_operand.hbm [shape: f32[64,64], index: 11, kind: input, shape index: {}]   ;;  %s7658_s12 = inlined_call_operand.vmem [shape: f32[1,64], index: 12, kind: input, shape index: {}]   ;;  %s7659_s13 = inlined_call_operand.hbm [shape: f32[1,256], index: 13, kind: output, shape index: {}]  }
   0x1   :  { %7668 = sst [smem:[#allocation19_spill]] %s7646_s0 }
   0x2   :  { %7669 = sst [smem:[#allocation20_spill]] %s7647_s1 }
   0x3   :  { %7670 = sst [smem:[#allocation21_spill]] %s7653_s7 }
   0x4   :  { %7671 = sst [smem:[#allocation22_spill]] %s7654_s8 }
   0x5   :  { %7672 = sst [smem:[#allocation23_spill]] %s7655_s9 }
   0x6   :  { %7673 = sst [smem:[#allocation24_spill]] %s7658_s12 }
   0x7   :  { %7674 = sst [smem:[#allocation25_spill]] %s7659_s13 }
   0x8   :  { %18 = vsyncpa [#allocation3], 0 }
   0x9   :  { %20 = vsyncpa [#allocation3 + $0x1], 0 }
   0xa   :  { %21 = vsyncpa [#allocation6], 0 }
   0xb   :  { %22 = vsyncpa [#allocation9], 0 }
   0xc   :  { %23 = vsyncpa [#allocation12], 0 }
   0xd   :  { %24 = vsyncpa [#allocation4], 0 }
   0xe   :  { %26 = vsyncpa [#allocation4 + $0x1], 0  ;;  %s6119_s25 = smov 0   ;;  %s6121_s26 = smov 0  }
   0xf   :  { %s6123_s27 = smov 0   ;;  %s6125_s28 = smov 0  }
  0x10 LB: > { %s6038_s29 = smov [#allocation5]   ;;  %s6140_s14 = sadd.s32 4294967295, %s6036_s28   ;;  %s6036_s28 = sphi %s6125_s28, %s7704_s28   ;;  %s6032_s27 = sphi %s6123_s27, %s7703_s27   ;;  %s6028_s26 = sphi %s6121_s26, %s7702_s26   ;;  %s6024_s25 = sphi %s6119_s25, %s7701_s25  }
  0x11   : > { %s353_s30 = sshll.u32 %s6038_s29, 4  ;;  %p3991_p0 = scmp.ge.s32.totalorder %s6036_s28, 1  ;;  %s6145_s30 = int_to_ptr.vmem [resolvable:$true] %s353_s30 }
  0x12   : > { %p7664_p1 = scmp.eq.s32.totalorder %s6140_s14, 0  ;;  %p341_p2 = scmp.lt.s32.totalorder %s6036_s28, 3 }
  0x13   : > { %s6039_s16 = smov [#allocation8]   ;;  %s6040_s19 = smov [#allocation7]  }
  0x14   : > { %p6147_p3 = pnand %p3991_p0, %p341_p2  ;;  %s388_s17 = sshll.u32 %s6039_s16, 4  ;;  %s6160_s17 = int_to_ptr.vmem [resolvable:$true] %s388_s17 }
  0x15   : > { %s375_s20 = sshll.u32 %s6040_s19, 4  ;;  %s7677_s1 = sld [smem:[#allocation20_spill]]  ;;  %s6162_s20 = int_to_ptr.vmem [resolvable:$true] %s375_s20 }
  0x16   : > { %s7675_s15 = scalar_select %p6147_p3, 1, 0 }
  0x17   : > { %p5455_p5 = pneg %p6147_p3 }
  0x19   : > { %p6156_p6 = pnand %p5455_p5, %p7664_p1 }
  0x1b   : > { %s5788_s23 = scalar_lea.hbm %s7677_s1, 4096  ;;  %p6172_p8 = pneg %p6156_p6 }
  0x1c   : > { %p5789_p7 = scmp.ne.s32.totalorder %s7677_s1, %s5788_s23  ;;  %p5795_p11 = scmp.lt.u32.totalorder %s5788_s23, %s7677_s1 }
  0x1e   : > { %p5791_p9 = pnand %p6172_p8, %p5789_p7 }
  0x20   : > { %p5792_p10 = pneg %p5791_p9 }
  0x22   : > { %p5797_p12 = pnand %p5795_p11, %p5792_p10 }
  0x24   : > { %5800 = shalt.err (!%p5797_p12)
}
  0x25   : > { %s5801_s21 = scalar_lea.vmem %s6145_s30, 4096  ;;  %p5809_p5 = scmp.lt.s32.totalorder %s6145_s30, %s6145_s30 }
  0x26   : > { %p5802_p13 = scmp.ne.s32.totalorder %s6145_s30, %s5801_s21  ;;  %p5810_p4 = scmp.lt.s32.totalorder %s5801_s21, %s5801_s21 }
  0x28   : > { %p5804_p0 = pnand %p5802_p13, %p6172_p8  ;;  %p5811_p7 = por %p5810_p4, %p5809_p5 }
  0x2a   : > { %p5805_p2 = pneg %p5804_p0 }
  0x2c   : > { %p5812_p9 = pnand %p5811_p7, %p5805_p2 }
  0x2e   : > { %5815 = shalt.err (!%p5812_p9)
}
  0x2f   : > { %s7666_s22 = smov 128   ;;  %s6042_s13 = smov 8  }
  0x30   : > { %5458 = dma.hbm_to_vmem [thread:$0]  (!%p6156_p6), %s7677_s1, 4096, %s6145_s30, [#allocation6], %s7666_s22, %s7666_s22, %s6042_s13  }
  0x31   : > { %s5816_s21 = scalar_lea.hbm %s7652_s6, 2048 }
  0x32   : > { %p5817_p4 = scmp.ne.s32.totalorder %s7652_s6, %s5816_s21  ;;  %p5823_p12 = scmp.lt.u32.totalorder %s5816_s21, %s7652_s6 }
  0x34   : > { %p5819_p10 = pnand %p5817_p4, %p6172_p8 }
  0x36   : > { %p5820_p11 = pneg %p5819_p10 }
  0x38   : > { %p5825_p13 = pnand %p5823_p12, %p5820_p11 }
  0x3a   : > { %5828 = shalt.err (!%p5825_p13)
}
  0x3b   : > { %s5829_s30 = scalar_lea.vmem %s6160_s17, 2048  ;;  %p5837_p7 = scmp.lt.s32.totalorder %s6160_s17, %s6160_s17 }
  0x3c   : > { %p5830_p0 = scmp.ne.s32.totalorder %s6160_s17, %s5829_s30  ;;  %p5838_p9 = scmp.lt.s32.totalorder %s5829_s30, %s5829_s30 }
  0x3e   : > { %p5832_p2 = pnand %p5830_p0, %p6172_p8  ;;  %p5839_p4 = por %p5838_p9, %p5837_p7 }
  0x40   : > { %p5833_p5 = pneg %p5832_p2 }
  0x42   : > { %p5840_p10 = pnand %p5839_p4, %p5833_p5 }
  0x44   : > { %5843 = shalt.err (!%p5840_p10)
}
  0x45   : > { %5464 = dma.hbm_to_vmem [thread:$0]  (!%p6156_p6), %s7652_s6, 2048, %s6160_s17, [#allocation9], %s7666_s22, %s7666_s22, %s6042_s13  }
  0x46   : > { %s5844_s23 = scalar_lea.hbm %s7651_s5, 2048 }
  0x47   : > { %p5845_p11 = scmp.ne.s32.totalorder %s7651_s5, %s5844_s23  ;;  %p5851_p0 = scmp.lt.u32.totalorder %s5844_s23, %s7651_s5 }
  0x49   : > { %p5847_p12 = pnand %p5845_p11, %p6172_p8 }
  0x4b   : > { %p5848_p13 = pneg %p5847_p12 }
  0x4d   : > { %p5853_p2 = pnand %p5851_p0, %p5848_p13 }
  0x4f   : > { %5856 = shalt.err (!%p5853_p2)
}
  0x50   : > { %s5857_s17 = scalar_lea.vmem %s6162_s20, 2048  ;;  %p5865_p4 = scmp.lt.s32.totalorder %s6162_s20, %s6162_s20 }
  0x51   : > { %p5858_p5 = scmp.ne.s32.totalorder %s6162_s20, %s5857_s17  ;;  %p5866_p10 = scmp.lt.s32.totalorder %s5857_s17, %s5857_s17 }
  0x53   : > { %p5860_p7 = pnand %p5858_p5, %p6172_p8  ;;  %p5867_p11 = por %p5866_p10, %p5865_p4 }
  0x55   : > { %p5861_p9 = pneg %p5860_p7 }
  0x57   : > { %p5868_p12 = pnand %p5867_p11, %p5861_p9 }
  0x59   : > { %5871 = shalt.err (!%p5868_p12)
}
  0x5a   : > { %5461 = dma.hbm_to_vmem [thread:$0]  (!%p6156_p6), %s7651_s5, 2048, %s6162_s20, [#allocation6], %s7666_s22, %s7666_s22, %s6042_s13  }
  0x5b   : > { %s6043_s8 = smov [#allocation10]   ;;  %s6044_s12 = smov [#allocation11]  }
  0x5c   : > { %s410_s9 = sshll.u32 %s6043_s8, 4  ;;  %s423_s23 = sshll.u32 %s6044_s12, 4  ;;  %s411_s9 = int_to_ptr.vmem [resolvable:$true] %s410_s9  ;;  %s424_s23 = int_to_ptr.vmem [resolvable:$true] %s423_s23 }
  0x5d   : > { %s5872_s19 = scalar_lea.hbm %s7656_s10, 1024 }
  0x5e   : > { %p5873_p13 = scmp.ne.s32.totalorder %s7656_s10, %s5872_s19  ;;  %p5879_p5 = scmp.lt.u32.totalorder %s5872_s19, %s7656_s10 }
  0x60   : > { %p5875_p0 = pnand %p5873_p13, %p6172_p8 }
  0x62   : > { %p5876_p2 = pneg %p5875_p0 }
  0x64   : > { %p5881_p7 = pnand %p5879_p5, %p5876_p2 }
  0x66   : > { %5884 = shalt.err (!%p5881_p7)
}
  0x67   : > { %s5885_s20 = scalar_lea.vmem %s411_s9, 1024  ;;  %p5893_p11 = scmp.lt.s32.totalorder %s411_s9, %s411_s9 }
  0x68   : > { %p5886_p9 = scmp.ne.s32.totalorder %s411_s9, %s5885_s20  ;;  %p5894_p12 = scmp.lt.s32.totalorder %s5885_s20, %s5885_s20 }
  0x6a   : > { %p5888_p4 = pnand %p5886_p9, %p6172_p8  ;;  %p5895_p1 = por %p5894_p12, %p5893_p11 }
  0x6c   : > { %p5889_p10 = pneg %p5888_p4 }
  0x6e   : > { %p5896_p3 = pnand %p5895_p1, %p5889_p10 }
  0x70   : > { %5899 = shalt.err (!%p5896_p3)
}
  0x71   : > { %5467 = dma.hbm_to_vmem [thread:$0]  (!%p6156_p6), %s7656_s10, 1024, %s411_s9, [#allocation9], %s7666_s22, %s7666_s22, %s6042_s13  }
  0x72   : > { %s5900_s24 = scalar_lea.hbm %s7657_s11, 1024 }
  0x73   : > { %p5901_p1 = scmp.ne.s32.totalorder %s7657_s11, %s5900_s24  ;;  %p5907_p0 = scmp.lt.u32.totalorder %s5900_s24, %s7657_s11 }
  0x75   : > { %p5903_p3 = pnand %p5901_p1, %p6172_p8 }
  0x77   : > { %p5904_p13 = pneg %p5903_p3 }
  0x79   : > { %p5909_p2 = pnand %p5907_p0, %p5904_p13 }
  0x7b   : > { %5912 = shalt.err (!%p5909_p2)
}
  0x7c   : > { %s5913_s30 = scalar_lea.vmem %s424_s23, 1024  ;;  %p5921_p4 = scmp.lt.s32.totalorder %s424_s23, %s424_s23 }
  0x7d   : > { %p5914_p5 = scmp.ne.s32.totalorder %s424_s23, %s5913_s30  ;;  %p5922_p10 = scmp.lt.s32.totalorder %s5913_s30, %s5913_s30 }
  0x7f   : > { %p5916_p7 = pnand %p5914_p5, %p6172_p8  ;;  %p5923_p11 = por %p5922_p10, %p5921_p4 }
  0x81   : > { %p5917_p9 = pneg %p5916_p7 }
  0x83   : > { %p5924_p12 = pnand %p5923_p11, %p5917_p9 }
  0x85   : > { %5927 = shalt.err (!%p5924_p12)
}
  0x86   : > { %5470 = dma.hbm_to_vmem [thread:$0]  (!%p6156_p6), %s7657_s11, 1024, %s424_s23, [#allocation12], %s7666_s22, %s7666_s22, %s6042_s13  }
  0x87   : > { %s3990_s18 = sadd.s32 4294967294, %s6036_s28   ;;  %s6292_s16 = sadd.s32 1, %s6036_s28  }
  0x88   : > { %s39_s1 = sadd.s32 1, %s6032_s27  ;;  %s36_s7 = ssub.s32 %s6036_s28, %s6292_s16 }
  0x89   : > { %p46_p8 = scmp.ne.s32.totalorder %s6032_s27, %s6028_s26  ;;  %p37_p1 = scmp.eq.s32.totalorder %s36_s7, 0 }
  0x8a   : > { %p47_p3 = scmp.eq.s32.totalorder %s6036_s28, 0  ;;  %p52_p13 = scmp.ne.s32.totalorder %s6028_s26, %s6024_s25 }
  0x8b   : > { %p328_p0 = scmp.eq.s32.totalorder %s6140_s14, 1  ;;  %p7679_p5 = scmp.eq.s32.totalorder %s6140_s14, 0 }
  0x8c   : > { %s6304_s8 = scalar_select %p37_p1, %s6032_s27, %s39_s1  }
  0x8d   : > { %p48_p2 = por %p47_p3, %p46_p8  ;;  %p6308_p7 = por %p7679_p5, %p52_p13 }
  0x8e   : > { %p6312_p6 = por %p328_p0, %p46_p8  ;;  %p334_p9 = scmp.eq.s32.totalorder %s3990_s18, 1 }
  0x8f   : > { %p5484_p4 = scmp.lt.s32.totalorder %s6036_s28, 2  ;;  %s440_s24 = sand.u32 1, %s6032_s27  }
  0x90   : > { %s7681_s23 = scalar_select %p6312_p6, 1, 0 }
  0x91   : > { %p6318_p10 = por %p334_p9, %p52_p13  ;;  %s3998_s19 = sshll.u32 %s440_s24, 7 }
  0x92   : > { %s4142_s21 = sshll.u32 %s6036_s28, 11  ;;  %s7683_s0 = sld [smem:[#allocation19_spill]] }
  0x93   : > { %s7682_s29 = scalar_select %p6318_p10, 1, 0 }
  0x94   : > { %s444_s20 = scalar_lea.vmem [#allocation2], %s3998_s19  ;;  %p6328_p11 = pnand %p5484_p4, %p48_p2 }
  0x95   : > { %s451_s1 = sshll.u32 %s444_s20, 4  ;;  %s6334_s7 = scalar_lea.sflag [#allocation3], %s440_s24  ;;  %s6332_s1 = int_to_ptr.vmem [resolvable:$true] %s451_s1 }
  0x96   : > { %p5930_p8 = pneg %p6328_p11 }
  0x98   : > { %s6326_s9 = scalar_lea.hbm %s7683_s0, %s4142_s21  ;;  %s5933_s17 = scalar_lea.hbm %s7683_s0, 4096 }
  0x99   : > { %s5928_s22 = scalar_lea.hbm %s6326_s9, 2048  ;;  %p5934_p13 = scmp.lt.u32.totalorder %s6326_s9, %s7683_s0 }
  0x9a   : > { %p5929_p12 = scmp.ne.s32.totalorder %s6326_s9, %s5928_s22  ;;  %p5935_p0 = scmp.lt.u32.totalorder %s5933_s17, %s5928_s22 }
  0x9b   : > { %p5937_p5 = scmp.lt.u32.totalorder %s5928_s22, %s6326_s9 }
  0x9c   : > { %p5931_p1 = pnand %p5930_p8, %p5929_p12  ;;  %p5936_p2 = por %p5935_p0, %p5934_p13 }
  0x9e   : > { %p5932_p3 = pneg %p5931_p1  ;;  %p5938_p9 = por %p5937_p5, %p5936_p2 }
  0xa0   : > { %p5939_p4 = pnand %p5938_p9, %p5932_p3 }
  0xa2   : > { %5942 = shalt.err (!%p5939_p4)
}
  0xa3   : > { %s5943_s24 = scalar_lea.vmem %s6332_s1, 2048  ;;  %s6045_s19 = smov [#allocation2]  }
  0xa4   : > { %p5944_p12 = scmp.ne.s32.totalorder %s6332_s1, %s5943_s24  ;;  %s5948_s21 = sshll.u32 %s6045_s19, 4  ;;  %s5949_s21 = int_to_ptr.vmem [resolvable:$false] %s5948_s21 }
  0xa5   : > { %s5950_s30 = scalar_lea.vmem %s5949_s21, 4096  ;;  %p5951_p6 = scmp.lt.s32.totalorder %s6332_s1, %s5949_s21 }
  0xa6   : > { %p5946_p1 = pnand %p5944_p12, %p5930_p8  ;;  %p5952_p13 = scmp.lt.s32.totalorder %s5950_s30, %s5943_s24 }
  0xa8   : > { %p5947_p10 = pneg %p5946_p1  ;;  %p5953_p0 = por %p5952_p13, %p5951_p6 }
  0xaa   : > { %p5954_p2 = pnand %p5953_p0, %p5947_p10 }
  0xac   : > { %5957 = shalt.err (!%p5954_p2)
}
  0xad   : > { %s7685_s22 = smov 128   ;;  %p7686_p8 = scmp.ne.s32.totalorder %s7675_s15, 0 }
  0xae   : > { %5474 = dma.hbm_to_vmem [thread:$0]  (!%p6328_p11), %s6326_s9, 2048, %s6332_s1, %s6334_s7, %s7685_s22, %s7685_s22, %s6042_s13  }
  0xaf   : > { %463 = sbr.rel (%p7686_p8) target bundleno = 3702 (0xe76), region = 72  ;;  %s6368_s17 = sand.u32 (!%p7686_p8), 1, %s6028_s26  }
  0xb0   : > { %s4002_s20 = sshll.u32 (!%p7686_p8), %s6368_s17, 7  ;;  %s466_s24 = scalar_lea.sflag (!%p7686_p8), [#allocation3], %s6368_s17 }
  0xb1   : > { %s6372_s19 = scalar_lea.vmem (!%p7686_p8), [#allocation2], %s4002_s20 }
  0xb6   : > { %6003 = dma.done.wait (%p6308_p7), %s466_s24, 2048  }
  0xb7   : > { %6005 = vsyncadd (%p6308_p7), %s466_s24, 4294965248  ;;  %p7687_p6 = scmp.eq.s32.totalorder %s6140_s14, 0 }
  0xb9   : > { %6007 = dma.done.wait (%p7687_p6), [#allocation6], 6144   ;;  %p7688_p10 = pmov %p7687_p6 }
  0xba   : > { %p7689_p11 = pmov %p7687_p6 }
  0xbb   : > { %6009 = vsyncadd (%p7688_p10), [#allocation6], 4294961152 }
  0xbc   : > { %6011 = dma.done.wait (%p7689_p11), [#allocation9], 3072   ;;  %p7690_p3 = pmov %p7687_p6 }
  0xbe   : > { %6013 = vsyncadd (%p7690_p3), [#allocation9], 4294964224  ;;  %p7691_p5 = pmov %p7690_p3 }
  0xbf   : > { %p7692_p9 = pmov %p7690_p3 }
  0xc0   : > { %6015 = dma.done.wait (%p7691_p5), [#allocation12], 1024  }
  0xc1   : > { %6017 = vsyncadd (%p7692_p9), [#allocation12], 4294966272  ;;  %v564_v0 = vld [vmem:[#allocation5] sm:$0xff]  ;;  %v565_v1 = vld [vmem:[#allocation5 + $0x8] sm:$0xff]  ;;  %vm1935_vm0 = vcmask 523264   ;;  %s7693_s12 = sld [smem:[#allocation21_spill]] }
  0xc2   : > { %v566_v2 = vld [vmem:[#allocation5 + $0x10] sm:$0xff]  ;;  %v5119_v3 = vpack.c.bf16 %v565_v1, %v564_v0  ;;  %v567_v4 = vld [vmem:[#allocation5 + $0x18] sm:$0xff]  ;;  %v568_v6 = vld [vmem:[#allocation5 + $0x20] sm:$0xff]  ;;  %s7694_s18 = sld [smem:[#allocation22_spill]]  ;;  %s7695_s30 = sld [smem:[#allocation23_spill]]  ;;  %vm3781_vm1 = vcmask 261120  }
  0xc3   : > { %v5123_v5 = vpack.c.bf16 %v567_v4, %v566_v2  ;;  %v569_v7 = vld [vmem:[#allocation5 + $0x28] sm:$0xff]  ;;  %v532_v9 = vld [vmem:[%s6372_s19] sm:$0xff]  ;;  %v570_v10 = vld [vmem:[#allocation5 + $0x30] sm:$0xff]  ;;  %s7696_s7 = sld [smem:[#allocation24_spill]]  ;;  %s6047_s21 = smov 96  }
  0xc4   : > { %5120 = vmatprep.subr.bf16.mxu0 %v5119_v3  ;;  %v5127_v8 = vpack.c.bf16 %v569_v7, %v568_v6  ;;  %v571_v11 = vld [vmem:[#allocation5 + $0x38] sm:$0xff]  ;;  %4535 = vmatprep.mubr.f32.mxu0 %v532_v9  ;;  %v572_v13 = vld [vmem:[#allocation5 + $0x40] sm:$0xff]  ;;  %v573_v14 = vld [vmem:[#allocation5 + $0x48] sm:$0xff]  ;;  %s530_s22 = scalar_lea.vmem [#allocation13], %s6368_s17  ;;  %s4139_s24 = sshll.u32 %s6140_s14, 4 }
  0xc5   : > { %5122 = vmatpush3.bf16.msra.mxu0 %v5119_v3  ;;  %v5131_v12 = vpack.c.bf16 %v571_v11, %v570_v10  ;;  %v548_v15 = vld [vmem:[#allocation7] sm:$0xff]  ;;  %v549_v16 = vld [vmem:[#allocation7 + $0x8] sm:$0xff]  ;;  %v550_v17 = vld [vmem:[#allocation7 + $0x10] sm:$0xff]  ;;  %v5135_v21 = vpack.c.bf16 %v573_v14, %v572_v13  ;;  %s3876_s20 = sshll.u32 %s530_s22, 4  ;;  %s7697_s13 = sld [smem:[#allocation25_spill]]  ;;  %s7599_s20 = int_to_ptr.vmem [resolvable:$true] %s3876_s20 }
  0xc6   : > { %5124 = vmatprep.subr.bf16.mxu0 %v5123_v5  ;;  %v551_v18 = vld [vmem:[#allocation7 + $0x18] sm:$0xff]  ;;  %v6391_v19 = vpack.c.bf16 %v549_v16, %v548_v15  ;;  %v552_v22 = vld [vmem:[#allocation7 + $0x20] sm:$0xff]  ;;  %v553_v23 = vld [vmem:[#allocation7 + $0x28] sm:$0xff]  ;;  %s3864_s1 = scalar_lea.sflag [#allocation4], %s6368_s17  ;;  %p7698_p4 = scmp.ne.s32.totalorder %s7681_s23, 0 }
  0xc7   : > { %v6393_v20 = vpack.c.bf16 %v551_v18, %v550_v17  ;;  %v574_v24 = vld [vmem:[#allocation5 + $0x50] sm:$0xff]  ;;  %v575_v25 = vld [vmem:[#allocation5 + $0x58] sm:$0xff]  ;;  %v6398_v26 = vpack.c.bf16 %v553_v23, %v552_v22  ;;  %v576_v28 = vld [vmem:[#allocation5 + $0x60] sm:$0xff] }
  0xc8   : > { %5152 = vmatprep.subr.bf16.mxu1 %v6391_v19  ;;  %v5139_v27 = vpack.c.bf16 %v575_v25, %v574_v24  ;;  %v577_v29 = vld [vmem:[#allocation5 + $0x68] sm:$0xff]  ;;  %v578_v31 = vld [vmem:[#allocation5 + $0x70] sm:$0xff]  ;;  %v579_v32 = vld [vmem:[#allocation5 + $0x78] sm:$0xff] }
  0xc9   : > { %5126 = vmatpush3.bf16.msra.mxu0 %v5123_v5  ;;  %5154 = vmatpush3.bf16.msra.mxu1 %v6391_v19  ;;  %v5143_v30 = vpack.c.bf16 %v577_v29, %v576_v28  ;;  %v5147_v33 = vpack.c.bf16 %v579_v32, %v578_v31  ;;  %v533_v34 = vld [vmem:[%s6372_s19 + $0x8] sm:$0xff]  ;;  %v534_v35 = vld [vmem:[%s6372_s19 + $0x10] sm:$0xff]  ;;  %v535_v36 = vld [vmem:[%s6372_s19 + $0x18] sm:$0xff] }
  0xca   : > { %5128 = vmatprep.subr.bf16.mxu0 %v5127_v8  ;;  %5156 = vmatprep.subr.bf16.mxu1 %v6393_v20  ;;  %v536_v37 = vld [vmem:[%s6372_s19 + $0x20] sm:$0xff]  ;;  %v537_v38 = vld [vmem:[%s6372_s19 + $0x28] sm:$0xff]  ;;  %v538_v39 = vld [vmem:[%s6372_s19 + $0x30] sm:$0xff] }
  0xcb   : > { %v539_v40 = vld [vmem:[%s6372_s19 + $0x38] sm:$0xff]  ;;  %v540_v41 = vld [vmem:[%s6372_s19 + $0x40] sm:$0xff]  ;;  %v541_v42 = vld [vmem:[%s6372_s19 + $0x48] sm:$0xff]  ;;  %s7604_s9 = scalar_lea.hbm %s7697_s13, %s4139_s24 }
  0xcc   : > { %v542_v43 = vld [vmem:[%s6372_s19 + $0x50] sm:$0xff]  ;;  %v543_v44 = vld [vmem:[%s6372_s19 + $0x58] sm:$0xff]  ;;  %v544_v45 = vld [vmem:[%s6372_s19 + $0x60] sm:$0xff] }
  0xcd   : > { %5130 = vmatpush3.bf16.msra.mxu0 %v5127_v8  ;;  %5158 = vmatpush3.bf16.msra.mxu1 %v6393_v20  ;;  %v545_v46 = vld [vmem:[%s6372_s19 + $0x68] sm:$0xff]  ;;  %v546_v47 = vld [vmem:[%s6372_s19 + $0x70] sm:$0xff]  ;;  %v547_v48 = vld [vmem:[%s6372_s19 + $0x78] sm:$0xff]  ;;  %s6046_s19 = smov 64  }
  0xce   : > { %5132 = vmatprep.subr.bf16.mxu0 %v5131_v12  ;;  %5160 = vmatprep.subr.bf16.mxu1 %v6398_v26  ;;  %v554_v49 = vld [vmem:[#allocation7 + $0x30] sm:$0xff]  ;;  %v555_v50 = vld [vmem:[#allocation7 + $0x38] sm:$0xff]  ;;  %v556_v52 = vld [vmem:[#allocation7 + $0x40] sm:$0xff] }
  0xcf   : > { %v6424_v51 = vpack.c.bf16 %v555_v50, %v554_v49  ;;  %v557_v53 = vld [vmem:[#allocation7 + $0x48] sm:$0xff]  ;;  %v558_v55 = vld [vmem:[#allocation7 + $0x50] sm:$0xff]  ;;  %v559_v56 = vld [vmem:[#allocation7 + $0x58] sm:$0xff] }
  0xd0   : > { %v6430_v54 = vpack.c.bf16 %v557_v53, %v556_v52  ;;  %v6436_v57 = vpack.c.bf16 %v559_v56, %v558_v55  ;;  %v560_v58 = vld [vmem:[#allocation7 + $0x60] sm:$0xff]  ;;  %v561_v59 = vld [vmem:[#allocation7 + $0x68] sm:$0xff]  ;;  %v562_v61 = vld [vmem:[#allocation7 + $0x70] sm:$0xff] }
  0xd1   : > { %5134 = vmatpush3.bf16.msra.mxu0 %v5131_v12  ;;  %5162 = vmatpush3.bf16.msra.mxu1 %v6398_v26  ;;  %v6442_v60 = vpack.c.bf16 %v561_v59, %v560_v58  ;;  %v563_v62 = vld [vmem:[#allocation7 + $0x78] sm:$0xff]  ;;  %v6458_v0 = vld [vmem:[%s7648_s2] ss:$0 sm:$0xff] }
  0xd2   : > { %5136 = vmatprep.subr.bf16.mxu0 %v5135_v21  ;;  %5164 = vmatprep.subr.bf16.mxu1 %v6424_v51  ;;  %v6448_v63 = vpack.c.bf16 %v563_v62, %v562_v61 }
  0xd5   : > { %5138 = vmatpush3.bf16.msra.mxu0 %v5135_v21  ;;  %5166 = vmatpush3.bf16.msra.mxu1 %v6424_v51 }
  0xd6   : > { %5140 = vmatprep.subr.bf16.mxu0 %v5139_v27  ;;  %5168 = vmatprep.subr.bf16.mxu1 %v6430_v54 }
  0xd9   : > { %5142 = vmatpush3.bf16.msra.mxu0 %v5139_v27  ;;  %5170 = vmatpush3.bf16.msra.mxu1 %v6430_v54 }
  0xda   : > { %5144 = vmatprep.subr.bf16.mxu0 %v5143_v30  ;;  %5172 = vmatprep.subr.bf16.mxu1 %v6436_v57 }
  0xdd   : > { %5146 = vmatpush3.bf16.msra.mxu0 %v5143_v30  ;;  %5174 = vmatpush3.bf16.msra.mxu1 %v6436_v57 }
  0xde   : > { %5148 = vmatprep.subr.bf16.mxu0 %v5147_v33  ;;  %5176 = vmatprep.subr.bf16.mxu1 %v6442_v60 }
  0xe1   : > { %5150 = vmatpush3.bf16.msra.mxu0 %v5147_v33  ;;  %5178 = vmatpush3.bf16.msra.mxu1 %v6442_v60 }
  0xe2   : > { %5184 = vmatprep.subr.bf16.mxu0 %v6391_v19  ;;  %5180 = vmatprep.subr.bf16.mxu1 %v6448_v63 }
  0xe4   : > { %4536 = vmatmul.mubr.f32.vlgmr.msra.gmra.mrb[0].mxu0 %v533_v34 }
  0xe5   : > { %4538 = vmatprep.mubr.f32.mxu0 %v534_v35  ;;  %5186 = vmatpush3.bf16.msra.mxu0 %v6391_v19 }
  0xe6   : > { %5188 = vmatprep.subr.bf16.mxu0 %v6393_v20  ;;  %5182 = vmatpush3.bf16.msra.mxu1 %v6448_v63 }
  0xe8   : > { %4539 = vmatmul.mubr.f32.gmra.mrb[2].mxu0 %v535_v36 }
  0xe9   : > { %4541 = vmatprep.mubr.f32.mxu0 %v536_v37  ;;  %5190 = vmatpush3.bf16.msra.mxu0 %v6393_v20 }
  0xea   : > { %5192 = vmatprep.subr.bf16.mxu0 %v6398_v26 }
  0xec   : > { %4542 = vmatmul.mubr.f32.gmra.mrb[4].mxu0 %v537_v38 }
  0xed   : > { %4544 = vmatprep.mubr.f32.mxu0 %v538_v39  ;;  %5194 = vmatpush3.bf16.msra.mxu0 %v6398_v26 }
  0xee   : > { %5196 = vmatprep.subr.bf16.mxu0 %v6424_v51 }
  0xf0   : > { %4545 = vmatmul.mubr.f32.gmra.mrb[6].mxu0 %v539_v40 }
  0xf1   : > { %4547 = vmatprep.mubr.f32.mxu0 %v540_v41  ;;  %5198 = vmatpush3.bf16.msra.mxu0 %v6424_v51 }
  0xf2   : > { %5200 = vmatprep.subr.bf16.mxu0 %v6430_v54 }
  0xf4   : > { %4548 = vmatmul.mubr.f32.gmra.mrb[8].mxu0 %v541_v42 }
  0xf5   : > { %4550 = vmatprep.mubr.f32.mxu0 %v542_v43  ;;  %5202 = vmatpush3.bf16.msra.mxu0 %v6430_v54 }
  0xf6   : > { %5204 = vmatprep.subr.bf16.mxu0 %v6436_v57 }
  0xf8   : > { %4551 = vmatmul.mubr.f32.gmra.mrb[10].mxu0 %v543_v44 }
  0xf9   : > { %4553 = vmatprep.mubr.f32.mxu0 %v544_v45  ;;  %5206 = vmatpush3.bf16.msra.mxu0 %v6436_v57 }
  0xfa   : > { %5208 = vmatprep.subr.bf16.mxu0 %v6442_v60 }
  0xfc   : > { %4554 = vmatmul.mubr.f32.gmra.mrb[12].mxu0 %v545_v46 }
  0xfd   : > { %4556 = vmatprep.mubr.f32.mxu0 %v546_v47  ;;  %5210 = vmatpush3.bf16.msra.mxu0 %v6442_v60 }
  0xfe   : > { %5212 = vmatprep.subr.bf16.mxu0 %v6448_v63 }
 0x100   : > { %4557 = vmatmul.mubr.f32.gmra.mrb[14].mxu0 %v547_v48 }
 0x101   : > { %5214 = vmatpush3.bf16.msra.mxu0 %v6448_v63 }
 0x102   : > { %5248 = vmatprep.subr.bf16.mxu0 %v6391_v19 }
 0x1b7   : > { %v4537_v1 = vpop.f32.mrb[0].mxu0 }
 0x1b8   : > { %v659_v2 = vadd.f32 %v4537_v1, %v6458_v0  ;;  %v653_v3 = vpop.f32.mrb[1].mxu0 }
 0x1b9   : > { %v654_v4 = vadd.f32 %v6458_v0, %v653_v3 }
 0x1ba   : > { %v749_v5 = vmul.f32 0.70710677, %v659_v2  ;;  %v733_v36 = vmul.f32 0.5, %v659_v2 }
 0x1bb   : > { %v748_v6 = vmul.f32 0.70710677, %v654_v4  ;;  %v4540_v7 = vpop.f32.mrb[2].mxu0  ;;  %v732_v32 = vmul.f32 0.5, %v654_v4 }
 0x1bc   : > { %5532 = verf.f32 %v749_v5  ;;  %v669_v8 = vadd.f32 %v4540_v7, %v6458_v0  ;;  %v663_v9 = vpop.f32.mrb[3].mxu0 }
 0x1bd   : > { %5534 = verf.f32 %v748_v6  ;;  %v664_v10 = vadd.f32 %v6458_v0, %v663_v9 }
 0x1be   : > { %v751_v11 = vmul.f32 0.70710677, %v669_v8  ;;  %v735_v50 = vmul.f32 0.5, %v669_v8 }
 0x1bf   : > { %v750_v12 = vmul.f32 0.70710677, %v664_v10  ;;  %v4543_v13 = vpop.f32.mrb[4].mxu0  ;;  %v734_v46 = vmul.f32 0.5, %v664_v10 }
 0x1c0   : > { %5536 = verf.f32 %v751_v11  ;;  %v679_v14 = vadd.f32 %v4543_v13, %v6458_v0  ;;  %v673_v15 = vpop.f32.mrb[5].mxu0 }
 0x1c1   : > { %5538 = verf.f32 %v750_v12  ;;  %v674_v16 = vadd.f32 %v6458_v0, %v673_v15 }
 0x1c2   : > { %v753_v17 = vmul.f32 0.70710677, %v679_v14  ;;  %v737_v6 = vmul.f32 0.5, %v679_v14 }
 0x1c3   : > { %v752_v18 = vmul.f32 0.70710677, %v674_v16  ;;  %v4546_v21 = vpop.f32.mrb[6].mxu0  ;;  %v736_v2 = vmul.f32 0.5, %v674_v16 }
 0x1c4   : > { %5540 = verf.f32 %v753_v17  ;;  %v689_v22 = vadd.f32 %v4546_v21, %v6458_v0  ;;  %v683_v23 = vpop.f32.mrb[7].mxu0 }
 0x1c5   : > { %5542 = verf.f32 %v752_v18  ;;  %v684_v24 = vadd.f32 %v6458_v0, %v683_v23 }
 0x1c6   : > { %v5533_v25 = vpop.eup %5532  ;;  %v755_v27 = vmul.f32 0.70710677, %v689_v22  ;;  %v739_v7 = vmul.f32 0.5, %v689_v22 }
 0x1c7   : > { %v5535_v28 = vpop.eup %5534  ;;  %v781_v29 = vadd.f32 1.0, %v5533_v25  ;;  %v754_v30 = vmul.f32 0.70710677, %v684_v24  ;;  %v4549_v31 = vpop.f32.mrb[8].mxu0  ;;  %v738_v10 = vmul.f32 0.5, %v684_v24 }
 0x1c8   : > { %5544 = verf.f32 %v755_v27  ;;  %v699_v33 = vadd.f32 %v4549_v31, %v6458_v0  ;;  %v693_v34 = vpop.f32.mrb[9].mxu0  ;;  %v780_v35 = vadd.f32 1.0, %v5535_v28 }
 0x1c9   : > { %5546 = verf.f32 %v754_v30  ;;  %v694_v37 = vadd.f32 %v6458_v0, %v693_v34  ;;  %v6472_v45 = vmul.f32 %v781_v29, %v733_v36 }
 0x1ca   : > { %v5537_v38 = vpop.eup %5536  ;;  %v757_v39 = vmul.f32 0.70710677, %v699_v33  ;;  %v6470_v40 = vmul.f32 %v780_v35, %v732_v32  ;;  %v741_v23 = vmul.f32 0.5, %v699_v33 }
 0x1cb   : > { %v5539_v41 = vpop.eup %5538  ;;  %v783_v42 = vadd.f32 1.0, %v5537_v38  ;;  %v756_v43 = vmul.f32 0.70710677, %v694_v37  ;;  %v4552_v44 = vpop.f32.mrb[10].mxu0  ;;  %v740_v28 = vmul.f32 0.5, %v694_v37 }
 0x1cc   : > { %v782_v47 = vadd.f32 1.0, %v5539_v41  ;;  %5548 = verf.f32 %v757_v39  ;;  %v709_v48 = vadd.f32 %v4552_v44, %v6458_v0  ;;  %v703_v49 = vpop.f32.mrb[11].mxu0  ;;  %4591 = vmatprep.mubr.f32.mxu1 %v6470_v40 }
 0x1cd   : > { %5550 = verf.f32 %v756_v43  ;;  %v704_v52 = vadd.f32 %v6458_v0, %v703_v49  ;;  %4592 = vmatmul.mubr.f32.vlgmr.msra.gmra.mrb[0].mxu1 %v6472_v45  ;;  %v6480_v1 = vmul.f32 %v783_v42, %v735_v50 }
 0x1ce   : > { %v5541_v53 = vpop.eup %5540  ;;  %v759_v55 = vmul.f32 0.70710677, %v709_v48  ;;  %v6478_v56 = vmul.f32 %v782_v47, %v734_v46  ;;  %v743_v33 = vmul.f32 0.5, %v709_v48 }
 0x1cf   : > { %v5543_v58 = vpop.eup %5542  ;;  %v785_v59 = vadd.f32 1.0, %v5541_v53  ;;  %v758_v61 = vmul.f32 0.70710677, %v704_v52  ;;  %v4555_v62 = vpop.f32.mrb[12].mxu0  ;;  %v742_v38 = vmul.f32 0.5, %v704_v52 }
 0x1d0   : > { %v784_v3 = vadd.f32 1.0, %v5543_v58  ;;  %5552 = verf.f32 %v759_v55  ;;  %v719_v4 = vadd.f32 %v4555_v62, %v6458_v0  ;;  %v713_v5 = vpop.f32.mrb[13].mxu0  ;;  %4594 = vmatprep.mubr.f32.mxu1 %v6478_v56 }
 0x1d1   : > { %5554 = verf.f32 %v758_v61  ;;  %v714_v8 = vadd.f32 %v6458_v0, %v713_v5  ;;  %4595 = vmatmul.mubr.f32.gmra.mrb[2].mxu1 %v6480_v1  ;;  %v6488_v18 = vmul.f32 %v785_v59, %v737_v6  ;;  %v1213_v6 = vld [vmem:[#allocation5 + $0x80] sm:$0xff] }
 0x1d2   : > { %v5545_v9 = vpop.eup %5544  ;;  %v761_v11 = vmul.f32 0.70710677, %v719_v4  ;;  %v6486_v12 = vmul.f32 %v784_v3, %v736_v2  ;;  %v745_v43 = vmul.f32 0.5, %v719_v4 }
 0x1d3   : > { %v5547_v13 = vpop.eup %5546  ;;  %v787_v15 = vadd.f32 1.0, %v5545_v9  ;;  %v760_v16 = vmul.f32 0.70710677, %v714_v8  ;;  %v4558_v17 = vpop.f32.mrb[14].mxu0  ;;  %v744_v47 = vmul.f32 0.5, %v714_v8  ;;  %v1215_v8 = vld [vmem:[#allocation5 + $0x90] sm:$0xff] }
 0x1d4   : > { %v786_v21 = vadd.f32 1.0, %v5547_v13  ;;  %5556 = verf.f32 %v761_v11  ;;  %v729_v14 = vadd.f32 %v4558_v17, %v6458_v0  ;;  %v723_v22 = vpop.f32.mrb[15].mxu0  ;;  %4597 = vmatprep.mubr.f32.mxu1 %v6486_v12  ;;  %v1217_v13 = vld [vmem:[#allocation5 + $0xa0] sm:$0xff] }
 0x1d5   : > { %5558 = verf.f32 %v760_v16  ;;  %v724_v24 = vadd.f32 %v6458_v0, %v723_v22  ;;  %4598 = vmatmul.mubr.f32.gmra.mrb[4].mxu1 %v6488_v18  ;;  %v6494_v25 = vmul.f32 %v787_v15, %v739_v7  ;;  %v1214_v7 = vld [vmem:[#allocation5 + $0x88] sm:$0xff] }
 0x1d6   : > { %v5549_v27 = vpop.eup %5548  ;;  %v763_v29 = vmul.f32 0.70710677, %v729_v14  ;;  %v6496_v30 = vmul.f32 %v786_v21, %v738_v10  ;;  %v747_v52 = vmul.f32 0.5, %v729_v14  ;;  %v5215_v9 = vpack.c.bf16 %v1214_v7, %v1213_v6  ;;  %v1216_v10 = vld [vmem:[#allocation5 + $0x98] sm:$0xff]  ;;  %v1218_v15 = vld [vmem:[#allocation5 + $0xa8] sm:$0xff] }
 0x1d7   : > { %v5551_v31 = vpop.eup %5550  ;;  %v789_v32 = vadd.f32 1.0, %v5549_v27  ;;  %v762_v34 = vmul.f32 0.70710677, %v724_v24  ;;  %v746_v59 = vmul.f32 0.5, %v724_v24  ;;  %v5219_v11 = vpack.c.bf16 %v1216_v10, %v1215_v8  ;;  %v1221_v10 = vld [vmem:[#allocation5 + $0xc0] sm:$0xff] }
 0x1d8   : > { %v788_v35 = vadd.f32 1.0, %v5551_v31  ;;  %5560 = verf.f32 %v763_v29  ;;  %4600 = vmatprep.mubr.f32.mxu1 %v6496_v30  ;;  %5216 = vmatprep.subr.bf16.mxu1 %v5215_v9  ;;  %v5223_v16 = vpack.c.bf16 %v1218_v15, %v1217_v13  ;;  %v1223_v15 = vld [vmem:[#allocation5 + $0xd0] sm:$0xff] }
 0x1d9   : > { %5562 = verf.f32 %v762_v34  ;;  %4601 = vmatmul.mubr.f32.gmra.mrb[6].mxu1 %v6494_v25  ;;  %v6500_v0 = vmul.f32 %v789_v32, %v741_v23 }
 0x1da   : > { %v5553_v36 = vpop.eup %5552  ;;  %v6502_v39 = vmul.f32 %v788_v35, %v740_v28  ;;  %5218 = vmatpush3.bf16.msra.mxu1 %v5215_v9  ;;  %v1220_v9 = vld [vmem:[#allocation5 + $0xb8] sm:$0xff] }
 0x1db   : > { %v5555_v37 = vpop.eup %5554  ;;  %v791_v41 = vadd.f32 1.0, %v5553_v36  ;;  %5220 = vmatprep.subr.bf16.mxu1 %v5219_v11 }
 0x1dc   : > { %v790_v42 = vadd.f32 1.0, %v5555_v37  ;;  %4603 = vmatprep.mubr.f32.mxu1 %v6502_v39 }
 0x1dd   : > { %4604 = vmatmul.mubr.f32.gmra.mrb[8].mxu1 %v6500_v0  ;;  %v6506_v44 = vmul.f32 %v791_v41, %v743_v33 }
 0x1de   : > { %v5557_v46 = vpop.eup %5556  ;;  %v6508_v48 = vmul.f32 %v790_v42, %v742_v38  ;;  %5222 = vmatpush3.bf16.msra.mxu1 %v5219_v11  ;;  %v1222_v11 = vld [vmem:[#allocation5 + $0xc8] sm:$0xff] }
 0x1df   : > { %v5559_v49 = vpop.eup %5558  ;;  %v793_v50 = vadd.f32 1.0, %v5557_v46  ;;  %5224 = vmatprep.subr.bf16.mxu1 %v5223_v16  ;;  %v5231_v13 = vpack.c.bf16 %v1222_v11, %v1221_v10 }
 0x1e0   : > { %v792_v53 = vadd.f32 1.0, %v5559_v49  ;;  %4606 = vmatprep.mubr.f32.mxu1 %v6508_v48 }
 0x1e1   : > { %4607 = vmatmul.mubr.f32.gmra.mrb[10].mxu1 %v6506_v44  ;;  %v6512_v55 = vmul.f32 %v793_v50, %v745_v43 }
 0x1e2   : > { %v5561_v58 = vpop.eup %5560  ;;  %v6514_v61 = vmul.f32 %v792_v53, %v744_v47  ;;  %5226 = vmatpush3.bf16.msra.mxu1 %v5223_v16  ;;  %v1224_v16 = vld [vmem:[#allocation5 + $0xd8] sm:$0xff] }
 0x1e3   : > { %v5563_v62 = vpop.eup %5562  ;;  %v795_v2 = vadd.f32 1.0, %v5561_v58 }
 0x1e4   : > { %v794_v3 = vadd.f32 1.0, %v5563_v62  ;;  %4609 = vmatprep.mubr.f32.mxu1 %v6514_v61 }
 0x1e5   : > { %4610 = vmatmul.mubr.f32.gmra.mrb[12].mxu1 %v6512_v55  ;;  %v6518_v4 = vmul.f32 %v795_v2, %v747_v52 }
 0x1e6   : > { %v6520_v5 = vmul.f32 %v794_v3, %v746_v59 }
 0x1e8   : > { %4612 = vmatprep.mubr.f32.mxu1 %v6520_v5 }
 0x1e9   : > { %4613 = vmatmul.mubr.f32.gmra.mrb[14].mxu1 %v6518_v4 }
 0x2a0   : > { %v4593_v17 = vpop.f32.mrb[0].mxu1 }
 0x2a1   : > { %v6525_v21 = vsub.f32 %v6472_v45, %v4593_v17  ;;  %v878_v14 = vpop.f32.mrb[1].mxu1  ;;  %v5235_v17 = vpack.c.bf16 %v1224_v16, %v1223_v15 }
 0x2a2   : > { %v6528_v22 = vsub.f32 %v6470_v40, %v878_v14  ;;  %v1225_v14 = vld [vmem:[#allocation5 + $0xe0] sm:$0xff] }
 0x2a3   : > { %v974_v27 = vmul.f32 %v6525_v21, %v6525_v21 }
 0x2a4   : > { %v973_v23 = vmul.f32 %v6528_v22, %v6528_v22  ;;  %v4596_v24 = vpop.f32.mrb[2].mxu1 }
 0x2a5   : > { %v6535_v28 = vsub.f32 %v6480_v1, %v4596_v24  ;;  %v888_v29 = vpop.f32.mrb[3].mxu1 }
 0x2a6   : > { %v6538_v31 = vsub.f32 %v6478_v56, %v888_v29  ;;  %4647 = vmatprep.mubr.f32.mxu0 %v973_v23  ;;  %v1226_v23 = vld [vmem:[#allocation5 + $0xe8] sm:$0xff]  ;;  %v1228_v29 = vld [vmem:[#allocation5 + $0xf8] sm:$0xff] }
 0x2a7   : > { %4648 = vmatmul.mubr.f32.vlgmr.msra.gmra.mrb[16].mxu0 %v974_v27  ;;  %v976_v32 = vmul.f32 %v6535_v28, %v6535_v28  ;;  %v5239_v24 = vpack.c.bf16 %v1226_v23, %v1225_v14  ;;  %v1227_v27 = vld [vmem:[#allocation5 + $0xf0] sm:$0xff] }
 0x2a8   : > { %v975_v40 = vmul.f32 %v6538_v31, %v6538_v31  ;;  %v4599_v45 = vpop.f32.mrb[4].mxu1  ;;  %5250 = vmatpush3.bf16.msra.mxu0 %v6391_v19 }
 0x2a9   : > { %v6546_v34 = vsub.f32 %v6488_v18, %v4599_v45  ;;  %v898_v1 = vpop.f32.mrb[5].mxu1  ;;  %5252 = vmatprep.subr.bf16.mxu0 %v6393_v20 }
 0x2aa   : > { %v6550_v56 = vsub.f32 %v6486_v12, %v898_v1  ;;  %4650 = vmatprep.mubr.f32.mxu0 %v975_v40  ;;  %v5243_v40 = vpack.c.bf16 %v1228_v29, %v1227_v27 }
 0x2ab   : > { %4651 = vmatmul.mubr.f32.gmra.mrb[18].mxu0 %v976_v32  ;;  %v978_v36 = vmul.f32 %v6546_v34, %v6546_v34 }
 0x2ac   : > { %v977_v35 = vmul.f32 %v6550_v56, %v6550_v56  ;;  %v4602_v33 = vpop.f32.mrb[6].mxu1  ;;  %5254 = vmatpush3.bf16.msra.mxu0 %v6393_v20 }
 0x2ad   : > { %v6558_v18 = vsub.f32 %v6494_v25, %v4602_v33  ;;  %v908_v38 = vpop.f32.mrb[7].mxu1  ;;  %5256 = vmatprep.subr.bf16.mxu0 %v6398_v26 }
 0x2ae   : > { %v6562_v12 = vsub.f32 %v6496_v30, %v908_v38  ;;  %4653 = vmatprep.mubr.f32.mxu0 %v977_v35 }
 0x2af   : > { %4654 = vmatmul.mubr.f32.gmra.mrb[20].mxu0 %v978_v36  ;;  %v980_v42 = vmul.f32 %v6558_v18, %v6558_v18 }
 0x2b0   : > { %v979_v37 = vmul.f32 %v6562_v12, %v6562_v12  ;;  %v4605_v41 = vpop.f32.mrb[8].mxu1  ;;  %5258 = vmatpush3.bf16.msra.mxu0 %v6398_v26 }
 0x2b1   : > { %v6570_v25 = vsub.f32 %v6500_v0, %v4605_v41  ;;  %v918_v43 = vpop.f32.mrb[9].mxu1  ;;  %5260 = vmatprep.subr.bf16.mxu0 %v6424_v51 }
 0x2b2   : > { %v6574_v30 = vsub.f32 %v6502_v39, %v918_v43  ;;  %4656 = vmatprep.mubr.f32.mxu0 %v979_v37 }
 0x2b3   : > { %4657 = vmatmul.mubr.f32.gmra.mrb[22].mxu0 %v980_v42  ;;  %v982_v49 = vmul.f32 %v6570_v25, %v6570_v25 }
 0x2b4   : > { %v981_v46 = vmul.f32 %v6574_v30, %v6574_v30  ;;  %v4608_v47 = vpop.f32.mrb[10].mxu1  ;;  %5262 = vmatpush3.bf16.msra.mxu0 %v6424_v51 }
 0x2b5   : > { %v6582_v0 = vsub.f32 %v6506_v44, %v4608_v47  ;;  %v928_v50 = vpop.f32.mrb[11].mxu1  ;;  %5264 = vmatprep.subr.bf16.mxu0 %v6430_v54 }
 0x2b6   : > { %v6586_v39 = vsub.f32 %v6508_v48, %v928_v50  ;;  %4659 = vmatprep.mubr.f32.mxu0 %v981_v46 }
 0x2b7   : > { %4660 = vmatmul.mubr.f32.gmra.mrb[24].mxu0 %v982_v49  ;;  %v984_v58 = vmul.f32 %v6582_v0, %v6582_v0 }
 0x2b8   : > { %v983_v53 = vmul.f32 %v6586_v39, %v6586_v39  ;;  %v4611_v52 = vpop.f32.mrb[12].mxu1  ;;  %5266 = vmatpush3.bf16.msra.mxu0 %v6430_v54 }
 0x2b9   : > { %v6594_v44 = vsub.f32 %v6512_v55, %v4611_v52  ;;  %v938_v59 = vpop.f32.mrb[13].mxu1  ;;  %5268 = vmatprep.subr.bf16.mxu0 %v6436_v57  ;;  %v6623_v52 = vld [vmem:[%s7649_s3] ss:$0 sm:$0xff] }
 0x2ba   : > { %v6598_v48 = vsub.f32 %v6514_v61, %v938_v59  ;;  %4662 = vmatprep.mubr.f32.mxu0 %v983_v53 }
 0x2bb   : > { %4663 = vmatmul.mubr.f32.gmra.mrb[26].mxu0 %v984_v58  ;;  %v986_v3 = vmul.f32 %v6594_v44, %v6594_v44 }
 0x2bc   : > { %v985_v62 = vmul.f32 %v6598_v48, %v6598_v48  ;;  %v4614_v2 = vpop.f32.mrb[14].mxu1  ;;  %5270 = vmatpush3.bf16.msra.mxu0 %v6436_v57 }
 0x2bd   : > { %v6606_v55 = vsub.f32 %v6518_v4, %v4614_v2  ;;  %v948_v6 = vpop.f32.mrb[15].mxu1  ;;  %5272 = vmatprep.subr.bf16.mxu0 %v6442_v60  ;;  %v1219_v4 = vld [vmem:[#allocation5 + $0xb0] sm:$0xff] }
 0x2be   : > { %v6610_v61 = vsub.f32 %v6520_v5, %v948_v6  ;;  %4665 = vmatprep.mubr.f32.mxu0 %v985_v62  ;;  %v5227_v5 = vpack.c.bf16 %v1220_v9, %v1219_v4  ;;  %v6630_v6 = vld [vmem:[%s7650_s4] ss:$0 sm:$0xff] }
 0x2bf   : > { %4666 = vmatmul.mubr.f32.gmra.mrb[28].mxu0 %v986_v3  ;;  %v988_v8 = vmul.f32 %v6606_v55, %v6606_v55 }
 0x2c0   : > { %v987_v7 = vmul.f32 %v6610_v61, %v6610_v61  ;;  %5274 = vmatpush3.bf16.msra.mxu0 %v6442_v60  ;;  %5228 = vmatprep.subr.bf16.mxu1 %v5227_v5 }
 0x2c1   : > { %5276 = vmatprep.subr.bf16.mxu0 %v6448_v63  ;;  %5230 = vmatpush3.bf16.msra.mxu1 %v5227_v5 }
 0x2c2   : > { %4668 = vmatprep.mubr.f32.mxu0 %v987_v7  ;;  %5232 = vmatprep.subr.bf16.mxu1 %v5231_v13 }
 0x2c3   : > { %4669 = vmatmul.mubr.f32.gmra.mrb[30].mxu0 %v988_v8 }
 0x2c4   : > { %5278 = vmatpush3.bf16.msra.mxu0 %v6448_v63 }
 0x2c5   : > { %5234 = vmatpush3.bf16.msra.mxu1 %v5231_v13 }
 0x2c6   : > { %5236 = vmatprep.subr.bf16.mxu1 %v5235_v17 }
 0x2c9   : > { %5238 = vmatpush3.bf16.msra.mxu1 %v5235_v17 }
 0x2ca   : > { %5240 = vmatprep.subr.bf16.mxu1 %v5239_v24 }
 0x2cd   : > { %5242 = vmatpush3.bf16.msra.mxu1 %v5239_v24 }
 0x2ce   : > { %5244 = vmatprep.subr.bf16.mxu1 %v5243_v40 }
 0x2d1   : > { %5246 = vmatpush3.bf16.msra.mxu1 %v5243_v40 }
 0x2d2   : > { %5280 = vmatprep.subr.bf16.mxu1 %v6391_v19 }
 0x37a   : > { %v4649_v45 = vpop.f32.mrb[16].mxu0 }
 0x37b   : > { %v1061_v32 = vadd.f32 1e-05, %v4649_v45  ;;  %v1055_v1 = vpop.f32.mrb[17].mxu0 }
 0x37c   : > { %v1056_v35 = vadd.f32 1e-05, %v1055_v1 }
 0x37d   : > { %5564 = vrsqrt.f32 %v1061_v32 }
 0x37e   : > { %5566 = vrsqrt.f32 %v1056_v35  ;;  %v4652_v33 = vpop.f32.mrb[18].mxu0 }
 0x37f   : > { %v1071_v36 = vadd.f32 1e-05, %v4652_v33  ;;  %v1065_v38 = vpop.f32.mrb[19].mxu0 }
 0x380   : > { %v1066_v37 = vadd.f32 1e-05, %v1065_v38 }
 0x381   : > { %5568 = vrsqrt.f32 %v1071_v36 }
 0x382   : > { %5570 = vrsqrt.f32 %v1066_v37  ;;  %v4655_v41 = vpop.f32.mrb[20].mxu0 }
 0x383   : > { %v1081_v42 = vadd.f32 1e-05, %v4655_v41  ;;  %v1075_v43 = vpop.f32.mrb[21].mxu0 }
 0x384   : > { %v1076_v46 = vadd.f32 1e-05, %v1075_v43 }
 0x385   : > { %5572 = vrsqrt.f32 %v1081_v42 }
 0x386   : > { %5574 = vrsqrt.f32 %v1076_v46  ;;  %v4658_v47 = vpop.f32.mrb[22].mxu0 }
 0x387   : > { %v5565_v49 = vpop.eup %5564  ;;  %v1091_v50 = vadd.f32 1e-05, %v4658_v47  ;;  %v1085_v53 = vpop.f32.mrb[23].mxu0 }
 0x388   : > { %v5567_v58 = vpop.eup %5566  ;;  %v1151_v59 = vmul.f32 %v5565_v49, %v6525_v21  ;;  %v1086_v62 = vadd.f32 1e-05, %v1085_v53 }
 0x389   : > { %5576 = vrsqrt.f32 %v1091_v50  ;;  %v1150_v2 = vmul.f32 %v5567_v58, %v6528_v22 }
 0x38a   : > { %5578 = vrsqrt.f32 %v1086_v62  ;;  %v4661_v3 = vpop.f32.mrb[24].mxu0  ;;  %v1174_v7 = vmul.f32 %v6623_v52, %v1151_v59 }
 0x38b   : > { %v5569_v8 = vpop.eup %5568  ;;  %v1101_v4 = vadd.f32 1e-05, %v4661_v3  ;;  %v1095_v9 = vpop.f32.mrb[25].mxu0  ;;  %v1173_v5 = vmul.f32 %v6623_v52, %v1150_v2 }
 0x38c   : > { %v5571_v10 = vpop.eup %5570  ;;  %v1096_v21 = vadd.f32 1e-05, %v1095_v9  ;;  %v1153_v11 = vmul.f32 %v5569_v8, %v6535_v28  ;;  %v1197_v16 = vadd.f32 %v6630_v6, %v1174_v7 }
 0x38d   : > { %5580 = vrsqrt.f32 %v1101_v4  ;;  %v1196_v22 = vadd.f32 %v6630_v6, %v1173_v5  ;;  %v1152_v13 = vmul.f32 %v5571_v10, %v6538_v31 }
 0x38e   : > { %5582 = vrsqrt.f32 %v1096_v21  ;;  %v4664_v15 = vpop.f32.mrb[26].mxu0  ;;  %v1176_v17 = vmul.f32 %v6623_v52, %v1153_v11 }
 0x38f   : > { %v5573_v14 = vpop.eup %5572  ;;  %v1111_v23 = vadd.f32 1e-05, %v4664_v15  ;;  %v1105_v24 = vpop.f32.mrb[27].mxu0  ;;  %4703 = vmatprep.mubr.f32.mxu1 %v1196_v22  ;;  %v1175_v27 = vmul.f32 %v6623_v52, %v1152_v13 }
 0x390   : > { %v5575_v29 = vpop.eup %5574  ;;  %v1106_v40 = vadd.f32 1e-05, %v1105_v24  ;;  %4704 = vmatmul.mubr.f32.vlgmr.msra.gmra.mrb[16].mxu1 %v1197_v16  ;;  %v1155_v28 = vmul.f32 %v5573_v14, %v6546_v34  ;;  %v1199_v1 = vadd.f32 %v6630_v6, %v1176_v17 }
 0x391   : > { %5584 = vrsqrt.f32 %v1111_v23  ;;  %v1198_v31 = vadd.f32 %v6630_v6, %v1175_v27  ;;  %v1154_v45 = vmul.f32 %v5575_v29, %v6550_v56  ;;  %5282 = vmatpush3.bf16.msra.mxu1 %v6391_v19 }
 0x392   : > { %5586 = vrsqrt.f32 %v1106_v40  ;;  %v4667_v32 = vpop.f32.mrb[28].mxu0  ;;  %v1178_v35 = vmul.f32 %v6623_v52, %v1155_v28  ;;  %5284 = vmatprep.subr.bf16.mxu1 %v6393_v20 }
 0x393   : > { %v5577_v33 = vpop.eup %5576  ;;  %v1121_v36 = vadd.f32 1e-05, %v4667_v32  ;;  %v1115_v38 = vpop.f32.mrb[29].mxu0  ;;  %4706 = vmatprep.mubr.f32.mxu1 %v1198_v31  ;;  %v1177_v34 = vmul.f32 %v6623_v52, %v1154_v45 }
 0x394   : > { %v5579_v37 = vpop.eup %5578  ;;  %v1116_v41 = vadd.f32 1e-05, %v1115_v38  ;;  %4707 = vmatmul.mubr.f32.gmra.mrb[18].mxu1 %v1199_v1  ;;  %v1157_v56 = vmul.f32 %v5577_v33, %v6558_v18  ;;  %v1201_v46 = vadd.f32 %v6630_v6, %v1178_v35 }
 0x395   : > { %5588 = vrsqrt.f32 %v1121_v36  ;;  %v1200_v19 = vadd.f32 %v6630_v6, %v1177_v34  ;;  %v1156_v42 = vmul.f32 %v5579_v37, %v6562_v12  ;;  %5286 = vmatpush3.bf16.msra.mxu1 %v6393_v20 }
 0x396   : > { %5590 = vrsqrt.f32 %v1116_v41  ;;  %v4670_v43 = vpop.f32.mrb[30].mxu0  ;;  %v1180_v47 = vmul.f32 %v6623_v52, %v1157_v56  ;;  %5288 = vmatprep.subr.bf16.mxu1 %v6398_v26 }
 0x397   : > { %v5581_v49 = vpop.eup %5580  ;;  %v1131_v50 = vadd.f32 1e-05, %v4670_v43  ;;  %v1125_v53 = vpop.f32.mrb[31].mxu0  ;;  %4709 = vmatprep.mubr.f32.mxu1 %v1200_v19  ;;  %v1179_v18 = vmul.f32 %v6623_v52, %v1156_v42 }
 0x398   : > { %v5583_v58 = vpop.eup %5582  ;;  %v1126_v59 = vadd.f32 1e-05, %v1125_v53  ;;  %4710 = vmatmul.mubr.f32.gmra.mrb[20].mxu1 %v1201_v46  ;;  %v1159_v12 = vmul.f32 %v5581_v49, %v6570_v25  ;;  %v1203_v2 = vadd.f32 %v6630_v6, %v1180_v47 }
 0x399   : > { %5592 = vrsqrt.f32 %v1131_v50  ;;  %v1202_v20 = vadd.f32 %v6630_v6, %v1179_v18  ;;  %v1158_v62 = vmul.f32 %v5583_v58, %v6574_v30  ;;  %5290 = vmatpush3.bf16.msra.mxu1 %v6398_v26 }
 0x39a   : > { %5594 = vrsqrt.f32 %v1126_v59  ;;  %v1182_v3 = vmul.f32 %v6623_v52, %v1159_v12  ;;  %5292 = vmatprep.subr.bf16.mxu1 %v6424_v51 }
 0x39b   : > { %v5585_v7 = vpop.eup %5584  ;;  %4712 = vmatprep.mubr.f32.mxu1 %v1202_v20  ;;  %v1181_v8 = vmul.f32 %v6623_v52, %v1158_v62 }
 0x39c   : > { %v5587_v4 = vpop.eup %5586  ;;  %4713 = vmatmul.mubr.f32.gmra.mrb[22].mxu1 %v1203_v2  ;;  %v1161_v25 = vmul.f32 %v5585_v7, %v6582_v0  ;;  %v1205_v26 = vadd.f32 %v6630_v6, %v1182_v3 }
 0x39d   : > { %v1204_v9 = vadd.f32 %v6630_v6, %v1181_v8  ;;  %v1160_v30 = vmul.f32 %v5587_v4, %v6586_v39  ;;  %5294 = vmatpush3.bf16.msra.mxu1 %v6424_v51 }
 0x39e   : > { %v1184_v5 = vmul.f32 %v6623_v52, %v1161_v25  ;;  %5296 = vmatprep.subr.bf16.mxu1 %v6430_v54 }
 0x39f   : > { %v5589_v10 = vpop.eup %5588  ;;  %4715 = vmatprep.mubr.f32.mxu1 %v1204_v9  ;;  %v1183_v21 = vmul.f32 %v6623_v52, %v1160_v30 }
 0x3a0   : > { %v5591_v11 = vpop.eup %5590  ;;  %4716 = vmatmul.mubr.f32.gmra.mrb[24].mxu1 %v1205_v26  ;;  %v1163_v0 = vmul.f32 %v5589_v10, %v6594_v44  ;;  %v1207_v51 = vadd.f32 %v6630_v6, %v1184_v5 }
 0x3a1   : > { %v1206_v22 = vadd.f32 %v6630_v6, %v1183_v21  ;;  %v1162_v39 = vmul.f32 %v5591_v11, %v6598_v48  ;;  %5298 = vmatpush3.bf16.msra.mxu1 %v6430_v54 }
 0x3a2   : > { %v1186_v13 = vmul.f32 %v6623_v52, %v1163_v0  ;;  %5300 = vmatprep.subr.bf16.mxu1 %v6436_v57 }
 0x3a3   : > { %v5593_v15 = vpop.eup %5592  ;;  %4718 = vmatprep.mubr.f32.mxu1 %v1206_v22  ;;  %v1185_v16 = vmul.f32 %v6623_v52, %v1162_v39 }
 0x3a4   : > { %v5595_v17 = vpop.eup %5594  ;;  %4719 = vmatmul.mubr.f32.gmra.mrb[26].mxu1 %v1207_v51  ;;  %v1165_v44 = vmul.f32 %v5593_v15, %v6606_v55  ;;  %v1209_v54 = vadd.f32 %v6630_v6, %v1186_v13 }
 0x3a5   : > { %v1208_v14 = vadd.f32 %v6630_v6, %v1185_v16  ;;  %v1164_v48 = vmul.f32 %v5595_v17, %v6610_v61  ;;  %5302 = vmatpush3.bf16.msra.mxu1 %v6436_v57  ;;  %v6696_v57 = vld [vmem:[%s7648_s2 + $0x1] ss:$0 sm:$0xff] }
 0x3a6   : > { %v1188_v23 = vmul.f32 %v6623_v52, %v1165_v44  ;;  %5304 = vmatprep.subr.bf16.mxu1 %v6442_v60 }
 0x3a7   : > { %4721 = vmatprep.mubr.f32.mxu1 %v1208_v14  ;;  %v1187_v24 = vmul.f32 %v6623_v52, %v1164_v48 }
 0x3a8   : > { %4722 = vmatmul.mubr.f32.gmra.mrb[28].mxu1 %v1209_v54  ;;  %v1211_v55 = vadd.f32 %v6630_v6, %v1188_v23 }
 0x3a9   : > { %v1210_v27 = vadd.f32 %v6630_v6, %v1187_v24  ;;  %5306 = vmatpush3.bf16.msra.mxu1 %v6442_v60 }
 0x3aa   : > { %5308 = vmatprep.subr.bf16.mxu1 %v6448_v63 }
 0x3ab   : > { %4724 = vmatprep.mubr.f32.mxu1 %v1210_v27 }
 0x3ac   : > { %4725 = vmatmul.mubr.f32.gmra.mrb[30].mxu1 %v1211_v55 }
 0x3ad   : > { %5310 = vmatpush3.bf16.msra.mxu1 %v6448_v63 }
 0x463   : > { %v4705_v61 = vpop.f32.mrb[16].mxu1 }
 0x464   : > { %v1309_v52 = vadd.f32 %v4705_v61, %v6696_v57  ;;  %v1303_v29 = vpop.f32.mrb[17].mxu1 }
 0x465   : > { %v1304_v40 = vadd.f32 %v6696_v57, %v1303_v29 }
 0x466   : > { %v1399_v60 = vmul.f32 0.70710677, %v1309_v52  ;;  %v1383_v20 = vmul.f32 0.5, %v1309_v52 }
 0x467   : > { %v1398_v28 = vmul.f32 0.70710677, %v1304_v40  ;;  %v4708_v6 = vpop.f32.mrb[18].mxu1  ;;  %v1382_v18 = vmul.f32 0.5, %v1304_v40 }
 0x468   : > { %5596 = verf.f32 %v1399_v60  ;;  %v1319_v31 = vadd.f32 %v4708_v6, %v6696_v57  ;;  %v1313_v45 = vpop.f32.mrb[19].mxu1 }
 0x469   : > { %5598 = verf.f32 %v1398_v28  ;;  %v1314_v63 = vadd.f32 %v6696_v57, %v1313_v45 }
 0x46a   : > { %v1401_v32 = vmul.f32 0.70710677, %v1319_v31  ;;  %v1385_v11 = vmul.f32 0.5, %v1319_v31 }
 0x46b   : > { %v1400_v1 = vmul.f32 0.70710677, %v1314_v63  ;;  %v4711_v35 = vpop.f32.mrb[20].mxu1  ;;  %v1384_v26 = vmul.f32 0.5, %v1314_v63 }
 0x46c   : > { %5600 = verf.f32 %v1401_v32  ;;  %v1329_v33 = vadd.f32 %v4711_v35, %v6696_v57  ;;  %v1323_v36 = vpop.f32.mrb[21].mxu1 }
 0x46d   : > { %5602 = verf.f32 %v1400_v1  ;;  %v1324_v38 = vadd.f32 %v6696_v57, %v1323_v36 }
 0x46e   : > { %v1403_v34 = vmul.f32 0.70710677, %v1329_v33  ;;  %v1387_v24 = vmul.f32 0.5, %v1329_v33 }
 0x46f   : > { %v1402_v37 = vmul.f32 0.70710677, %v1324_v38  ;;  %v4714_v41 = vpop.f32.mrb[22].mxu1  ;;  %v1386_v14 = vmul.f32 0.5, %v1324_v38 }
 0x470   : > { %5604 = verf.f32 %v1403_v34  ;;  %v6705_v56 = vadd.f32 %v4714_v41, %v6696_v57  ;;  %v1333_v19 = vpop.f32.mrb[23].mxu1 }
 0x471   : > { %5606 = verf.f32 %v1402_v37  ;;  %v1334_v42 = vadd.f32 %v6696_v57, %v1333_v19 }
 0x472   : > { %v5597_v43 = vpop.eup %5596  ;;  %v1405_v46 = vmul.f32 0.70710677, %v6705_v56  ;;  %v1389_v1 = vmul.f32 0.5, %v6705_v56 }
 0x473   : > { %v5599_v47 = vpop.eup %5598  ;;  %v1431_v49 = vadd.f32 1.0, %v5597_v43  ;;  %v1404_v50 = vmul.f32 0.70710677, %v1334_v42  ;;  %v4717_v53 = vpop.f32.mrb[24].mxu1  ;;  %v1388_v31 = vmul.f32 0.5, %v1334_v42 }
 0x474   : > { %v1430_v58 = vadd.f32 1.0, %v5599_v47  ;;  %5608 = verf.f32 %v1405_v46  ;;  %v6710_v59 = vadd.f32 %v4717_v53, %v6696_v57  ;;  %v1343_v12 = vpop.f32.mrb[25].mxu1 }
 0x475   : > { %5610 = verf.f32 %v1404_v50  ;;  %v1344_v62 = vadd.f32 %v6696_v57, %v1343_v12  ;;  %v6716_v4 = vmul.f32 %v1431_v49, %v1383_v20 }
 0x476   : > { %v5601_v2 = vpop.eup %5600  ;;  %v1407_v3 = vmul.f32 0.70710677, %v6710_v59  ;;  %v6714_v7 = vmul.f32 %v1430_v58, %v1382_v18  ;;  %v1391_v56 = vmul.f32 0.5, %v6710_v59 }
 0x477   : > { %v5603_v8 = vpop.eup %5602  ;;  %v1433_v25 = vadd.f32 1.0, %v5601_v2  ;;  %v1406_v9 = vmul.f32 0.70710677, %v1344_v62  ;;  %v4720_v30 = vpop.f32.mrb[26].mxu1  ;;  %v1390_v42 = vmul.f32 0.5, %v1344_v62 }
 0x478   : > { %v1432_v5 = vadd.f32 1.0, %v5603_v8  ;;  %5612 = verf.f32 %v1407_v3  ;;  %v6719_v10 = vadd.f32 %v4720_v30, %v6696_v57  ;;  %v1353_v21 = vpop.f32.mrb[27].mxu1  ;;  %4759 = vmatprep.mubr.f32.mxu0 %v6714_v7 }
 0x479   : > { %5614 = verf.f32 %v1406_v9  ;;  %v1354_v0 = vadd.f32 %v6696_v57, %v1353_v21  ;;  %4760 = vmatmul.mubr.f32.vlgmr.msra.gmra.mrb[32].mxu0 %v6716_v4  ;;  %v6727_v44 = vmul.f32 %v1433_v25, %v1385_v11 }
 0x47a   : > { %v5605_v22 = vpop.eup %5604  ;;  %v1409_v39 = vmul.f32 0.70710677, %v6719_v10  ;;  %v6725_v51 = vmul.f32 %v1432_v5, %v1384_v26  ;;  %v1393_v58 = vmul.f32 0.5, %v6719_v10 }
 0x47b   : > { %v5607_v13 = vpop.eup %5606  ;;  %v1435_v15 = vadd.f32 1.0, %v5605_v22  ;;  %v1408_v16 = vmul.f32 0.70710677, %v1354_v0  ;;  %v4723_v17 = vpop.f32.mrb[28].mxu1  ;;  %v1392_v53 = vmul.f32 0.5, %v1354_v0 }
 0x47c   : > { %v1434_v48 = vadd.f32 1.0, %v5607_v13  ;;  %5616 = verf.f32 %v1409_v39  ;;  %v1369_v54 = vadd.f32 %v4723_v17, %v6696_v57  ;;  %v1363_v23 = vpop.f32.mrb[29].mxu1  ;;  %4762 = vmatprep.mubr.f32.mxu0 %v6725_v51 }
 0x47d   : > { %5618 = verf.f32 %v1408_v16  ;;  %v1364_v27 = vadd.f32 %v6696_v57, %v1363_v23  ;;  %4763 = vmatmul.mubr.f32.gmra.mrb[34].mxu0 %v6727_v44  ;;  %v6735_v6 = vmul.f32 %v1435_v15, %v1387_v24 }
 0x47e   : > { %v5609_v55 = vpop.eup %5608  ;;  %v1411_v61 = vmul.f32 0.70710677, %v1369_v54  ;;  %v6733_v52 = vmul.f32 %v1434_v48, %v1386_v14  ;;  %v1395_v25 = vmul.f32 0.5, %v1369_v54 }
 0x47f   : > { %v5611_v29 = vpop.eup %5610  ;;  %v1437_v40 = vadd.f32 1.0, %v5609_v55  ;;  %v1410_v60 = vmul.f32 0.70710677, %v1364_v27  ;;  %v4726_v28 = vpop.f32.mrb[30].mxu1  ;;  %v1394_v3 = vmul.f32 0.5, %v1364_v27 }
 0x480   : > { %v1436_v45 = vadd.f32 1.0, %v5611_v29  ;;  %5620 = verf.f32 %v1411_v61  ;;  %v1379_v63 = vadd.f32 %v4726_v28, %v6696_v57  ;;  %v1373_v32 = vpop.f32.mrb[31].mxu1  ;;  %4765 = vmatprep.mubr.f32.mxu0 %v6733_v52 }
 0x481   : > { %5622 = verf.f32 %v1410_v60  ;;  %v1374_v35 = vadd.f32 %v6696_v57, %v1373_v32  ;;  %4766 = vmatmul.mubr.f32.gmra.mrb[36].mxu0 %v6735_v6  ;;  %v6744_v19 = vmul.f32 %v1437_v40, %v1389_v1 }
 0x482   : > { %v5613_v33 = vpop.eup %5612  ;;  %v1413_v36 = vmul.f32 0.70710677, %v1379_v63  ;;  %v6742_v38 = vmul.f32 %v1436_v45, %v1388_v31  ;;  %v1397_v0 = vmul.f32 0.5, %v1379_v63 }
 0x483   : > { %v5615_v34 = vpop.eup %5614  ;;  %v1439_v37 = vadd.f32 1.0, %v5613_v33  ;;  %v1412_v41 = vmul.f32 0.70710677, %v1374_v35  ;;  %v1396_v11 = vmul.f32 0.5, %v1374_v35 }
 0x484   : > { %v1438_v43 = vadd.f32 1.0, %v5615_v34  ;;  %5624 = verf.f32 %v1413_v36  ;;  %4768 = vmatprep.mubr.f32.mxu0 %v6742_v38 }
 0x485   : > { %5626 = verf.f32 %v1412_v41  ;;  %4769 = vmatmul.mubr.f32.gmra.mrb[38].mxu0 %v6744_v19  ;;  %v1455_v50 = vmul.f32 %v1439_v37, %v1391_v56 }
 0x486   : > { %v5617_v57 = vpop.eup %5616  ;;  %v6749_v46 = vmul.f32 %v1438_v43, %v1390_v42 }
 0x487   : > { %v5619_v47 = vpop.eup %5618  ;;  %v1441_v49 = vadd.f32 1.0, %v5617_v57 }
 0x488   : > { %v1440_v18 = vadd.f32 1.0, %v5619_v47  ;;  %4771 = vmatprep.mubr.f32.mxu0 %v6749_v46 }
 0x489   : > { %4772 = vmatmul.mubr.f32.gmra.mrb[40].mxu0 %v1455_v50  ;;  %v1457_v2 = vmul.f32 %v1441_v49, %v1393_v58 }
 0x48a   : > { %v5621_v12 = vpop.eup %5620  ;;  %v6753_v20 = vmul.f32 %v1440_v18, %v1392_v53 }
 0x48b   : > { %v5623_v59 = vpop.eup %5622  ;;  %v1443_v62 = vadd.f32 1.0, %v5621_v12 }
 0x48c   : > { %v1442_v8 = vadd.f32 1.0, %v5623_v59  ;;  %4774 = vmatprep.mubr.f32.mxu0 %v6753_v20  ;;  %v1872_v59 = vld [vmem:[#allocation8] sm:$0xff] }
 0x48d   : > { %4775 = vmatmul.mubr.f32.gmra.mrb[42].mxu0 %v1457_v2  ;;  %v1459_v21 = vmul.f32 %v1443_v62, %v1395_v25  ;;  %v1873_v62 = vld [vmem:[#allocation8 + $0x8] sm:$0xff] }
 0x48e   : > { %v5625_v9 = vpop.eup %5624  ;;  %v1458_v30 = vmul.f32 %v1442_v8, %v1394_v3  ;;  %v5311_v3 = vpack.c.bf16 %v1873_v62, %v1872_v59  ;;  %v1875_v8 = vld [vmem:[#allocation8 + $0x18] sm:$0xff] }
 0x48f   : > { %v5627_v26 = vpop.eup %5626  ;;  %v1445_v5 = vadd.f32 1.0, %v5625_v9  ;;  %v1876_v9 = vld [vmem:[#allocation8 + $0x20] sm:$0xff] }
 0x490   : > { %v1444_v10 = vadd.f32 1.0, %v5627_v26  ;;  %4777 = vmatprep.mubr.f32.mxu0 %v1458_v30  ;;  %5312 = vmatprep.subr.bf16.mxu0 %v5311_v3 }
 0x491   : > { %4778 = vmatmul.mubr.f32.gmra.mrb[44].mxu0 %v1459_v21  ;;  %v1461_v39 = vmul.f32 %v1445_v5, %v1397_v0  ;;  %5423 = vmatprep.subr.bf16.mxu1 %v5311_v3  ;;  %v1878_v5 = vld [vmem:[#allocation8 + $0x30] sm:$0xff] }
 0x492   : > { %v1460_v22 = vmul.f32 %v1444_v10, %v1396_v11  ;;  %5314 = vmatpush3.bf16.msra.mxu0 %v5311_v3 }
 0x494   : > { %4780 = vmatprep.mubr.f32.mxu0 %v1460_v22 }
 0x495   : > { %4781 = vmatmul.mubr.f32.gmra.mrb[46].mxu0 %v1461_v39 }
 0x54c   : > { %v4761_v13 = vpop.f32.mrb[32].mxu0 }
 0x54d   : > { %v6757_v15 = vsub.f32 %v6716_v4, %v4761_v13  ;;  %v1528_v16 = vpop.f32.mrb[33].mxu0 }
 0x54e   : > { %v6760_v17 = vsub.f32 %v6714_v7, %v1528_v16 }
 0x54f   : > { %v1624_v54 = vmul.f32 %v6757_v15, %v6757_v15 }
 0x550   : > { %v1623_v14 = vmul.f32 %v6760_v17, %v6760_v17  ;;  %v4764_v48 = vpop.f32.mrb[34].mxu0 }
 0x551   : > { %v6767_v23 = vsub.f32 %v6727_v44, %v4764_v48  ;;  %v1538_v24 = vpop.f32.mrb[35].mxu0 }
 0x552   : > { %v6770_v27 = vsub.f32 %v6725_v51, %v1538_v24  ;;  %4815 = vmatprep.mubr.f32.mxu1 %v1623_v14 }
 0x553   : > { %4816 = vmatmul.mubr.f32.vlgmr.msra.gmra.mrb[32].mxu1 %v1624_v54  ;;  %v1626_v55 = vmul.f32 %v6767_v23, %v6767_v23 }
 0x554   : > { %v1625_v7 = vmul.f32 %v6770_v27, %v6770_v27  ;;  %v4767_v4 = vpop.f32.mrb[36].mxu0  ;;  %5427 = vmatpush3.bf16.msra.mxu1 %v5311_v3 }
 0x555   : > { %v6777_v61 = vsub.f32 %v6735_v6, %v4767_v4  ;;  %v1548_v29 = vpop.f32.mrb[37].mxu0 }
 0x556   : > { %v6780_v44 = vsub.f32 %v6733_v52, %v1548_v29  ;;  %4818 = vmatprep.mubr.f32.mxu1 %v1625_v7 }
 0x557   : > { %4819 = vmatmul.mubr.f32.gmra.mrb[34].mxu1 %v1626_v55  ;;  %v1628_v60 = vmul.f32 %v6777_v61, %v6777_v61 }
 0x558   : > { %v1627_v51 = vmul.f32 %v6780_v44, %v6780_v44  ;;  %v4770_v40 = vpop.f32.mrb[38].mxu0 }
 0x559   : > { %v6787_v28 = vsub.f32 %v6744_v19, %v4770_v40  ;;  %v1558_v31 = vpop.f32.mrb[39].mxu0 }
 0x55a   : > { %v6790_v6 = vsub.f32 %v6742_v38, %v1558_v31  ;;  %4821 = vmatprep.mubr.f32.mxu1 %v1627_v51 }
 0x55b   : > { %4822 = vmatmul.mubr.f32.gmra.mrb[36].mxu1 %v1628_v60  ;;  %v1630_v63 = vmul.f32 %v6787_v28, %v6787_v28 }
 0x55c   : > { %v1629_v52 = vmul.f32 %v6790_v6, %v6790_v6  ;;  %v4773_v45 = vpop.f32.mrb[40].mxu0 }
 0x55d   : > { %v6796_v32 = vsub.f32 %v1455_v50, %v4773_v45  ;;  %v1568_v1 = vpop.f32.mrb[41].mxu0 }
 0x55e   : > { %v6799_v35 = vsub.f32 %v6749_v46, %v1568_v1  ;;  %4824 = vmatprep.mubr.f32.mxu1 %v1629_v52  ;;  %v6833_v52 = vld [vmem:[%s7649_s3 + $0x1] ss:$0 sm:$0xff] }
 0x55f   : > { %4825 = vmatmul.mubr.f32.gmra.mrb[38].mxu1 %v1630_v63  ;;  %v1632_v38 = vmul.f32 %v6796_v32, %v6796_v32 }
 0x560   : > { %v1631_v33 = vmul.f32 %v6799_v35, %v6799_v35  ;;  %v4776_v36 = vpop.f32.mrb[42].mxu0 }
 0x561   : > { %v6805_v34 = vsub.f32 %v1457_v2, %v4776_v36  ;;  %v1578_v37 = vpop.f32.mrb[43].mxu0  ;;  %v1874_v2 = vld [vmem:[#allocation8 + $0x10] sm:$0xff] }
 0x562   : > { %v6808_v41 = vsub.f32 %v6753_v20, %v1578_v37  ;;  %4827 = vmatprep.mubr.f32.mxu1 %v1631_v33  ;;  %v5315_v25 = vpack.c.bf16 %v1875_v8, %v1874_v2  ;;  %v6840_v33 = vld [vmem:[%s7650_s4 + $0x1] ss:$0 sm:$0xff] }
 0x563   : > { %4828 = vmatmul.mubr.f32.gmra.mrb[40].mxu1 %v1632_v38  ;;  %v1634_v43 = vmul.f32 %v6805_v34, %v6805_v34 }
 0x564   : > { %v1633_v19 = vmul.f32 %v6808_v41, %v6808_v41  ;;  %v4779_v42 = vpop.f32.mrb[44].mxu0  ;;  %5316 = vmatprep.subr.bf16.mxu0 %v5315_v25  ;;  %5424 = vmatprep.subr.bf16.mxu1 %v5315_v25 }
 0x565   : > { %v6814_v56 = vsub.f32 %v1459_v21, %v4779_v42  ;;  %v1588_v57 = vpop.f32.mrb[45].mxu0  ;;  %v1879_v21 = vld [vmem:[#allocation8 + $0x38] sm:$0xff]  ;;  %5318 = vmatpush3.bf16.msra.mxu0 %v5315_v25  ;;  %5428 = vmatpush3.bf16.msra.mxu1 %v5315_v25 }
 0x566   : > { %v6816_v46 = vsub.f32 %v1458_v30, %v1588_v57  ;;  %4830 = vmatprep.mubr.f32.mxu1 %v1633_v19  ;;  %v1877_v30 = vld [vmem:[#allocation8 + $0x28] sm:$0xff]  ;;  %v5323_v11 = vpack.c.bf16 %v1879_v21, %v1878_v5 }
 0x567   : > { %4831 = vmatmul.mubr.f32.gmra.mrb[42].mxu1 %v1634_v43  ;;  %v1636_v50 = vmul.f32 %v6814_v56, %v6814_v56  ;;  %v5319_v26 = vpack.c.bf16 %v1877_v30, %v1876_v9 }
 0x568   : > { %v1635_v47 = vmul.f32 %v6816_v46, %v6816_v46  ;;  %v4782_v49 = vpop.f32.mrb[46].mxu0 }
 0x569   : > { %v6822_v53 = vsub.f32 %v1461_v39, %v4782_v49  ;;  %v1598_v18 = vpop.f32.mrb[47].mxu0  ;;  %5320 = vmatprep.subr.bf16.mxu0 %v5319_v26  ;;  %5425 = vmatprep.subr.bf16.mxu1 %v5319_v26 }
 0x56a   : > { %v6824_v58 = vsub.f32 %v1460_v22, %v1598_v18  ;;  %4833 = vmatprep.mubr.f32.mxu1 %v1635_v47  ;;  %5322 = vmatpush3.bf16.msra.mxu0 %v5319_v26 }
 0x56b   : > { %4834 = vmatmul.mubr.f32.gmra.mrb[44].mxu1 %v1636_v50  ;;  %v1638_v20 = vmul.f32 %v6822_v53, %v6822_v53  ;;  %5324 = vmatprep.subr.bf16.mxu0 %v5323_v11 }
 0x56c   : > { %v1637_v12 = vmul.f32 %v6824_v58, %v6824_v58  ;;  %5429 = vmatpush3.bf16.msra.mxu1 %v5319_v26 }
 0x56d   : > { %5426 = vmatprep.subr.bf16.mxu1 %v5323_v11 }
 0x56e   : > { %4836 = vmatprep.mubr.f32.mxu1 %v1637_v12  ;;  %5326 = vmatpush3.bf16.msra.mxu0 %v5323_v11 }
 0x56f   : > { %4837 = vmatmul.mubr.f32.gmra.mrb[46].mxu1 %v1638_v20 }
 0x570   : > { %5430 = vmatpush3.bf16.msra.mxu1 %v5323_v11 }
 0x626   : > { %v4817_v10 = vpop.f32.mrb[32].mxu1 }
 0x627   : > { %v1711_v0 = vadd.f32 1e-05, %v4817_v10  ;;  %v1705_v22 = vpop.f32.mrb[33].mxu1 }
 0x628   : > { %v1706_v39 = vadd.f32 1e-05, %v1705_v22 }
 0x629   : > { %5628 = vrsqrt.f32 %v1711_v0 }
 0x62a   : > { %5630 = vrsqrt.f32 %v1706_v39  ;;  %v4820_v13 = vpop.f32.mrb[34].mxu1 }
 0x62b   : > { %v1721_v16 = vadd.f32 1e-05, %v4820_v13  ;;  %v1715_v14 = vpop.f32.mrb[35].mxu1 }
 0x62c   : > { %v1716_v48 = vadd.f32 1e-05, %v1715_v14 }
 0x62d   : > { %5632 = vrsqrt.f32 %v1721_v16 }
 0x62e   : > { %5634 = vrsqrt.f32 %v1716_v48  ;;  %v4823_v54 = vpop.f32.mrb[36].mxu1 }
 0x62f   : > { %v1731_v24 = vadd.f32 1e-05, %v4823_v54  ;;  %v1725_v7 = vpop.f32.mrb[37].mxu1 }
 0x630   : > { %v1726_v4 = vadd.f32 1e-05, %v1725_v7 }
 0x631   : > { %5636 = vrsqrt.f32 %v1731_v24 }
 0x632   : > { %5638 = vrsqrt.f32 %v1726_v4  ;;  %v4826_v55 = vpop.f32.mrb[38].mxu1 }
 0x633   : > { %v5629_v29 = vpop.eup %5628  ;;  %v1741_v51 = vadd.f32 1e-05, %v4826_v55  ;;  %v1735_v40 = vpop.f32.mrb[39].mxu1 }
 0x634   : > { %v5631_v60 = vpop.eup %5630  ;;  %v1736_v31 = vadd.f32 1e-05, %v1735_v40  ;;  %v1801_v45 = vmul.f32 %v5629_v29, %v6757_v15 }
 0x635   : > { %5640 = vrsqrt.f32 %v1741_v51  ;;  %v1800_v63 = vmul.f32 %v5631_v60, %v6760_v17 }
 0x636   : > { %5642 = vrsqrt.f32 %v1736_v31  ;;  %v4829_v1 = vpop.f32.mrb[40].mxu1  ;;  %v1825_v57 = vmul.f32 %v6833_v52, %v1801_v45 }
 0x637   : > { %v5633_v36 = vpop.eup %5632  ;;  %v1751_v38 = vadd.f32 1e-05, %v4829_v1  ;;  %v1745_v37 = vpop.f32.mrb[41].mxu1  ;;  %v1824_v19 = vmul.f32 %v6833_v52, %v1800_v63 }
 0x638   : > { %v5635_v42 = vpop.eup %5634  ;;  %v1746_v43 = vadd.f32 1e-05, %v1745_v37  ;;  %v1803_v47 = vmul.f32 %v5633_v36, %v6767_v23  ;;  %v6853_v2 = vadd.f32 %v6840_v33, %v1825_v57 }
 0x639   : > { %5644 = vrsqrt.f32 %v1751_v38  ;;  %v6845_v15 = vadd.f32 %v6840_v33, %v1824_v19  ;;  %v1802_v17 = vmul.f32 %v5635_v42, %v6770_v27 }
 0x63a   : > { %5646 = vrsqrt.f32 %v1746_v43  ;;  %v4832_v49 = vpop.f32.mrb[42].mxu1  ;;  %v1827_v3 = vmul.f32 %v6833_v52, %v1803_v47 }
 0x63b   : > { %v5637_v50 = vpop.eup %5636  ;;  %v1761_v18 = vadd.f32 1e-05, %v4832_v49  ;;  %v1755_v12 = vpop.f32.mrb[43].mxu1  ;;  %1903 = vrot.lane.b32.xlu0 %v6845_v15, %s6046_s19  ;;  %v1826_v20 = vmul.f32 %v6833_v52, %v1802_v17 }
 0x63c   : > { %v5639_v59 = vpop.eup %5638  ;;  %v1756_v62 = vadd.f32 1e-05, %v1755_v12  ;;  %v1805_v27 = vmul.f32 %v5637_v50, %v6777_v61 }
 0x63d   : > { %5648 = vrsqrt.f32 %v1761_v18  ;;  %v6857_v23 = vadd.f32 %v6840_v33, %v1826_v20  ;;  %v1804_v8 = vmul.f32 %v5639_v59, %v6780_v44  ;;  %v6869_v44 = vadd.f32 %v6840_v33, %v1827_v3 }
 0x63e   : > { %5650 = vrsqrt.f32 %v1756_v62  ;;  %v4835_v25 = vpop.f32.mrb[44].mxu1  ;;  %v1829_v11 = vmul.f32 %v6833_v52, %v1805_v27 }
 0x63f   : > { %v5641_v9 = vpop.eup %5640  ;;  %v1771_v30 = vadd.f32 1e-05, %v4835_v25  ;;  %v1765_v26 = vpop.f32.mrb[45].mxu1  ;;  %1907 = vrot.lane.b32.xlu1 %v6857_v23, %s6046_s19  ;;  %1905 = vrot.lane.b32.xlu0 %v6853_v2, %s6046_s19  ;;  %v1828_v61 = vmul.f32 %v6833_v52, %v1804_v8 }
 0x640   : > { %v5643_v5 = vpop.eup %5642  ;;  %v1766_v21 = vadd.f32 1e-05, %v1765_v26  ;;  %v1807_v10 = vmul.f32 %v5641_v9, %v6787_v28  ;;  %v6881_v24 = vadd.f32 %v6840_v33, %v1829_v11 }
 0x641   : > { %5652 = vrsqrt.f32 %v1771_v30  ;;  %v6872_v0 = vadd.f32 %v6840_v33, %v1828_v61  ;;  %v1806_v22 = vmul.f32 %v5643_v5, %v6790_v6 }
 0x642   : > { %5654 = vrsqrt.f32 %v1766_v21  ;;  %v4838_v39 = vpop.f32.mrb[46].mxu1  ;;  %v1831_v6 = vmul.f32 %v6833_v52, %v1807_v10  ;;  %v1864_v10 = vld [vmem:[#allocation10] sm:$0xff] }
 0x643   : > { %v5645_v13 = vpop.eup %5644  ;;  %v1781_v16 = vadd.f32 1e-05, %v4838_v39  ;;  %1909 = vrot.lane.b32.xlu1 %v6869_v44, %s6046_s19  ;;  %1911 = vrot.lane.b32.xlu0 %v6872_v0, %s6046_s19  ;;  %v1775_v28 = vpop.f32.mrb[47].mxu1  ;;  %v1830_v14 = vmul.f32 %v6833_v52, %v1806_v22  ;;  %v1865_v22 = vld [vmem:[#allocation10 + $0x8] sm:$0xff] }
 0x644   : > { %v5647_v48 = vpop.eup %5646  ;;  %v1776_v54 = vadd.f32 1e-05, %v1775_v28  ;;  %v1809_v55 = vmul.f32 %v5645_v13, %v6796_v32  ;;  %v6896_v31 = vadd.f32 %v6840_v33, %v1831_v6  ;;  %v6968_v39 = vpack.c.bf16 %v1865_v22, %v1864_v10  ;;  %v1866_v13 = vld [vmem:[#allocation10 + $0x10] sm:$0xff] }
 0x645   : > { %5656 = vrsqrt.f32 %v1781_v16  ;;  %v6885_v7 = vadd.f32 %v6840_v33, %v1830_v14  ;;  %v1808_v4 = vmul.f32 %v5647_v48, %v6799_v35  ;;  %v1867_v16 = vld [vmem:[#allocation10 + $0x18] sm:$0xff]  ;;  %v1868_v14 = vld [vmem:[#allocation10 + $0x20] sm:$0xff]  ;;  %v1869_v48 = vld [vmem:[#allocation10 + $0x28] sm:$0xff] }
 0x646   : > { %5658 = vrsqrt.f32 %v1776_v54  ;;  %v1833_v32 = vmul.f32 %v6833_v52, %v1809_v55  ;;  %5328 = vmatprep.subr.bf16.mxu1 %v6968_v39  ;;  %5344 = vmatprep.subr.bf16.mxu0 %v6968_v39  ;;  %v6974_v28 = vpack.c.bf16 %v1867_v16, %v1866_v13  ;;  %v6980_v54 = vpack.c.bf16 %v1869_v48, %v1868_v14  ;;  %v1870_v6 = vld [vmem:[#allocation10 + $0x30] sm:$0xff] }
 0x647   : > { %v5649_v29 = vpop.eup %5648  ;;  %1913 = vrot.lane.b32.xlu1 %v6881_v24, %s6046_s19  ;;  %1915 = vrot.lane.b32.xlu0 %v6885_v7, %s6046_s19  ;;  %v1832_v51 = vmul.f32 %v6833_v52, %v1808_v4  ;;  %v1871_v4 = vld [vmem:[#allocation10 + $0x38] sm:$0xff] }
 0x648   : > { %v5651_v40 = vpop.eup %5650  ;;  %v1811_v60 = vmul.f32 %v5649_v29, %v6805_v34  ;;  %v6910_v38 = vadd.f32 %v6840_v33, %v1833_v32  ;;  %v6986_v55 = vpack.c.bf16 %v1871_v4, %v1870_v6  ;;  %v6996_v29 = vld [vmem:[%s7693_s12] ss:$0 sm:$0xff] }
 0x649   : > { %v6899_v35 = vadd.f32 %v6840_v33, %v1832_v51  ;;  %v1810_v45 = vmul.f32 %v5651_v40, %v6808_v41 }
 0x64a   : > { %v1835_v36 = vmul.f32 %v6833_v52, %v1811_v60 }
 0x64b   : > { %v5653_v63 = vpop.eup %5652  ;;  %1917 = vrot.lane.b32.xlu1 %v6896_v31, %s6046_s19  ;;  %1919 = vrot.lane.b32.xlu0 %v6899_v35, %s6046_s19  ;;  %v1834_v1 = vmul.f32 %v6833_v52, %v1810_v45 }
 0x64c   : > { %v5655_v34 = vpop.eup %5654  ;;  %v1813_v19 = vmul.f32 %v5653_v63, %v6814_v56  ;;  %v6923_v17 = vadd.f32 %v6840_v33, %v1835_v36 }
 0x64d   : > { %v6913_v37 = vadd.f32 %v6840_v33, %v1834_v1  ;;  %v1812_v41 = vmul.f32 %v5655_v34, %v6816_v46 }
 0x64e   : > { %v1837_v46 = vmul.f32 %v6833_v52, %v1813_v19 }
 0x64f   : > { %v5657_v42 = vpop.eup %5656  ;;  %1921 = vrot.lane.b32.xlu1 %v6910_v38, %s6046_s19  ;;  %1923 = vrot.lane.b32.xlu0 %v6913_v37, %s6046_s19  ;;  %v1836_v43 = vmul.f32 %v6833_v52, %v1812_v41 }
 0x650   : > { %v5659_v57 = vpop.eup %5658  ;;  %v1815_v49 = vmul.f32 %v5657_v42, %v6822_v53  ;;  %v6937_v18 = vadd.f32 %v6840_v33, %v1837_v46 }
 0x651   : > { %v6926_v47 = vadd.f32 %v6840_v33, %v1836_v43  ;;  %v1814_v56 = vmul.f32 %v5659_v57, %v6824_v58 }
 0x652   : > { %v1839_v20 = vmul.f32 %v6833_v52, %v1815_v49 }
 0x653   : > { %1925 = vrot.lane.b32.xlu1 %v6923_v17, %s6046_s19  ;;  %1927 = vrot.lane.b32.xlu0 %v6926_v47, %s6046_s19  ;;  %v1838_v50 = vmul.f32 %v6833_v52, %v1814_v56 }
 0x654   : > { %v6948_v53 = vadd.f32 %v6840_v33, %v1839_v20 }
 0x655   : > { %v6940_v12 = vadd.f32 %v6840_v33, %v1838_v50 }
 0x657   : > { %1929 = vrot.lane.b32.xlu1 %v6937_v18, %s6046_s19  ;;  %1931 = vrot.lane.b32.xlu0 %v6940_v12, %s6046_s19 }
 0x65b   : > { %1933 = vrot.lane.b32.xlu1 %v6948_v53, %s6046_s19 }
 0x6ad   : > { %v1904_v58 = vpop.permute.xlu0 %1903 }
 0x6ae   : > { %4855 = vmatprep.mubr.msk.f32.mxu0 %vm1935_vm0, %v1904_v58 }
 0x6b1   : > { %v1908_v59 = vpop.permute.xlu1 %1907  ;;  %v1906_v62 = vpop.permute.xlu0 %1905 }
 0x6b2   : > { %4856 = vmatmul.mubr.msk.f32.vlgmr.msra.gmra.mrb[48].mxu0 %vm1935_vm0, %v1906_v62 }
 0x6b3   : > { %4858 = vmatprep.mubr.msk.f32.mxu0 %vm1935_vm0, %v1908_v59  ;;  %5346 = vmatpush3.bf16.msra.mxu0 %v6968_v39 }
 0x6b4   : > { %5348 = vmatprep.subr.bf16.mxu0 %v6974_v28 }
 0x6b5   : > { %v1910_v52 = vpop.permute.xlu1 %1909  ;;  %v1912_v27 = vpop.permute.xlu0 %1911 }
 0x6b6   : > { %4859 = vmatmul.mubr.msk.f32.gmra.mrb[50].mxu0 %vm1935_vm0, %v1910_v52 }
 0x6b7   : > { %4861 = vmatprep.mubr.msk.f32.mxu0 %vm1935_vm0, %v1912_v27  ;;  %5350 = vmatpush3.bf16.msra.mxu0 %v6974_v28 }
 0x6b8   : > { %5352 = vmatprep.subr.bf16.mxu0 %v6980_v54 }
 0x6b9   : > { %v1914_v33 = vpop.permute.xlu1 %1913  ;;  %v1916_v3 = vpop.permute.xlu0 %1915 }
 0x6ba   : > { %4862 = vmatmul.mubr.msk.f32.gmra.mrb[52].mxu0 %vm1935_vm0, %v1914_v33 }
 0x6bb   : > { %4864 = vmatprep.mubr.msk.f32.mxu0 %vm1935_vm0, %v1916_v3  ;;  %5354 = vmatpush3.bf16.msra.mxu0 %v6980_v54 }
 0x6bc   : > { %5356 = vmatprep.subr.bf16.mxu0 %v6986_v55 }
 0x6bd   : > { %v1918_v8 = vpop.permute.xlu1 %1917  ;;  %v1920_v25 = vpop.permute.xlu0 %1919 }
 0x6be   : > { %4865 = vmatmul.mubr.msk.f32.gmra.mrb[54].mxu0 %vm1935_vm0, %v1918_v8  ;;  %4867 = vmatprep.mubr.msk.f32.mxu1 %vm1935_vm0, %v1920_v25 }
 0x6bf   : > { %5358 = vmatpush3.bf16.msra.mxu0 %v6986_v55 }
 0x6c0   : > { %5376 = vmatprep.subr.bf16.mxu0 %v6968_v39 }
 0x6c1   : > { %v1922_v9 = vpop.permute.xlu1 %1921  ;;  %v1924_v30 = vpop.permute.xlu0 %1923 }
 0x6c2   : > { %4868 = vmatmul.mubr.msk.f32.vlgmr.msra.gmra.mrb[48].mxu1 %vm1935_vm0, %v1922_v9 }
 0x6c3   : > { %4870 = vmatprep.mubr.msk.f32.mxu1 %vm1935_vm0, %v1924_v30  ;;  %5330 = vmatpush3.bf16.msra.mxu1 %v6968_v39 }
 0x6c4   : > { %5332 = vmatprep.subr.bf16.mxu1 %v6974_v28 }
 0x6c5   : > { %v1926_v26 = vpop.permute.xlu1 %1925  ;;  %v1928_v61 = vpop.permute.xlu0 %1927 }
 0x6c6   : > { %4871 = vmatmul.mubr.msk.f32.gmra.mrb[50].mxu1 %vm1935_vm0, %v1926_v26 }
 0x6c7   : > { %4873 = vmatprep.mubr.msk.f32.mxu1 %vm1935_vm0, %v1928_v61  ;;  %5334 = vmatpush3.bf16.msra.mxu1 %v6974_v28 }
 0x6c8   : > { %5336 = vmatprep.subr.bf16.mxu1 %v6980_v54 }
 0x6c9   : > { %v1930_v5 = vpop.permute.xlu1 %1929  ;;  %v1932_v21 = vpop.permute.xlu0 %1931 }
 0x6ca   : > { %4874 = vmatmul.mubr.msk.f32.gmra.mrb[52].mxu1 %vm1935_vm0, %v1930_v5 }
 0x6cb   : > { %4876 = vmatprep.mubr.msk.f32.mxu1 %vm1935_vm0, %v1932_v21  ;;  %5338 = vmatpush3.bf16.msra.mxu1 %v6980_v54 }
 0x6cc   : > { %5340 = vmatprep.subr.bf16.mxu1 %v6986_v55 }
 0x6cd   : > { %v1934_v11 = vpop.permute.xlu1 %1933 }
 0x6ce   : > { %4877 = vmatmul.mubr.msk.f32.gmra.mrb[54].mxu1 %vm1935_vm0, %v1934_v11 }
 0x6cf   : > { %5342 = vmatpush3.bf16.msra.mxu1 %v6986_v55 }
 0x785   : > { %v4857_v51 = vpop.f32.mrb[48].mxu0 }
 0x786   : > { %v2040_v40 = vadd.f32 %v4857_v51, %v6996_v29  ;;  %v2034_v60 = vpop.f32.mrb[49].mxu0 }
 0x787   : > { %v2035_v32 = vadd.f32 %v6996_v29, %v2034_v60 }
 0x788   : > { %v2130_v45 = vmul.f32 0.70710677, %v2040_v40  ;;  %v2114_v5 = vmul.f32 0.5, %v2040_v40 }
 0x789   : > { %v2129_v63 = vmul.f32 0.70710677, %v2035_v32  ;;  %v4860_v1 = vpop.f32.mrb[50].mxu0  ;;  %v2113_v9 = vmul.f32 0.5, %v2035_v32 }
 0x78a   : > { %5660 = verf.f32 %v2130_v45  ;;  %v2050_v34 = vadd.f32 %v4860_v1, %v6996_v29  ;;  %v2044_v36 = vpop.f32.mrb[51].mxu0 }
 0x78b   : > { %5662 = verf.f32 %v2129_v63  ;;  %v2045_v41 = vadd.f32 %v6996_v29, %v2044_v36 }
 0x78c   : > { %v2132_v19 = vmul.f32 0.70710677, %v2050_v34  ;;  %v2116_v32 = vmul.f32 0.5, %v2050_v34 }
 0x78d   : > { %v2131_v42 = vmul.f32 0.70710677, %v2045_v41  ;;  %v4863_v43 = vpop.f32.mrb[52].mxu0  ;;  %v2115_v4 = vmul.f32 0.5, %v2045_v41 }
 0x78e   : > { %5664 = verf.f32 %v2132_v19  ;;  %v2060_v57 = vadd.f32 %v4863_v43, %v6996_v29  ;;  %v2054_v46 = vpop.f32.mrb[53].mxu0 }
 0x78f   : > { %5666 = verf.f32 %v2131_v42  ;;  %v2055_v56 = vadd.f32 %v6996_v29, %v2054_v46 }
 0x790   : > { %v2134_v49 = vmul.f32 0.70710677, %v2060_v57 }
 0x791   : > { %v2133_v50 = vmul.f32 0.70710677, %v2055_v56  ;;  %v4866_v20 = vpop.f32.mrb[54].mxu0 }
 0x792   : > { %5668 = verf.f32 %v2134_v49  ;;  %v7005_v58 = vadd.f32 %v4866_v20, %v6996_v29  ;;  %v2064_v59 = vpop.f32.mrb[55].mxu0  ;;  %v2117_v49 = vmul.f32 0.5, %v2055_v56 }
 0x793   : > { %5670 = verf.f32 %v2133_v50  ;;  %v2065_v62 = vadd.f32 %v6996_v29, %v2064_v59  ;;  %v2118_v59 = vmul.f32 0.5, %v2060_v57 }
 0x794   : > { %v5661_v52 = vpop.eup %5660  ;;  %v2136_v27 = vmul.f32 0.70710677, %v7005_v58 }
 0x795   : > { %v5663_v33 = vpop.eup %5662  ;;  %v2162_v3 = vadd.f32 1.0, %v5661_v52  ;;  %v2135_v8 = vmul.f32 0.70710677, %v2065_v62  ;;  %v4869_v25 = vpop.f32.mrb[48].mxu1 }
 0x796   : > { %v2161_v30 = vadd.f32 1.0, %v5663_v33  ;;  %5672 = verf.f32 %v2136_v27  ;;  %v7010_v26 = vadd.f32 %v4869_v25, %v6996_v29  ;;  %v2074_v61 = vpop.f32.mrb[49].mxu1 }
 0x797   : > { %5674 = verf.f32 %v2135_v8  ;;  %v2075_v21 = vadd.f32 %v6996_v29, %v2074_v61  ;;  %v7016_v16 = vmul.f32 %v2162_v3, %v2114_v5  ;;  %v2119_v61 = vmul.f32 0.5, %v2065_v62 }
 0x798   : > { %v5665_v11 = vpop.eup %5664  ;;  %v7013_v10 = vmul.f32 %v2161_v30, %v2113_v9  ;;  %v2138_v22 = vmul.f32 0.70710677, %v7010_v26 }
 0x799   : > { %v5667_v13 = vpop.eup %5666  ;;  %v2164_v14 = vadd.f32 1.0, %v5665_v11  ;;  %v2137_v48 = vmul.f32 0.70710677, %v2075_v21  ;;  %v4872_v6 = vpop.f32.mrb[50].mxu1 }
 0x79a   : > { %v2163_v51 = vadd.f32 1.0, %v5667_v13  ;;  %5676 = verf.f32 %v2138_v22  ;;  %v7019_v60 = vadd.f32 %v4872_v6, %v6996_v29  ;;  %v2084_v40 = vpop.f32.mrb[51].mxu1  ;;  %4895 = vmatprep.mubr.msk.f32.mxu1 %vm1935_vm0, %v7013_v10  ;;  %v2120_v22 = vmul.f32 0.5, %v7005_v58 }
 0x79b   : > { %5678 = verf.f32 %v2137_v48  ;;  %v2085_v45 = vadd.f32 %v6996_v29, %v2084_v40  ;;  %4896 = vmatmul.mubr.msk.f32.vlgmr.msra.gmra.mrb[56].mxu1 %vm1935_vm0, %v7016_v16  ;;  %v7029_v19 = vmul.f32 %v2164_v14, %v2116_v32  ;;  %v2121_v32 = vmul.f32 0.5, %v2075_v21 }
 0x79c   : > { %v5669_v63 = vpop.eup %5668  ;;  %v7026_v1 = vmul.f32 %v2163_v51, %v2115_v4  ;;  %v2140_v36 = vmul.f32 0.70710677, %v7019_v60 }
 0x79d   : > { %v5671_v41 = vpop.eup %5670  ;;  %v2166_v42 = vadd.f32 1.0, %v5669_v63  ;;  %v2139_v43 = vmul.f32 0.70710677, %v2085_v45  ;;  %v4875_v46 = vpop.f32.mrb[52].mxu1 }
 0x79e   : > { %v2165_v50 = vadd.f32 1.0, %v5671_v41  ;;  %5680 = verf.f32 %v2140_v36  ;;  %v2100_v34 = vadd.f32 %v4875_v46, %v6996_v29  ;;  %v2094_v20 = vpop.f32.mrb[53].mxu1  ;;  %4898 = vmatprep.mubr.msk.f32.mxu1 %vm1935_vm0, %v7026_v1  ;;  %v2123_v46 = vmul.f32 0.5, %v2085_v45 }
 0x79f   : > { %5682 = verf.f32 %v2139_v43  ;;  %v2095_v52 = vadd.f32 %v6996_v29, %v2094_v20  ;;  %4899 = vmatmul.mubr.msk.f32.gmra.mrb[58].mxu1 %vm1935_vm0, %v7029_v19  ;;  %v7039_v8 = vmul.f32 %v2166_v42, %v2118_v59 }
 0x7a0   : > { %v5673_v27 = vpop.eup %5672  ;;  %v7037_v33 = vmul.f32 %v2165_v50, %v2117_v49  ;;  %v2142_v3 = vmul.f32 0.70710677, %v2100_v34  ;;  %v2124_v49 = vmul.f32 0.5, %v7019_v60  ;;  %v2126_v45 = vmul.f32 0.5, %v2100_v34 }
 0x7a1   : > { %v5675_v56 = vpop.eup %5674  ;;  %v2168_v25 = vadd.f32 1.0, %v5673_v27  ;;  %v2141_v9 = vmul.f32 0.70710677, %v2095_v52  ;;  %v4878_v30 = vpop.f32.mrb[54].mxu1 }
 0x7a2   : > { %v2167_v5 = vadd.f32 1.0, %v5675_v56  ;;  %5684 = verf.f32 %v2142_v3  ;;  %v2110_v57 = vadd.f32 %v4878_v30, %v6996_v29  ;;  %v2104_v11 = vpop.f32.mrb[55].mxu1  ;;  %4901 = vmatprep.mubr.msk.f32.mxu1 %vm1935_vm0, %v7037_v33  ;;  %v2125_v3 = vmul.f32 0.5, %v2095_v52 }
 0x7a3   : > { %5686 = verf.f32 %v2141_v9  ;;  %v2105_v13 = vadd.f32 %v6996_v29, %v2104_v11  ;;  %4902 = vmatmul.mubr.msk.f32.gmra.mrb[60].mxu1 %vm1935_vm0, %v7039_v8  ;;  %v7050_v4 = vmul.f32 %v2168_v25, %v2120_v22  ;;  %v2122_v29 = vmul.f32 0.5, %v7010_v26 }
 0x7a4   : > { %v5677_v14 = vpop.eup %5676  ;;  %v7048_v48 = vmul.f32 %v2167_v5, %v2119_v61  ;;  %v2144_v62 = vmul.f32 0.70710677, %v2110_v57  ;;  %v2128_v52 = vmul.f32 0.5, %v2110_v57 }
 0x7a5   : > { %v5679_v6 = vpop.eup %5678  ;;  %v2170_v51 = vadd.f32 1.0, %v5677_v14  ;;  %v2143_v40 = vmul.f32 0.70710677, %v2105_v13  ;;  %v2127_v5 = vmul.f32 0.5, %v2105_v13  ;;  %v2690_v14 = vld [vmem:[#allocation8 + $0x40] sm:$0xff]  ;;  %v2691_v13 = vld [vmem:[#allocation8 + $0x48] sm:$0xff] }
 0x7a6   : > { %v2169_v63 = vadd.f32 1.0, %v5679_v6  ;;  %5688 = verf.f32 %v2144_v62  ;;  %4904 = vmatprep.mubr.msk.f32.mxu1 %vm1935_vm0, %v7048_v48  ;;  %v2692_v62 = vld [vmem:[#allocation8 + $0x50] sm:$0xff]  ;;  %v5359_v6 = vpack.c.bf16 %v2691_v13, %v2690_v14 }
 0x7a7   : > { %5690 = verf.f32 %v2143_v40  ;;  %4905 = vmatmul.mubr.msk.f32.gmra.mrb[62].mxu1 %vm1935_vm0, %v7050_v4  ;;  %v7059_v42 = vmul.f32 %v2170_v51, %v2122_v29  ;;  %v2693_v51 = vld [vmem:[#allocation8 + $0x58] sm:$0xff] }
 0x7a8   : > { %v5681_v58 = vpop.eup %5680  ;;  %v7057_v36 = vmul.f32 %v2169_v63, %v2121_v32  ;;  %v5363_v40 = vpack.c.bf16 %v2693_v51, %v2692_v62  ;;  %5360 = vmatprep.subr.bf16.mxu1 %v5359_v6 }
 0x7a9   : > { %v5683_v41 = vpop.eup %5682  ;;  %v2172_v43 = vadd.f32 1.0, %v5681_v58  ;;  %5362 = vmatpush3.bf16.msra.mxu1 %v5359_v6 }
 0x7aa   : > { %v2171_v21 = vadd.f32 1.0, %v5683_v41  ;;  %4907 = vmatprep.mubr.msk.f32.mxu1 %vm1935_vm0, %v7057_v36  ;;  %5364 = vmatprep.subr.bf16.mxu1 %v5363_v40 }
 0x7ab   : > { %4908 = vmatmul.mubr.msk.f32.gmra.mrb[64].mxu1 %vm1935_vm0, %v7059_v42  ;;  %v7068_v59 = vmul.f32 %v2172_v43, %v2124_v49 }
 0x7ac   : > { %v5685_v26 = vpop.eup %5684  ;;  %v7066_v50 = vmul.f32 %v2171_v21, %v2123_v46 }
 0x7ad   : > { %v5687_v20 = vpop.eup %5686  ;;  %v2174_v27 = vadd.f32 1.0, %v5685_v26  ;;  %5366 = vmatpush3.bf16.msra.mxu1 %v5363_v40 }
 0x7ae   : > { %v2173_v56 = vadd.f32 1.0, %v5687_v20  ;;  %4910 = vmatprep.mubr.msk.f32.mxu1 %vm1935_vm0, %v7066_v50 }
 0x7af   : > { %4911 = vmatmul.mubr.msk.f32.gmra.mrb[66].mxu1 %vm1935_vm0, %v7068_v59  ;;  %v7076_v30 = vmul.f32 %v2174_v27, %v2126_v45 }
 0x7b0   : > { %v5689_v60 = vpop.eup %5688  ;;  %v7074_v25 = vmul.f32 %v2173_v56, %v2125_v3 }
 0x7b1   : > { %v5691_v9 = vpop.eup %5690  ;;  %v2176_v61 = vadd.f32 1.0, %v5689_v60 }
 0x7b2   : > { %v2175_v11 = vadd.f32 1.0, %v5691_v9  ;;  %4913 = vmatprep.mubr.msk.f32.mxu1 %vm1935_vm0, %v7074_v25 }
 0x7b3   : > { %4914 = vmatmul.mubr.msk.f32.gmra.mrb[68].mxu1 %vm1935_vm0, %v7076_v30  ;;  %v7084_v22 = vmul.f32 %v2176_v61, %v2128_v52 }
 0x7b4   : > { %v7082_v34 = vmul.f32 %v2175_v11, %v2127_v5 }
 0x7b6   : > { %4916 = vmatprep.mubr.msk.f32.mxu1 %vm1935_vm0, %v7082_v34 }
 0x7b7   : > { %4917 = vmatmul.mubr.msk.f32.gmra.mrb[70].mxu1 %vm1935_vm0, %v7084_v22 }
 0x86e   : > { %v4897_v57 = vpop.f32.mrb[56].mxu1 }
 0x86f   : > { %v7091_v32 = vsub.f32 %v7016_v16, %v4897_v57  ;;  %v2307_v63 = vpop.f32.mrb[57].mxu1 }
 0x870   : > { %v7094_v29 = vsub.f32 %v7013_v10, %v2307_v63 }
 0x871   : > { %v2403_v43 = vmul.f32 %v7091_v32, %v7091_v32 }
 0x872   : > { %v2402_v58 = vmul.f32 %v7094_v29, %v7094_v29  ;;  %v4900_v41 = vpop.f32.mrb[58].mxu1 }
 0x873   : > { %v7101_v46 = vsub.f32 %v7029_v19, %v4900_v41  ;;  %v2317_v21 = vpop.f32.mrb[59].mxu1 }
 0x874   : > { %v7104_v49 = vsub.f32 %v7026_v1, %v2317_v21  ;;  %4935 = vmatprep.mubr.msk.f32.mxu0 %vm1935_vm0, %v2402_v58 }
 0x875   : > { %4936 = vmatmul.mubr.msk.f32.vlgmr.msra.gmra.mrb[56].mxu0 %vm1935_vm0, %v2403_v43  ;;  %v2405_v26 = vmul.f32 %v7101_v46, %v7101_v46 }
 0x876   : > { %v2404_v10 = vmul.f32 %v7104_v49, %v7104_v49  ;;  %v4903_v16 = vpop.f32.mrb[60].mxu1  ;;  %5378 = vmatpush3.bf16.msra.mxu0 %v6968_v39 }
 0x877   : > { %v7114_v19 = vsub.f32 %v7039_v8, %v4903_v16  ;;  %v2327_v20 = vpop.f32.mrb[61].mxu1  ;;  %5380 = vmatprep.subr.bf16.mxu0 %v6974_v28 }
 0x878   : > { %v7118_v1 = vsub.f32 %v7037_v33, %v2327_v20  ;;  %4938 = vmatprep.mubr.msk.f32.mxu0 %vm1935_vm0, %v2404_v10  ;;  %v2695_v10 = vld [vmem:[#allocation8 + $0x68] sm:$0xff] }
 0x879   : > { %4939 = vmatmul.mubr.msk.f32.gmra.mrb[58].mxu0 %vm1935_vm0, %v2405_v26  ;;  %v2407_v8 = vmul.f32 %v7114_v19, %v7114_v19  ;;  %v2697_v26 = vld [vmem:[#allocation8 + $0x78] sm:$0xff] }
 0x87a   : > { %v2406_v27 = vmul.f32 %v7118_v1, %v7118_v1  ;;  %v4906_v3 = vpop.f32.mrb[62].mxu1  ;;  %5382 = vmatpush3.bf16.msra.mxu0 %v6974_v28 }
 0x87b   : > { %v7128_v56 = vsub.f32 %v7050_v4, %v4906_v3  ;;  %v2337_v45 = vpop.f32.mrb[63].mxu1  ;;  %5384 = vmatprep.subr.bf16.mxu0 %v6980_v54 }
 0x87c   : > { %v7132_v33 = vsub.f32 %v7048_v48, %v2337_v45  ;;  %4941 = vmatprep.mubr.msk.f32.mxu0 %vm1935_vm0, %v2406_v27 }
 0x87d   : > { %4942 = vmatmul.mubr.msk.f32.gmra.mrb[60].mxu0 %vm1935_vm0, %v2407_v8  ;;  %v2409_v4 = vmul.f32 %v7128_v56, %v7128_v56 }
 0x87e   : > { %v2408_v60 = vmul.f32 %v7132_v33, %v7132_v33  ;;  %v4909_v9 = vpop.f32.mrb[64].mxu1  ;;  %5386 = vmatpush3.bf16.msra.mxu0 %v6980_v54 }
 0x87f   : > { %v7142_v61 = vsub.f32 %v7059_v42, %v4909_v9  ;;  %v2347_v5 = vpop.f32.mrb[65].mxu1  ;;  %5388 = vmatprep.subr.bf16.mxu0 %v6986_v55 }
 0x880   : > { %v7146_v48 = vsub.f32 %v7057_v36, %v2347_v5  ;;  %4944 = vmatprep.mubr.msk.f32.mxu0 %vm1935_vm0, %v2408_v60 }
 0x881   : > { %4945 = vmatmul.mubr.msk.f32.gmra.mrb[62].mxu0 %vm1935_vm0, %v2409_v4  ;;  %v2411_v42 = vmul.f32 %v7142_v61, %v7142_v61 }
 0x882   : > { %v2410_v11 = vmul.f32 %v7146_v48, %v7146_v48  ;;  %v4912_v52 = vpop.f32.mrb[66].mxu1  ;;  %5390 = vmatpush3.bf16.msra.mxu0 %v6986_v55 }
 0x883   : > { %v7156_v14 = vsub.f32 %v7068_v59, %v4912_v52  ;;  %v2357_v13 = vpop.f32.mrb[67].mxu1 }
 0x884   : > { %v7159_v36 = vsub.f32 %v7066_v50, %v2357_v13  ;;  %4947 = vmatprep.mubr.msk.f32.mxu0 %vm1935_vm0, %v2410_v11 }
 0x885   : > { %4948 = vmatmul.mubr.msk.f32.gmra.mrb[64].mxu0 %vm1935_vm0, %v2411_v42  ;;  %v2413_v51 = vmul.f32 %v7156_v14, %v7156_v14 }
 0x886   : > { %v2412_v62 = vmul.f32 %v7159_v36, %v7159_v36  ;;  %v4915_v6 = vpop.f32.mrb[68].mxu1 }
 0x887   : > { %v7168_v40 = vsub.f32 %v7076_v30, %v4915_v6  ;;  %v2367_v59 = vpop.f32.mrb[69].mxu1 }
 0x888   : > { %v7171_v57 = vsub.f32 %v7074_v25, %v2367_v59  ;;  %4950 = vmatprep.mubr.msk.f32.mxu0 %vm1935_vm0, %v2412_v62 }
 0x889   : > { %4951 = vmatmul.mubr.msk.f32.gmra.mrb[66].mxu0 %vm1935_vm0, %v2413_v51  ;;  %v2415_v58 = vmul.f32 %v7168_v40, %v7168_v40  ;;  %v7197_v51 = vld [vmem:[%s7694_s18] ss:$0 sm:$0xff] }
 0x88a   : > { %v2414_v50 = vmul.f32 %v7171_v57, %v7171_v57  ;;  %v4918_v63 = vpop.f32.mrb[70].mxu1 }
 0x88b   : > { %v7180_v41 = vsub.f32 %v7084_v22, %v4918_v63  ;;  %v2377_v30 = vpop.f32.mrb[71].mxu1  ;;  %v2694_v22 = vld [vmem:[#allocation8 + $0x60] sm:$0xff] }
 0x88c   : > { %v7183_v43 = vsub.f32 %v7082_v34, %v2377_v30  ;;  %4953 = vmatprep.mubr.msk.f32.mxu0 %vm1935_vm0, %v2414_v50  ;;  %v5367_v16 = vpack.c.bf16 %v2695_v10, %v2694_v22  ;;  %v2696_v34 = vld [vmem:[#allocation8 + $0x70] sm:$0xff]  ;;  %v7205_v22 = vld [vmem:[%s7695_s30] ss:$0 sm:$0xff] }
 0x88d   : > { %4954 = vmatmul.mubr.msk.f32.gmra.mrb[68].mxu0 %vm1935_vm0, %v2415_v58  ;;  %v2417_v21 = vmul.f32 %v7180_v41, %v7180_v41  ;;  %v5371_v20 = vpack.c.bf16 %v2697_v26, %v2696_v34 }
 0x88e   : > { %v2416_v25 = vmul.f32 %v7183_v43, %v7183_v43  ;;  %5368 = vmatprep.subr.bf16.mxu1 %v5367_v16 }
 0x88f   : > { %5370 = vmatpush3.bf16.msra.mxu1 %v5367_v16 }
 0x890   : > { %4956 = vmatprep.mubr.msk.f32.mxu0 %vm1935_vm0, %v2416_v25  ;;  %5372 = vmatprep.subr.bf16.mxu1 %v5371_v20 }
 0x891   : > { %4957 = vmatmul.mubr.msk.f32.gmra.mrb[70].mxu0 %vm1935_vm0, %v2417_v21 }
 0x893   : > { %5374 = vmatpush3.bf16.msra.mxu1 %v5371_v20 }
 0x894   : > { %5392 = vmatprep.subr.bf16.mxu1 %v6968_v39 }
 0x948   : > { %v4937_v27 = vpop.f32.mrb[56].mxu0 }
 0x949   : > { %v2538_v3 = vadd.f32 1e-05, %v4937_v27  ;;  %v2532_v8 = vpop.f32.mrb[57].mxu0 }
 0x94a   : > { %v2533_v45 = vadd.f32 1e-05, %v2532_v8 }
 0x94b   : > { %5692 = vrsqrt.f32 %v2538_v3 }
 0x94c   : > { %5694 = vrsqrt.f32 %v2533_v45  ;;  %v4940_v60 = vpop.f32.mrb[58].mxu0 }
 0x94d   : > { %v2548_v9 = vadd.f32 1e-05, %v4940_v60  ;;  %v2542_v4 = vpop.f32.mrb[59].mxu0 }
 0x94e   : > { %v2543_v5 = vadd.f32 1e-05, %v2542_v4 }
 0x94f   : > { %5696 = vrsqrt.f32 %v2548_v9 }
 0x950   : > { %5698 = vrsqrt.f32 %v2543_v5  ;;  %v4943_v11 = vpop.f32.mrb[60].mxu0 }
 0x951   : > { %v2558_v52 = vadd.f32 1e-05, %v4943_v11  ;;  %v2552_v42 = vpop.f32.mrb[61].mxu0 }
 0x952   : > { %v2553_v13 = vadd.f32 1e-05, %v2552_v42 }
 0x953   : > { %5700 = vrsqrt.f32 %v2558_v52 }
 0x954   : > { %5702 = vrsqrt.f32 %v2553_v13  ;;  %v4946_v62 = vpop.f32.mrb[62].mxu0 }
 0x955   : > { %v5693_v6 = vpop.eup %5692  ;;  %v2568_v59 = vadd.f32 1e-05, %v4946_v62  ;;  %v2562_v50 = vpop.f32.mrb[63].mxu0 }
 0x956   : > { %v5695_v63 = vpop.eup %5694  ;;  %v2628_v58 = vmul.f32 %v5693_v6, %v7091_v32  ;;  %v2563_v30 = vadd.f32 1e-05, %v2562_v50 }
 0x957   : > { %5704 = vrsqrt.f32 %v2568_v59  ;;  %v2627_v25 = vmul.f32 %v5695_v63, %v7094_v29 }
 0x958   : > { %v2651_v21 = vmul.f32 %v7197_v51, %v2628_v58  ;;  %5706 = vrsqrt.f32 %v2563_v30  ;;  %v4949_v10 = vpop.f32.mrb[64].mxu0 }
 0x959   : > { %v5697_v16 = vpop.eup %5696  ;;  %v2578_v34 = vadd.f32 1e-05, %v4949_v10  ;;  %v2572_v26 = vpop.f32.mrb[65].mxu0  ;;  %v2650_v20 = vmul.f32 %v7197_v51, %v2627_v25 }
 0x95a   : > { %v5699_v27 = vpop.eup %5698  ;;  %v2573_v32 = vadd.f32 1e-05, %v2572_v26  ;;  %v2630_v3 = vmul.f32 %v5697_v16, %v7101_v46  ;;  %v2674_v45 = vadd.f32 %v7205_v22, %v2651_v21 }
 0x95b   : > { %5708 = vrsqrt.f32 %v2578_v34  ;;  %v2673_v29 = vadd.f32 %v7205_v22, %v2650_v20  ;;  %v2629_v8 = vmul.f32 %v5699_v27, %v7104_v49 }
 0x95c   : > { %5710 = vrsqrt.f32 %v2573_v32  ;;  %v4952_v60 = vpop.f32.mrb[66].mxu0  ;;  %v2653_v9 = vmul.f32 %v7197_v51, %v2630_v3 }
 0x95d   : > { %v5701_v4 = vpop.eup %5700  ;;  %v2588_v5 = vadd.f32 1e-05, %v4952_v60  ;;  %v2582_v11 = vpop.f32.mrb[67].mxu0  ;;  %4975 = vmatprep.mubr.msk.f32.mxu1 %vm1935_vm0, %v2673_v29  ;;  %v2652_v52 = vmul.f32 %v7197_v51, %v2629_v8 }
 0x95e   : > { %v5703_v42 = vpop.eup %5702  ;;  %v2583_v46 = vadd.f32 1e-05, %v2582_v11  ;;  %4976 = vmatmul.mubr.msk.f32.vlgmr.msra.gmra.mrb[72].mxu1 %vm1935_vm0, %v2674_v45  ;;  %v2632_v13 = vmul.f32 %v5701_v4, %v7114_v19  ;;  %v2676_v59 = vadd.f32 %v7205_v22, %v2653_v9 }
 0x95f   : > { %5712 = vrsqrt.f32 %v2588_v5  ;;  %v2675_v49 = vadd.f32 %v7205_v22, %v2652_v52  ;;  %v2631_v62 = vmul.f32 %v5703_v42, %v7118_v1  ;;  %5394 = vmatpush3.bf16.msra.mxu1 %v6968_v39 }
 0x960   : > { %5714 = vrsqrt.f32 %v2583_v46  ;;  %v4955_v6 = vpop.f32.mrb[68].mxu0  ;;  %v2655_v50 = vmul.f32 %v7197_v51, %v2632_v13  ;;  %5396 = vmatprep.subr.bf16.mxu1 %v6974_v28 }
 0x961   : > { %v5705_v63 = vpop.eup %5704  ;;  %v2598_v58 = vadd.f32 1e-05, %v4955_v6  ;;  %v2592_v30 = vpop.f32.mrb[69].mxu0  ;;  %4978 = vmatprep.mubr.msk.f32.mxu1 %vm1935_vm0, %v2675_v49  ;;  %v2654_v19 = vmul.f32 %v7197_v51, %v2631_v62 }
 0x962   : > { %v5707_v25 = vpop.eup %5706  ;;  %v2593_v21 = vadd.f32 1e-05, %v2592_v30  ;;  %4979 = vmatmul.mubr.msk.f32.gmra.mrb[74].mxu1 %vm1935_vm0, %v2676_v59  ;;  %v2634_v39 = vmul.f32 %v5705_v63, %v7128_v56  ;;  %v2678_v34 = vadd.f32 %v7205_v22, %v2655_v50 }
 0x963   : > { %5716 = vrsqrt.f32 %v2598_v58  ;;  %v2677_v1 = vadd.f32 %v7205_v22, %v2654_v19  ;;  %v2633_v10 = vmul.f32 %v5707_v25, %v7132_v33  ;;  %5398 = vmatpush3.bf16.msra.mxu1 %v6974_v28 }
 0x964   : > { %5718 = vrsqrt.f32 %v2593_v21  ;;  %v4958_v16 = vpop.f32.mrb[70].mxu0  ;;  %v2657_v26 = vmul.f32 %v7197_v51, %v2634_v39  ;;  %5400 = vmatprep.subr.bf16.mxu1 %v6980_v54 }
 0x965   : > { %v5709_v20 = vpop.eup %5708  ;;  %v2608_v27 = vadd.f32 1e-05, %v4958_v16  ;;  %v2602_v32 = vpop.f32.mrb[71].mxu0  ;;  %4981 = vmatprep.mubr.msk.f32.mxu1 %vm1935_vm0, %v2677_v1  ;;  %v2656_v56 = vmul.f32 %v7197_v51, %v2633_v10 }
 0x966   : > { %v5711_v3 = vpop.eup %5710  ;;  %v2603_v29 = vadd.f32 1e-05, %v2602_v32  ;;  %4982 = vmatmul.mubr.msk.f32.gmra.mrb[76].mxu1 %vm1935_vm0, %v2678_v34  ;;  %v2636_v28 = vmul.f32 %v5709_v20, %v7142_v61  ;;  %v2680_v45 = vadd.f32 %v7205_v22, %v2657_v26 }
 0x967   : > { %5720 = vrsqrt.f32 %v2608_v27  ;;  %v2679_v33 = vadd.f32 %v7205_v22, %v2656_v56  ;;  %v2635_v8 = vmul.f32 %v5711_v3, %v7146_v48  ;;  %5402 = vmatpush3.bf16.msra.mxu1 %v6980_v54 }
 0x968   : > { %5722 = vrsqrt.f32 %v2603_v29  ;;  %v2659_v60 = vmul.f32 %v7197_v51, %v2636_v28  ;;  %5404 = vmatprep.subr.bf16.mxu1 %v6986_v55 }
 0x969   : > { %v5713_v9 = vpop.eup %5712  ;;  %4984 = vmatprep.mubr.msk.f32.mxu1 %vm1935_vm0, %v2679_v33  ;;  %v2658_v4 = vmul.f32 %v7197_v51, %v2635_v8 }
 0x96a   : > { %v5715_v61 = vpop.eup %5714  ;;  %4985 = vmatmul.mubr.msk.f32.gmra.mrb[78].mxu1 %vm1935_vm0, %v2680_v45  ;;  %v2638_v5 = vmul.f32 %v5713_v9, %v7156_v14  ;;  %v2682_v11 = vadd.f32 %v7205_v22, %v2659_v60 }
 0x96b   : > { %v2681_v48 = vadd.f32 %v7205_v22, %v2658_v4  ;;  %v2637_v54 = vmul.f32 %v5715_v61, %v7159_v36  ;;  %5406 = vmatpush3.bf16.msra.mxu1 %v6986_v55 }
 0x96c   : > { %v2661_v52 = vmul.f32 %v7197_v51, %v2638_v5 }
 0x96d   : > { %v5717_v42 = vpop.eup %5716  ;;  %4987 = vmatprep.mubr.msk.f32.mxu1 %vm1935_vm0, %v2681_v48  ;;  %v2660_v46 = vmul.f32 %v7197_v51, %v2637_v54 }
 0x96e   : > { %v5719_v13 = vpop.eup %5718  ;;  %4988 = vmatmul.mubr.msk.f32.gmra.mrb[80].mxu1 %vm1935_vm0, %v2682_v11  ;;  %v2640_v14 = vmul.f32 %v5717_v42, %v7168_v40  ;;  %v2684_v55 = vadd.f32 %v7205_v22, %v2661_v52 }
 0x96f   : > { %v2683_v49 = vadd.f32 %v7205_v22, %v2660_v46  ;;  %v2639_v36 = vmul.f32 %v5719_v13, %v7171_v57 }
 0x970   : > { %v2663_v62 = vmul.f32 %v7197_v51, %v2640_v14 }
 0x971   : > { %v5721_v6 = vpop.eup %5720  ;;  %4990 = vmatprep.mubr.msk.f32.mxu1 %vm1935_vm0, %v2683_v49  ;;  %v2662_v59 = vmul.f32 %v7197_v51, %v2639_v36 }
 0x972   : > { %v5723_v50 = vpop.eup %5722  ;;  %4991 = vmatmul.mubr.msk.f32.gmra.mrb[82].mxu1 %vm1935_vm0, %v2684_v55  ;;  %v2642_v63 = vmul.f32 %v5721_v6, %v7180_v41  ;;  %v2686_v57 = vadd.f32 %v7205_v22, %v2663_v62  ;;  %v7278_v41 = vld [vmem:[%s7693_s12 + $0x1] ss:$0 sm:$0xff] }
 0x973   : > { %v2685_v40 = vadd.f32 %v7205_v22, %v2662_v59  ;;  %v2641_v58 = vmul.f32 %v5723_v50, %v7183_v43 }
 0x974   : > { %v2665_v30 = vmul.f32 %v7197_v51, %v2642_v63 }
 0x975   : > { %4993 = vmatprep.mubr.msk.f32.mxu1 %vm1935_vm0, %v2685_v40  ;;  %v2664_v19 = vmul.f32 %v7197_v51, %v2641_v58 }
 0x976   : > { %4994 = vmatmul.mubr.msk.f32.gmra.mrb[84].mxu1 %vm1935_vm0, %v2686_v57  ;;  %v2688_v21 = vadd.f32 %v7205_v22, %v2665_v30 }
 0x977   : > { %v2687_v25 = vadd.f32 %v7205_v22, %v2664_v19 }
 0x979   : > { %4996 = vmatprep.mubr.msk.f32.mxu1 %vm1935_vm0, %v2687_v25 }
 0x97a   : > { %4997 = vmatmul.mubr.msk.f32.gmra.mrb[86].mxu1 %vm1935_vm0, %v2688_v21 }
 0xa31   : > { %v4977_v43 = vpop.f32.mrb[72].mxu1 }
 0xa32   : > { %v2826_v39 = vadd.f32 %v4977_v43, %v7278_v41  ;;  %v2820_v1 = vpop.f32.mrb[73].mxu1 }
 0xa33   : > { %v2821_v51 = vadd.f32 %v7278_v41, %v2820_v1 }
 0xa34   : > { %v2916_v10 = vmul.f32 0.70710677, %v2826_v39  ;;  %v2900_v49 = vmul.f32 0.5, %v2826_v39 }
 0xa35   : > { %v2915_v16 = vmul.f32 0.70710677, %v2821_v51  ;;  %v4980_v34 = vpop.f32.mrb[74].mxu1  ;;  %v2899_v42 = vmul.f32 0.5, %v2821_v51 }
 0xa36   : > { %5724 = verf.f32 %v2916_v10  ;;  %v2836_v22 = vadd.f32 %v4980_v34, %v7278_v41  ;;  %v2830_v26 = vpop.f32.mrb[75].mxu1 }
 0xa37   : > { %5726 = verf.f32 %v2915_v16  ;;  %v2831_v20 = vadd.f32 %v7278_v41, %v2830_v26 }
 0xa38   : > { %v2918_v27 = vmul.f32 0.70710677, %v2836_v22  ;;  %v2902_v21 = vmul.f32 0.5, %v2836_v22 }
 0xa39   : > { %v2917_v32 = vmul.f32 0.70710677, %v2831_v20  ;;  %v4983_v56 = vpop.f32.mrb[76].mxu1  ;;  %v2901_v57 = vmul.f32 0.5, %v2831_v20 }
 0xa3a   : > { %5728 = verf.f32 %v2918_v27  ;;  %v2846_v3 = vadd.f32 %v4983_v56, %v7278_v41  ;;  %v2840_v29 = vpop.f32.mrb[77].mxu1 }
 0xa3b   : > { %5730 = verf.f32 %v2917_v32  ;;  %v2841_v28 = vadd.f32 %v7278_v41, %v2840_v29 }
 0xa3c   : > { %v2920_v33 = vmul.f32 0.70710677, %v2846_v3  ;;  %v2904_v29 = vmul.f32 0.5, %v2846_v3 }
 0xa3d   : > { %v2919_v8 = vmul.f32 0.70710677, %v2841_v28  ;;  %v4986_v45 = vpop.f32.mrb[78].mxu1  ;;  %v2903_v27 = vmul.f32 0.5, %v2841_v28 }
 0xa3e   : > { %5732 = verf.f32 %v2920_v33  ;;  %v7287_v60 = vadd.f32 %v4986_v45, %v7278_v41  ;;  %v2850_v9 = vpop.f32.mrb[79].mxu1 }
 0xa3f   : > { %5734 = verf.f32 %v2919_v8  ;;  %v2851_v4 = vadd.f32 %v7278_v41, %v2850_v9 }
 0xa40   : > { %v5725_v61 = vpop.eup %5724  ;;  %v2922_v5 = vmul.f32 0.70710677, %v7287_v60 }
 0xa41   : > { %v5727_v48 = vpop.eup %5726  ;;  %v2948_v54 = vadd.f32 1.0, %v5725_v61  ;;  %v2921_v11 = vmul.f32 0.70710677, %v2851_v4  ;;  %v4989_v52 = vpop.f32.mrb[80].mxu1 }
 0xa42   : > { %v2947_v46 = vadd.f32 1.0, %v5727_v48  ;;  %5736 = verf.f32 %v2922_v5  ;;  %v7292_v13 = vadd.f32 %v4989_v52, %v7278_v41  ;;  %v2860_v14 = vpop.f32.mrb[81].mxu1 }
 0xa43   : > { %5738 = verf.f32 %v2921_v11  ;;  %v2861_v36 = vadd.f32 %v7278_v41, %v2860_v14  ;;  %v7298_v50 = vmul.f32 %v2948_v54, %v2900_v49  ;;  %v2905_v11 = vmul.f32 0.5, %v2851_v4 }
 0xa44   : > { %v5729_v55 = vpop.eup %5728  ;;  %v7295_v62 = vmul.f32 %v2947_v46, %v2899_v42  ;;  %v2924_v6 = vmul.f32 0.70710677, %v7292_v13  ;;  %v2906_v46 = vmul.f32 0.5, %v7287_v60 }
 0xa45   : > { %v5731_v59 = vpop.eup %5730  ;;  %v2950_v63 = vadd.f32 1.0, %v5729_v55  ;;  %v2923_v40 = vmul.f32 0.70710677, %v2861_v36  ;;  %v4992_v58 = vpop.f32.mrb[82].mxu1 }
 0xa46   : > { %v2949_v30 = vadd.f32 1.0, %v5731_v59  ;;  %5740 = verf.f32 %v2924_v6  ;;  %v7301_v19 = vadd.f32 %v4992_v58, %v7278_v41  ;;  %v2870_v25 = vpop.f32.mrb[83].mxu1  ;;  %5015 = vmatprep.mubr.msk.f32.mxu0 %vm1935_vm0, %v7295_v62  ;;  %v2907_v58 = vmul.f32 0.5, %v2861_v36 }
 0xa47   : > { %5742 = verf.f32 %v2923_v40  ;;  %v2871_v43 = vadd.f32 %v7278_v41, %v2870_v25  ;;  %5016 = vmatmul.mubr.msk.f32.vlgmr.msra.gmra.mrb[72].mxu0 %vm1935_vm0, %v7298_v50  ;;  %v7311_v16 = vmul.f32 %v2950_v63, %v2902_v21 }
 0xa48   : > { %v5733_v39 = vpop.eup %5732  ;;  %v7308_v1 = vmul.f32 %v2949_v30, %v2901_v57  ;;  %v2926_v51 = vmul.f32 0.70710677, %v7301_v19 }
 0xa49   : > { %v5735_v10 = vpop.eup %5734  ;;  %v2952_v34 = vadd.f32 1.0, %v5733_v39  ;;  %v2925_v26 = vmul.f32 0.70710677, %v2871_v43  ;;  %v4995_v20 = vpop.f32.mrb[84].mxu1 }
 0xa4a   : > { %v2951_v32 = vadd.f32 1.0, %v5735_v10  ;;  %5744 = verf.f32 %v2926_v51  ;;  %v2886_v22 = vadd.f32 %v4995_v20, %v7278_v41  ;;  %v2880_v56 = vpop.f32.mrb[85].mxu1  ;;  %5018 = vmatprep.mubr.msk.f32.mxu0 %vm1935_vm0, %v7308_v1  ;;  %v2909_v51 = vmul.f32 0.5, %v2871_v43 }
 0xa4b   : > { %5746 = verf.f32 %v2925_v26  ;;  %v2881_v33 = vadd.f32 %v7278_v41, %v2880_v56  ;;  %5019 = vmatmul.mubr.msk.f32.gmra.mrb[74].mxu0 %vm1935_vm0, %v7311_v16  ;;  %v7321_v61 = vmul.f32 %v2952_v34, %v2904_v29  ;;  %v2910_v10 = vmul.f32 0.5, %v7301_v19 }
 0xa4c   : > { %v5737_v8 = vpop.eup %5736  ;;  %v7319_v45 = vmul.f32 %v2951_v32, %v2903_v27  ;;  %v2928_v9 = vmul.f32 0.70710677, %v2886_v22  ;;  %v2912_v43 = vmul.f32 0.5, %v2886_v22 }
 0xa4d   : > { %v5739_v28 = vpop.eup %5738  ;;  %v2954_v5 = vadd.f32 1.0, %v5737_v8  ;;  %v2927_v48 = vmul.f32 0.70710677, %v2881_v33  ;;  %v4998_v54 = vpop.f32.mrb[86].mxu1  ;;  %v2911_v32 = vmul.f32 0.5, %v2881_v33 }
 0xa4e   : > { %v2953_v52 = vadd.f32 1.0, %v5739_v28  ;;  %5748 = verf.f32 %v2928_v9  ;;  %v2896_v3 = vadd.f32 %v4998_v54, %v7278_v41  ;;  %v2890_v42 = vpop.f32.mrb[87].mxu1  ;;  %5021 = vmatprep.mubr.msk.f32.mxu0 %vm1935_vm0, %v7319_v45 }
 0xa4f   : > { %5750 = verf.f32 %v2927_v48  ;;  %v2891_v14 = vadd.f32 %v7278_v41, %v2890_v42  ;;  %5022 = vmatmul.mubr.msk.f32.gmra.mrb[76].mxu0 %vm1935_vm0, %v7321_v61  ;;  %v7332_v59 = vmul.f32 %v2954_v5, %v2906_v46  ;;  %v2908_v41 = vmul.f32 0.5, %v7292_v13  ;;  %v3495_v42 = vld [vmem:[#allocation11 + $0x10] sm:$0xff] }
 0xa50   : > { %v5741_v49 = vpop.eup %5740  ;;  %v7330_v55 = vmul.f32 %v2953_v52, %v2905_v11  ;;  %v2930_v4 = vmul.f32 0.70710677, %v2896_v3  ;;  %v2914_v33 = vmul.f32 0.5, %v2896_v3  ;;  %v3493_v11 = vld [vmem:[#allocation11] sm:$0xff]  ;;  %v3494_v52 = vld [vmem:[#allocation11 + $0x8] sm:$0xff] }
 0xa51   : > { %v5743_v6 = vpop.eup %5742  ;;  %v2956_v63 = vadd.f32 1.0, %v5741_v49  ;;  %v2929_v40 = vmul.f32 0.70710677, %v2891_v14  ;;  %v2913_v5 = vmul.f32 0.5, %v2891_v14  ;;  %v5407_v46 = vpack.c.bf16 %v3494_v52, %v3493_v11  ;;  %v3496_v14 = vld [vmem:[#allocation11 + $0x18] sm:$0xff] }
 0xa52   : > { %v2955_v57 = vadd.f32 1.0, %v5743_v6  ;;  %5752 = verf.f32 %v2930_v4  ;;  %5024 = vmatprep.mubr.msk.f32.mxu0 %vm1935_vm0, %v7330_v55  ;;  %v5411_v49 = vpack.c.bf16 %v3496_v14, %v3495_v42 }
 0xa53   : > { %5754 = verf.f32 %v2929_v40  ;;  %5025 = vmatmul.mubr.msk.f32.gmra.mrb[78].mxu0 %vm1935_vm0, %v7332_v59  ;;  %v7341_v21 = vmul.f32 %v2956_v63, %v2908_v41  ;;  %5408 = vmatprep.subr.bf16.mxu0 %v5407_v46 }
 0xa54   : > { %v5745_v60 = vpop.eup %5744  ;;  %v7339_v30 = vmul.f32 %v2955_v57, %v2907_v58  ;;  %5410 = vmatpush3.bf16.msra.mxu0 %v5407_v46 }
 0xa55   : > { %v5747_v25 = vpop.eup %5746  ;;  %v2958_v39 = vadd.f32 1.0, %v5745_v60  ;;  %5412 = vmatprep.subr.bf16.mxu0 %v5411_v49 }
 0xa56   : > { %v2957_v36 = vadd.f32 1.0, %v5747_v25  ;;  %5027 = vmatprep.mubr.msk.f32.mxu0 %vm1935_vm0, %v7339_v30 }
 0xa57   : > { %5028 = vmatmul.mubr.msk.f32.gmra.mrb[80].mxu0 %vm1935_vm0, %v7341_v21  ;;  %v7350_v20 = vmul.f32 %v2958_v39, %v2910_v10 }
 0xa58   : > { %v5749_v13 = vpop.eup %5748  ;;  %v7348_v34 = vmul.f32 %v2957_v36, %v2909_v51  ;;  %5414 = vmatpush3.bf16.msra.mxu0 %v5411_v49 }
 0xa59   : > { %v5751_v26 = vpop.eup %5750  ;;  %v2960_v27 = vadd.f32 1.0, %v5749_v13 }
 0xa5a   : > { %v2959_v56 = vadd.f32 1.0, %v5751_v26  ;;  %5030 = vmatprep.mubr.msk.f32.mxu0 %vm1935_vm0, %v7348_v34 }
 0xa5b   : > { %5031 = vmatmul.mubr.msk.f32.gmra.mrb[82].mxu0 %vm1935_vm0, %v7350_v20  ;;  %v7358_v9 = vmul.f32 %v2960_v27, %v2912_v43 }
 0xa5c   : > { %v5753_v19 = vpop.eup %5752  ;;  %v7356_v29 = vmul.f32 %v2959_v56, %v2911_v32 }
 0xa5d   : > { %v5755_v8 = vpop.eup %5754  ;;  %v2962_v28 = vadd.f32 1.0, %v5753_v19 }
 0xa5e   : > { %v2961_v48 = vadd.f32 1.0, %v5755_v8  ;;  %5033 = vmatprep.mubr.msk.f32.mxu0 %vm1935_vm0, %v7356_v29 }
 0xa5f   : > { %5034 = vmatmul.mubr.msk.f32.gmra.mrb[84].mxu0 %vm1935_vm0, %v7358_v9  ;;  %v7366_v54 = vmul.f32 %v2962_v28, %v2914_v33 }
 0xa60   : > { %v7364_v22 = vmul.f32 %v2961_v48, %v2913_v5 }
 0xa62   : > { %5036 = vmatprep.mubr.msk.f32.mxu0 %vm1935_vm0, %v7364_v22 }
 0xa63   : > { %5037 = vmatmul.mubr.msk.f32.gmra.mrb[86].mxu0 %vm1935_vm0, %v7366_v54 }
 0xb1a   : > { %v5017_v3 = vpop.f32.mrb[72].mxu0 }
 0xb1b   : > { %v7373_v4 = vsub.f32 %v7298_v50, %v5017_v3  ;;  %v3093_v6 = vpop.f32.mrb[73].mxu0 }
 0xb1c   : > { %v7376_v63 = vsub.f32 %v7295_v62, %v3093_v6 }
 0xb1d   : > { %v3189_v57 = vmul.f32 %v7373_v4, %v7373_v4 }
 0xb1e   : > { %v3188_v40 = vmul.f32 %v7376_v63, %v7376_v63  ;;  %v5020_v58 = vpop.f32.mrb[74].mxu0 }
 0xb1f   : > { %v7383_v41 = vsub.f32 %v7311_v16, %v5020_v58  ;;  %v3103_v60 = vpop.f32.mrb[75].mxu0 }
 0xb20   : > { %v7386_v25 = vsub.f32 %v7308_v1, %v3103_v60  ;;  %5055 = vmatprep.mubr.msk.f32.mxu1 %vm1935_vm0, %v3188_v40  ;;  %v3498_v40 = vld [vmem:[#allocation11 + $0x28] sm:$0xff] }
 0xb21   : > { %5056 = vmatmul.mubr.msk.f32.vlgmr.msra.gmra.mrb[88].mxu1 %vm1935_vm0, %v3189_v57  ;;  %v3191_v39 = vmul.f32 %v7383_v41, %v7383_v41  ;;  %v3500_v57 = vld [vmem:[#allocation11 + $0x38] sm:$0xff] }
 0xb22   : > { %v3190_v62 = vmul.f32 %v7386_v25, %v7386_v25  ;;  %v5023_v50 = vpop.f32.mrb[76].mxu0 }
 0xb23   : > { %v7395_v51 = vsub.f32 %v7321_v61, %v5023_v50  ;;  %v3113_v16 = vpop.f32.mrb[77].mxu0 }
 0xb24   : > { %v7398_v36 = vsub.f32 %v7319_v45, %v3113_v16  ;;  %5058 = vmatprep.mubr.msk.f32.mxu1 %vm1935_vm0, %v3190_v62 }
 0xb25   : > { %5059 = vmatmul.mubr.msk.f32.gmra.mrb[90].mxu1 %vm1935_vm0, %v3191_v39  ;;  %v3193_v13 = vmul.f32 %v7395_v51, %v7395_v51 }
 0xb26   : > { %v3192_v1 = vmul.f32 %v7398_v36, %v7398_v36  ;;  %v5026_v10 = vpop.f32.mrb[78].mxu0 }
 0xb27   : > { %v7407_v26 = vsub.f32 %v7332_v59, %v5026_v10  ;;  %v3123_v61 = vpop.f32.mrb[79].mxu0 }
 0xb28   : > { %v7410_v27 = vsub.f32 %v7330_v55, %v3123_v61  ;;  %5061 = vmatprep.mubr.msk.f32.mxu1 %vm1935_vm0, %v3192_v1 }
 0xb29   : > { %5062 = vmatmul.mubr.msk.f32.gmra.mrb[92].mxu1 %vm1935_vm0, %v3193_v13  ;;  %v3195_v56 = vmul.f32 %v7407_v26, %v7407_v26 }
 0xb2a   : > { %v3194_v45 = vmul.f32 %v7410_v27, %v7410_v27  ;;  %v5029_v32 = vpop.f32.mrb[80].mxu0 }
 0xb2b   : > { %v7419_v43 = vsub.f32 %v7341_v21, %v5029_v32  ;;  %v3133_v59 = vpop.f32.mrb[81].mxu0 }
 0xb2c   : > { %v7422_v19 = vsub.f32 %v7339_v30, %v3133_v59  ;;  %5064 = vmatprep.mubr.msk.f32.mxu1 %vm1935_vm0, %v3194_v45 }
 0xb2d   : > { %5065 = vmatmul.mubr.msk.f32.gmra.mrb[94].mxu1 %vm1935_vm0, %v3195_v56  ;;  %v3197_v28 = vmul.f32 %v7419_v43, %v7419_v43 }
 0xb2e   : > { %v3196_v55 = vmul.f32 %v7422_v19, %v7422_v19  ;;  %v5032_v8 = vpop.f32.mrb[82].mxu0 }
 0xb2f   : > { %v7431_v5 = vsub.f32 %v7350_v20, %v5032_v8  ;;  %v3143_v21 = vpop.f32.mrb[83].mxu0 }
 0xb30   : > { %v7434_v48 = vsub.f32 %v7348_v34, %v3143_v21  ;;  %5067 = vmatprep.mubr.msk.f32.mxu1 %vm1935_vm0, %v3196_v55 }
 0xb31   : > { %5068 = vmatmul.mubr.msk.f32.gmra.mrb[96].mxu1 %vm1935_vm0, %v3197_v28  ;;  %v3199_v11 = vmul.f32 %v7431_v5, %v7431_v5  ;;  %v7471_v28 = vld [vmem:[%s7694_s18 + $0x1] ss:$0 sm:$0xff] }
 0xb32   : > { %v3198_v30 = vmul.f32 %v7434_v48, %v7434_v48  ;;  %v5035_v33 = vpop.f32.mrb[84].mxu0 }
 0xb33   : > { %v7443_v52 = vsub.f32 %v7358_v9, %v5035_v33  ;;  %v3153_v20 = vpop.f32.mrb[85].mxu0 }
 0xb34   : > { %v7446_v42 = vsub.f32 %v7356_v29, %v3153_v20  ;;  %5070 = vmatprep.mubr.msk.f32.mxu1 %vm1935_vm0, %v3198_v30 }
 0xb35   : > { %5071 = vmatmul.mubr.msk.f32.gmra.mrb[98].mxu1 %vm1935_vm0, %v3199_v11  ;;  %v3201_v14 = vmul.f32 %v7443_v52, %v7443_v52 }
 0xb36   : > { %v3200_v34 = vmul.f32 %v7446_v42, %v7446_v42  ;;  %v5038_v46 = vpop.f32.mrb[86].mxu0 }
 0xb37   : > { %v7455_v49 = vsub.f32 %v7366_v54, %v5038_v46  ;;  %v3163_v9 = vpop.f32.mrb[87].mxu0  ;;  %v3497_v54 = vld [vmem:[#allocation11 + $0x20] sm:$0xff] }
 0xb38   : > { %v7458_v3 = vsub.f32 %v7364_v22, %v3163_v9  ;;  %5073 = vmatprep.mubr.msk.f32.mxu1 %vm1935_vm0, %v3200_v34  ;;  %v5415_v58 = vpack.c.bf16 %v3498_v40, %v3497_v54  ;;  %v3499_v22 = vld [vmem:[#allocation11 + $0x30] sm:$0xff]  ;;  %v7477_v34 = vld [vmem:[%s7695_s30 + $0x1] ss:$0 sm:$0xff] }
 0xb39   : > { %5074 = vmatmul.mubr.msk.f32.gmra.mrb[100].mxu1 %vm1935_vm0, %v3201_v14  ;;  %v3203_v6 = vmul.f32 %v7455_v49, %v7455_v49  ;;  %v5419_v60 = vpack.c.bf16 %v3500_v57, %v3499_v22 }
 0xb3a   : > { %v3202_v29 = vmul.f32 %v7458_v3, %v7458_v3  ;;  %5416 = vmatprep.subr.bf16.mxu0 %v5415_v58 }
 0xb3b   : > { %5418 = vmatpush3.bf16.msra.mxu0 %v5415_v58 }
 0xb3c   : > { %5076 = vmatprep.mubr.msk.f32.mxu1 %vm1935_vm0, %v3202_v29  ;;  %5420 = vmatprep.subr.bf16.mxu0 %v5419_v60 }
 0xb3d   : > { %5077 = vmatmul.mubr.msk.f32.gmra.mrb[102].mxu1 %vm1935_vm0, %v3203_v6 }
 0xb3f   : > { %5422 = vmatpush3.bf16.msra.mxu0 %v5419_v60 }
 0xbf4   : > { %v5057_v62 = vpop.f32.mrb[88].mxu1 }
 0xbf5   : > { %v3324_v50 = vadd.f32 1e-05, %v5057_v62  ;;  %v3318_v39 = vpop.f32.mrb[89].mxu1 }
 0xbf6   : > { %v3319_v16 = vadd.f32 1e-05, %v3318_v39 }
 0xbf7   : > { %5756 = vrsqrt.f32 %v3324_v50 }
 0xbf8   : > { %5758 = vrsqrt.f32 %v3319_v16  ;;  %v5060_v1 = vpop.f32.mrb[90].mxu1 }
 0xbf9   : > { %v3334_v10 = vadd.f32 1e-05, %v5060_v1  ;;  %v3328_v13 = vpop.f32.mrb[91].mxu1 }
 0xbfa   : > { %v3329_v61 = vadd.f32 1e-05, %v3328_v13 }
 0xbfb   : > { %5760 = vrsqrt.f32 %v3334_v10 }
 0xbfc   : > { %5762 = vrsqrt.f32 %v3329_v61  ;;  %v5063_v45 = vpop.f32.mrb[92].mxu1 }
 0xbfd   : > { %v3344_v32 = vadd.f32 1e-05, %v5063_v45  ;;  %v3338_v56 = vpop.f32.mrb[93].mxu1 }
 0xbfe   : > { %v3339_v59 = vadd.f32 1e-05, %v3338_v56 }
 0xbff   : > { %5764 = vrsqrt.f32 %v3344_v32 }
 0xc00   : > { %5766 = vrsqrt.f32 %v3339_v59  ;;  %v5066_v55 = vpop.f32.mrb[94].mxu1 }
 0xc01   : > { %v5757_v8 = vpop.eup %5756  ;;  %v3354_v21 = vadd.f32 1e-05, %v5066_v55  ;;  %v3348_v30 = vpop.f32.mrb[95].mxu1 }
 0xc02   : > { %v5759_v33 = vpop.eup %5758  ;;  %v3414_v11 = vmul.f32 %v5757_v8, %v7373_v4  ;;  %v3349_v20 = vadd.f32 1e-05, %v3348_v30 }
 0xc03   : > { %v3413_v46 = vmul.f32 %v5759_v33, %v7376_v63  ;;  %5768 = vrsqrt.f32 %v3354_v21 }
 0xc04   : > { %v3438_v14 = vmul.f32 %v7471_v28, %v3414_v11  ;;  %5770 = vrsqrt.f32 %v3349_v20  ;;  %v5069_v9 = vpop.f32.mrb[96].mxu1 }
 0xc05   : > { %v5761_v29 = vpop.eup %5760  ;;  %v3364_v6 = vadd.f32 1e-05, %v5069_v9  ;;  %v3358_v54 = vpop.f32.mrb[97].mxu1  ;;  %v3437_v40 = vmul.f32 %v7471_v28, %v3413_v46 }
 0xc06   : > { %v5763_v58 = vpop.eup %5762  ;;  %v3462_v4 = vadd.f32 %v7477_v34, %v3438_v14  ;;  %v3416_v22 = vmul.f32 %v5761_v29, %v7383_v41  ;;  %v3359_v57 = vadd.f32 1e-05, %v3358_v54 }
 0xc07   : > { %v3415_v60 = vmul.f32 %v5763_v58, %v7386_v25  ;;  %5772 = vrsqrt.f32 %v3364_v6  ;;  %v3461_v63 = vadd.f32 %v7477_v34, %v3437_v40 }
 0xc08   : > { %5774 = vrsqrt.f32 %v3359_v57  ;;  %v5072_v62 = vpop.f32.mrb[98].mxu1  ;;  %v3440_v50 = vmul.f32 %v7471_v28, %v3416_v22  ;;  %v3478_v25 = vmul.f32 %v3462_v4, %v6853_v2 }
 0xc09   : > { %v5765_v39 = vpop.eup %5764  ;;  %v3374_v16 = vadd.f32 1e-05, %v5072_v62  ;;  %v3368_v1 = vpop.f32.mrb[99].mxu1  ;;  %v3477_v10 = vmul.f32 %v3461_v63, %v6845_v15  ;;  %v3439_v13 = vmul.f32 %v7471_v28, %v3415_v60 }
 0xc0a   : > { %v5767_v61 = vpop.eup %5766  ;;  %v3418_v41 = vmul.f32 %v5765_v39, %v7395_v51  ;;  %v3369_v45 = vadd.f32 1e-05, %v3368_v1  ;;  %v3464_v32 = vadd.f32 %v7477_v34, %v3440_v50 }
 0xc0b   : > { %v3417_v56 = vmul.f32 %v5767_v61, %v7398_v36  ;;  %5776 = vrsqrt.f32 %v3374_v16  ;;  %5095 = vmatprep.mubr.msk.f32.mxu0 %vm1935_vm0, %v3477_v10  ;;  %v3463_v59 = vadd.f32 %v7477_v34, %v3439_v13 }
 0xc0c   : > { %5778 = vrsqrt.f32 %v3369_v45  ;;  %v5075_v55 = vpop.f32.mrb[100].mxu1  ;;  %5096 = vmatmul.mubr.msk.f32.vlgmr.msra.gmra.mrb[88].mxu0 %vm1935_vm0, %v3478_v25  ;;  %v3442_v15 = vmul.f32 %v7471_v28, %v3418_v41  ;;  %v3480_v20 = vmul.f32 %v3464_v32, %v6869_v44 }
 0xc0d   : > { %v5769_v8 = vpop.eup %5768  ;;  %v3384_v51 = vadd.f32 1e-05, %v5075_v55  ;;  %v3378_v21 = vpop.f32.mrb[101].mxu1  ;;  %v3479_v2 = vmul.f32 %v3463_v59, %v6857_v23  ;;  %v3441_v30 = vmul.f32 %v7471_v28, %v3417_v56 }
 0xc0e   : > { %v5771_v33 = vpop.eup %5770  ;;  %v3420_v36 = vmul.f32 %v5769_v8, %v7407_v26  ;;  %v3379_v11 = vadd.f32 1e-05, %v3378_v21  ;;  %v3466_v46 = vadd.f32 %v7477_v34, %v3442_v15 }
 0xc0f   : > { %v3419_v14 = vmul.f32 %v5771_v33, %v7410_v27  ;;  %5780 = vrsqrt.f32 %v3384_v51  ;;  %5098 = vmatprep.mubr.msk.f32.mxu0 %vm1935_vm0, %v3479_v2  ;;  %v3465_v9 = vadd.f32 %v7477_v34, %v3441_v30 }
 0xc10   : > { %5782 = vrsqrt.f32 %v3379_v11  ;;  %v5078_v29 = vpop.f32.mrb[102].mxu1  ;;  %5099 = vmatmul.mubr.msk.f32.gmra.mrb[90].mxu0 %vm1935_vm0, %v3480_v20  ;;  %v3444_v23 = vmul.f32 %v7471_v28, %v3420_v36  ;;  %v3482_v22 = vmul.f32 %v3466_v46, %v6881_v24 }
 0xc11   : > { %v5773_v6 = vpop.eup %5772  ;;  %v3394_v26 = vadd.f32 1e-05, %v5078_v29  ;;  %v3388_v54 = vpop.f32.mrb[103].mxu1  ;;  %v3481_v44 = vmul.f32 %v3465_v9, %v6872_v0  ;;  %v3443_v40 = vmul.f32 %v7471_v28, %v3419_v14 }
 0xc12   : > { %v5775_v58 = vpop.eup %5774  ;;  %v3422_v27 = vmul.f32 %v5773_v6, %v7419_v43  ;;  %v3389_v4 = vadd.f32 1e-05, %v3388_v54  ;;  %v3468_v57 = vadd.f32 %v7477_v34, %v3444_v23 }
 0xc13   : > { %v3421_v60 = vmul.f32 %v5775_v58, %v7422_v19  ;;  %5784 = vrsqrt.f32 %v3394_v26  ;;  %5101 = vmatprep.mubr.msk.f32.mxu0 %vm1935_vm0, %v3481_v44  ;;  %v3467_v63 = vadd.f32 %v7477_v34, %v3443_v40 }
 0xc14   : > { %5786 = vrsqrt.f32 %v3389_v4  ;;  %5102 = vmatmul.mubr.msk.f32.gmra.mrb[92].mxu0 %vm1935_vm0, %v3482_v22  ;;  %v3446_v0 = vmul.f32 %v7471_v28, %v3422_v27  ;;  %v3484_v19 = vmul.f32 %v3468_v57, %v6896_v31 }
 0xc15   : > { %v5777_v62 = vpop.eup %5776  ;;  %v3483_v43 = vmul.f32 %v3467_v63, %v6885_v7  ;;  %v3445_v50 = vmul.f32 %v7471_v28, %v3421_v60 }
 0xc16   : > { %v5779_v24 = vpop.eup %5778  ;;  %v3424_v39 = vmul.f32 %v5777_v62, %v7431_v5  ;;  %v3470_v16 = vadd.f32 %v7477_v34, %v3446_v0 }
 0xc17   : > { %v3423_v1 = vmul.f32 %v5779_v24, %v7434_v48  ;;  %5104 = vmatprep.mubr.msk.f32.mxu0 %vm1935_vm0, %v3483_v43  ;;  %v3469_v10 = vadd.f32 %v7477_v34, %v3445_v50 }
 0xc18   : > { %5105 = vmatmul.mubr.msk.f32.gmra.mrb[94].mxu0 %vm1935_vm0, %v3484_v19  ;;  %v3448_v13 = vmul.f32 %v7471_v28, %v3424_v39  ;;  %v3486_v45 = vmul.f32 %v3470_v16, %v6910_v38 }
 0xc19   : > { %v5781_v7 = vpop.eup %5780  ;;  %v3485_v61 = vmul.f32 %v3469_v10, %v6899_v35  ;;  %v3447_v41 = vmul.f32 %v7471_v28, %v3423_v1 }
 0xc1a   : > { %v5783_v5 = vpop.eup %5782  ;;  %v3426_v31 = vmul.f32 %v5781_v7, %v7443_v52  ;;  %v3472_v48 = vadd.f32 %v7477_v34, %v3448_v13 }
 0xc1b   : > { %v3425_v25 = vmul.f32 %v5783_v5, %v7446_v42  ;;  %5107 = vmatprep.mubr.msk.f32.mxu0 %vm1935_vm0, %v3485_v61  ;;  %v3471_v32 = vadd.f32 %v7477_v34, %v3447_v41 }
 0xc1c   : > { %5108 = vmatmul.mubr.msk.f32.gmra.mrb[96].mxu0 %vm1935_vm0, %v3486_v45  ;;  %v3450_v56 = vmul.f32 %v7471_v28, %v3426_v31  ;;  %v3488_v15 = vmul.f32 %v3472_v48, %v6923_v17 }
 0xc1d   : > { %v5785_v35 = vpop.eup %5784  ;;  %v3487_v59 = vmul.f32 %v3471_v32, %v6913_v37  ;;  %v3449_v55 = vmul.f32 %v7471_v28, %v3425_v25 }
 0xc1e   : > { %v5787_v52 = vpop.eup %5786  ;;  %v3428_v38 = vmul.f32 %v5785_v35, %v7455_v49  ;;  %v3474_v42 = vadd.f32 %v7477_v34, %v3450_v56 }
 0xc1f   : > { %v3427_v8 = vmul.f32 %v5787_v52, %v7458_v3  ;;  %5110 = vmatprep.mubr.msk.f32.mxu0 %vm1935_vm0, %v3487_v59  ;;  %v3473_v51 = vadd.f32 %v7477_v34, %v3449_v55 }
 0xc20   : > { %5111 = vmatmul.mubr.msk.f32.gmra.mrb[98].mxu0 %vm1935_vm0, %v3488_v15  ;;  %v3452_v21 = vmul.f32 %v7471_v28, %v3428_v38  ;;  %v3490_v49 = vmul.f32 %v3474_v42, %v6937_v18 }
 0xc21   : > { %v3489_v37 = vmul.f32 %v3473_v51, %v6926_v47  ;;  %v3451_v2 = vmul.f32 %v7471_v28, %v3427_v8  ;;  %v4122_v47 = vld [vmem:[%s7696_s7] ss:$0 sm:$0xff]  ;;  %s5958_s7 = scalar_lea.vmem %s7599_s20, 16 }
 0xc22   : > { %v3476_v17 = vadd.f32 %v7477_v34, %v3452_v21  ;;  %p5959_p7 = scmp.ne.s32.totalorder %s7599_s20, %s5958_s7 }
 0xc23   : > { %5113 = vmatprep.mubr.msk.f32.mxu0 %vm1935_vm0, %v3489_v37  ;;  %v3475_v3 = vadd.f32 %v7477_v34, %v3451_v2 }
 0xc24   : > { %5114 = vmatmul.mubr.msk.f32.gmra.mrb[100].mxu0 %vm1935_vm0, %v3490_v49  ;;  %v3492_v33 = vmul.f32 %v3476_v17, %v6948_v53  ;;  %p5960_p12 = pnand %p5959_p7, %p7698_p4 }
 0xc25   : > { %v3491_v30 = vmul.f32 %v3475_v3, %v6940_v12 }
 0xc26   : > { %p5961_p1 = pneg %p5960_p12 }
 0xc27   : > { %5116 = vmatprep.mubr.msk.f32.mxu0 %vm1935_vm0, %v3491_v30 }
 0xc28   : > { %5117 = vmatmul.mubr.msk.f32.gmra.mrb[102].mxu0 %vm1935_vm0, %v3492_v33 }
 0xcdf   : > { %v5097_v18 = vpop.f32.mrb[88].mxu0 }
 0xce0   : > { %v3628_v28 = vadd.f32 %v5097_v18, %v4122_v47  ;;  %v3622_v36 = vpop.f32.mrb[89].mxu0 }
 0xce1   : > { %v3623_v11 = vadd.f32 %v4122_v47, %v3622_v36 }
 0xce2   : > { %3719 = vrot.lane.b32.xlu1 %v3628_v28, %s6047_s21 }
 0xce3   : > { %v5100_v34 = vpop.f32.mrb[90].mxu0  ;;  %3717 = vrot.lane.b32.xlu0 %v3623_v11, %s6047_s21 }
 0xce4   : > { %v3638_v12 = vadd.f32 %v5100_v34, %v4122_v47  ;;  %v3632_v53 = vpop.f32.mrb[91].mxu0 }
 0xce5   : > { %v3633_v20 = vadd.f32 %v4122_v47, %v3632_v53 }
 0xce6   : > { %3723 = vrot.lane.b32.xlu1 %v3638_v12, %s6047_s21 }
 0xce7   : > { %v5103_v46 = vpop.f32.mrb[92].mxu0  ;;  %3721 = vrot.lane.b32.xlu0 %v3633_v20, %s6047_s21 }
 0xce8   : > { %v3648_v14 = vadd.f32 %v5103_v46, %v4122_v47  ;;  %v3642_v9 = vpop.f32.mrb[93].mxu0 }
 0xce9   : > { %v3643_v29 = vadd.f32 %v4122_v47, %v3642_v9 }
 0xcea   : > { %3727 = vrot.lane.b32.xlu1 %v3648_v14, %s6047_s21 }
 0xceb   : > { %v5106_v23 = vpop.f32.mrb[94].mxu0  ;;  %3725 = vrot.lane.b32.xlu0 %v3643_v29, %s6047_s21 }
 0xcec   : > { %v3658_v6 = vadd.f32 %v5106_v23, %v4122_v47  ;;  %v3652_v26 = vpop.f32.mrb[95].mxu0 }
 0xced   : > { %v3653_v54 = vadd.f32 %v4122_v47, %v3652_v26 }
 0xcee   : > { %3731 = vrot.lane.b32.xlu1 %v3658_v6, %s6047_s21 }
 0xcef   : > { %v5109_v44 = vpop.f32.mrb[96].mxu0  ;;  %3729 = vrot.lane.b32.xlu0 %v3653_v54, %s6047_s21 }
 0xcf0   : > { %v3668_v40 = vadd.f32 %v5109_v44, %v4122_v47  ;;  %v3662_v58 = vpop.f32.mrb[97].mxu0 }
 0xcf1   : > { %v3663_v27 = vadd.f32 %v4122_v47, %v3662_v58 }
 0xcf2   : > { %3735 = vrot.lane.b32.xlu1 %v3668_v40, %s6047_s21 }
 0xcf3   : > { %v5112_v4 = vpop.f32.mrb[98].mxu0  ;;  %3733 = vrot.lane.b32.xlu0 %v3663_v27, %s6047_s21 }
 0xcf4   : > { %v3678_v22 = vadd.f32 %v5112_v4, %v4122_v47  ;;  %v3672_v57 = vpop.f32.mrb[99].mxu0 }
 0xcf5   : > { %v3673_v60 = vadd.f32 %v4122_v47, %v3672_v57 }
 0xcf6   : > { %3739 = vrot.lane.b32.xlu1 %v3678_v22, %s6047_s21 }
 0xcf7   : > { %v5115_v63 = vpop.f32.mrb[100].mxu0  ;;  %3737 = vrot.lane.b32.xlu0 %v3673_v60, %s6047_s21 }
 0xcf8   : > { %v3688_v0 = vadd.f32 %v5115_v63, %v4122_v47  ;;  %v3682_v62 = vpop.f32.mrb[101].mxu0 }
 0xcf9   : > { %v3683_v43 = vadd.f32 %v4122_v47, %v3682_v62 }
 0xcfa   : > { %3743 = vrot.lane.b32.xlu1 %v3688_v0, %s6047_s21 }
 0xcfb   : > { %3741 = vrot.lane.b32.xlu0 %v3683_v43, %s6047_s21  ;;  %v5118_v50 = vpop.f32.mrb[102].mxu0 }
 0xcfc   : > { %v7575_v24 = vadd.f32 %v5118_v50, %v4122_v47  ;;  %v3692_v39 = vpop.f32.mrb[103].mxu0 }
 0xcfd   : > { %v3693_v19 = vadd.f32 %v4122_v47, %v3692_v39 }
 0xcfe   : > { %3747 = vrot.lane.b32.xlu1 %v7575_v24, %s6047_s21 }
 0xcff   : > { %3745 = vrot.lane.b32.xlu0 %v3693_v19, %s6047_s21  ;;  %s6048_s21 = smov [#allocation13]  }
 0xd00   : > { %s5962_s14 = sshll.u32 %s6048_s21, 4  ;;  %s5963_s14 = int_to_ptr.vmem [resolvable:$false] %s5962_s14 }
 0xd01   : > { %s5964_s0 = scalar_lea.vmem %s5963_s14, 32  ;;  %p5965_p13 = scmp.lt.s32.totalorder %s7599_s20, %s5963_s14 }
 0xd02   : > { %p5966_p0 = scmp.lt.s32.totalorder %s5964_s0, %s5958_s7 }
 0xd04   : > { %p5967_p2 = por %p5966_p0, %p5965_p13 }
 0xd06   : > { %p5968_p8 = pnand %p5967_p2, %p5961_p1 }
 0xd54   : > { %v3720_v16 = vpop.permute.xlu1 %3719 }
 0xd55   : > { %v3766_v1 = vmul.f32 %v3720_v16, %v3628_v28  ;;  %v3718_v10 = vpop.permute.xlu0 %3717 }
 0xd56   : > { %v3765_v13 = vmul.f32 %v3718_v10, %v3623_v11 }
 0xd57   : > { %v3785_v7 = vsel %vm3781_vm1, %v3766_v1, 0.0 }
 0xd58   : > { %v3724_v61 = vpop.permute.xlu1 %3723  ;;  %3786 = vadd.xlane.f32.xlu1 %v3785_v7  ;;  %v3782_v41 = vsel %vm3781_vm1, %v3765_v13, 0.0 }
 0xd59   : > { %v3722_v5 = vpop.permute.xlu0 %3721  ;;  %3783 = vadd.xlane.f32.xlu0 %v3782_v41  ;;  %v3768_v45 = vmul.f32 %v3724_v61, %v3638_v12 }
 0xd5a   : > { %v3767_v31 = vmul.f32 %v3722_v5, %v3633_v20 }
 0xd5b   : > { %v3791_v52 = vsel %vm3781_vm1, %v3768_v45, 0.0 }
 0xd5c   : > { %v3728_v48 = vpop.permute.xlu1 %3727  ;;  %v3788_v25 = vsel %vm3781_vm1, %v3767_v31, 0.0 }
 0xd5d   : > { %v3726_v32 = vpop.permute.xlu0 %3725  ;;  %3789 = vadd.xlane.f32.xlu0 %v3788_v25  ;;  %v3770_v35 = vmul.f32 %v3728_v48, %v3648_v14 }
 0xd5e   : > { %v3769_v56 = vmul.f32 %v3726_v32, %v3643_v29 }
 0xd5f   : > { %v3797_v21 = vsel %vm3781_vm1, %v3770_v35, 0.0 }
 0xd60   : > { %v3732_v59 = vpop.permute.xlu1 %3731  ;;  %v3794_v55 = vsel %vm3781_vm1, %v3769_v56, 0.0 }
 0xd61   : > { %v3730_v38 = vpop.permute.xlu0 %3729  ;;  %3795 = vadd.xlane.f32.xlu1 %v3794_v55  ;;  %3792 = vadd.xlane.f32.xlu0 %v3791_v52  ;;  %v3772_v42 = vmul.f32 %v3732_v59, %v3658_v6 }
 0xd62   : > { %v3771_v15 = vmul.f32 %v3730_v38, %v3653_v54 }
 0xd63   : > { %v3803_v30 = vsel %vm3781_vm1, %v3772_v42, 0.0 }
 0xd64   : > { %v3736_v8 = vpop.permute.xlu1 %3735  ;;  %v3800_v51 = vsel %vm3781_vm1, %v3771_v15, 0.0 }
 0xd65   : > { %v3734_v37 = vpop.permute.xlu0 %3733  ;;  %3801 = vadd.xlane.f32.xlu1 %v3800_v51  ;;  %3798 = vadd.xlane.f32.xlu0 %v3797_v21  ;;  %v3774_v49 = vmul.f32 %v3736_v8, %v3668_v40 }
 0xd66   : > { %v3773_v2 = vmul.f32 %v3734_v37, %v3663_v27 }
 0xd67   : > { %v3809_v11 = vsel %vm3781_vm1, %v3774_v49, 0.0 }
 0xd68   : > { %v3740_v17 = vpop.permute.xlu1 %3739  ;;  %v3806_v3 = vsel %vm3781_vm1, %v3773_v2, 0.0 }
 0xd69   : > { %v3738_v33 = vpop.permute.xlu0 %3737  ;;  %3807 = vadd.xlane.f32.xlu1 %v3806_v3  ;;  %3804 = vadd.xlane.f32.xlu0 %v3803_v30  ;;  %v3776_v18 = vmul.f32 %v3740_v17, %v3678_v22 }
 0xd6a   : > { %v3775_v47 = vmul.f32 %v3738_v33, %v3673_v60 }
 0xd6b   : > { %v3815_v46 = vsel %vm3781_vm1, %v3776_v18, 0.0 }
 0xd6c   : > { %v3744_v28 = vpop.permute.xlu1 %3743  ;;  %v3812_v36 = vsel %vm3781_vm1, %v3775_v47, 0.0 }
 0xd6d   : > { %v3742_v34 = vpop.permute.xlu0 %3741  ;;  %3813 = vadd.xlane.f32.xlu1 %v3812_v36  ;;  %3810 = vadd.xlane.f32.xlu0 %v3809_v11  ;;  %v3778_v53 = vmul.f32 %v3744_v28, %v3688_v0 }
 0xd6e   : > { %v3777_v12 = vmul.f32 %v3742_v34, %v3683_v43 }
 0xd6f   : > { %v3821_v6 = vsel %vm3781_vm1, %v3778_v53, 0.0 }
 0xd70   : > { %v3818_v20 = vsel %vm3781_vm1, %v3777_v12, 0.0  ;;  %v3748_v14 = vpop.permute.xlu1 %3747 }
 0xd71   : > { %3819 = vadd.xlane.f32.xlu1 %v3818_v20  ;;  %3816 = vadd.xlane.f32.xlu0 %v3815_v46  ;;  %v3746_v9 = vpop.permute.xlu0 %3745  ;;  %v3780_v23 = vmul.f32 %v3748_v14, %v7575_v24 }
 0xd72   : > { %v3779_v29 = vmul.f32 %v3746_v9, %v3693_v19 }
 0xd73   : > { %v3827_v54 = vsel %vm3781_vm1, %v3780_v23, 0.0 }
 0xd74   : > { %v3824_v26 = vsel %vm3781_vm1, %v3779_v29, 0.0 }
 0xd75   : > { %3822 = vadd.xlane.f32.xlu0 %v3821_v6  ;;  %3825 = vadd.xlane.f32.xlu1 %v3824_v26 }
 0xd79   : > { %3828 = vadd.xlane.f32.xlu0 %v3827_v54 }
 0xde5   : > { %v3787_v40 = vpop.xlane.xlu1 %3786 }
 0xde6   : > { %v3784_v44 = vpop.xlane.xlu0 %3783 }
 0xde7   : > { %3830 = vxpose.xlu1.b32.start [1/16] (narrow) %v3784_v44, 8 }
 0xdea   : > { %v3790_v58 = vpop.xlane.xlu0 %3789 }
 0xdeb   : > { %3831 = vxpose.xlu1.b32.cont [2/16] (narrow) %v3787_v40, 8 }
 0xdee   : > { %v3793_v27 = vpop.xlane.xlu0 %3792  ;;  %v3796_v4 = vpop.xlane.xlu1 %3795 }
 0xdef   : > { %3832 = vxpose.xlu1.b32.cont [3/16] (narrow) %v3790_v58, 8 }
 0xdf2   : > { %v3799_v22 = vpop.xlane.xlu0 %3798  ;;  %v3802_v57 = vpop.xlane.xlu1 %3801 }
 0xdf3   : > { %3833 = vxpose.xlu1.b32.cont [4/16] (narrow) %v3793_v27, 8 }
 0xdf6   : > { %v3805_v60 = vpop.xlane.xlu0 %3804  ;;  %v3808_v63 = vpop.xlane.xlu1 %3807 }
 0xdf7   : > { %3834 = vxpose.xlu1.b32.cont [5/16] (narrow) %v3796_v4, 8 }
 0xdfa   : > { %v3811_v0 = vpop.xlane.xlu0 %3810  ;;  %v3814_v62 = vpop.xlane.xlu1 %3813 }
 0xdfb   : > { %3835 = vxpose.xlu1.b32.cont [6/16] (narrow) %v3799_v22, 8 }
 0xdfe   : > { %v3817_v43 = vpop.xlane.xlu0 %3816  ;;  %v3820_v50 = vpop.xlane.xlu1 %3819 }
 0xdff   : > { %3836 = vxpose.xlu1.b32.cont [7/16] (narrow) %v3802_v57, 8 }
 0xe02   : > { %v3823_v24 = vpop.xlane.xlu0 %3822  ;;  %v3826_v39 = vpop.xlane.xlu1 %3825 }
 0xe03   : > { %3837 = vxpose.xlu1.b32.cont [8/16] (narrow) %v3805_v60, 8 }
 0xe06   : > { %v3829_v19 = vpop.xlane.xlu0 %3828 }
 0xe07   : > { %3838 = vxpose.xlu1.b32.cont [9/16] (narrow) %v3808_v63, 8 }
 0xe0b   : > { %3839 = vxpose.xlu1.b32.cont [10/16] (narrow) %v3811_v0, 8 }
 0xe0f   : > { %3840 = vxpose.xlu1.b32.cont [11/16] (narrow) %v3814_v62, 8 }
 0xe13   : > { %3841 = vxpose.xlu1.b32.cont [12/16] (narrow) %v3817_v43, 8 }
 0xe17   : > { %3842 = vxpose.xlu1.b32.cont [13/16] (narrow) %v3820_v50, 8 }
 0xe1b   : > { %3843 = vxpose.xlu1.b32.cont [14/16] (narrow) %v3823_v24, 8 }
 0xe1f   : > { %3844 = vxpose.xlu1.b32.cont [15/16] (narrow) %v3826_v39, 8 }
 0xe23   : > { %3845 = vxpose.xlu1.b32.end [16/16] (narrow) %v3829_v19, 8 }
 0xe67   : > { %v3846_v16 = vpop.trf.xlu1 }
 0xe68   : > { %3862 = vst [vmem:[%s530_s22] sm:$0x1] %v3846_v16 }
 0xe69   : > { %5971 = shalt.err (!%p5968_p8)
}
 0xe6a   : > { %s5972_s17 = scalar_lea.hbm %s7604_s9, 16  ;;  %s5976_s19 = scalar_lea.hbm %s7697_s13, 32 }
 0xe6b   : > { %p5973_p6 = scmp.ne.s32.totalorder %s7604_s9, %s5972_s17  ;;  %p5977_p3 = scmp.lt.u32.totalorder %s7604_s9, %s7697_s13 }
 0xe6c   : > { %p5978_p5 = scmp.lt.u32.totalorder %s5976_s19, %s5972_s17  ;;  %p5980_p7 = scmp.lt.u32.totalorder %s5972_s17, %s7604_s9 }
 0xe6d   : > { %p5974_p10 = pnand %p5973_p6, %p7698_p4 }
 0xe6e   : > { %p5979_p9 = por %p5978_p5, %p5977_p3 }
 0xe6f   : > { %p5975_p11 = pneg %p5974_p10 }
 0xe70   : > { %p5981_p12 = por %p5980_p7, %p5979_p9 }
 0xe72   : > { %p5982_p1 = pnand %p5981_p12, %p5975_p11 }
 0xe74   : > { %5985 = shalt.err (!%p5982_p1)
}
 0xe75   : > { %5453 = dma.vmem_to_hbm [thread:$0]  (%p7698_p4), %s7599_s20, 16, %s7604_s9, %s3864_s1  }
 0xe76 PF: > { %s3888_s0 = sand.u32 1, %s6024_s25   ;;  %p7699_p13 = scmp.ne.s32.totalorder %s7682_s29, 0 }
 0xe77   : > { %p7700_p0 = scmp.ge.s32.totalorder %s6036_s28, 2  ;;  %s3889_s7 = scalar_lea.sflag [#allocation4], %s3888_s0 }
 0xe79   : > { %p5476_p2 = pnand %p7700_p0, %p7699_p13 }
 0xe7b   : > { %6019 = dma.done.wait (!%p5476_p2), %s3889_s7, 16  }
 0xe7c   : > { %6021 = vsyncadd (!%p5476_p2), %s3889_s7, 4294967280  ;;  %p29_p8 = scmp.ge.s32.totalorder %s6292_s16, 4   ;;  %s7701_s25 = smov %s6028_s26 }
 0xe7d   : > { %s7702_s26 = smov %s6032_s27  ;;  %s7703_s27 = smov %s6304_s8 }
 0xe7e   : > { %s7704_s28 = smov %s6292_s16  ;;  %31 = sbr.rel (!%p29_p8) target bundleno = 16 (0x10), region = 145 }
 0xe85   :  { %3893 = vsyncpa [#allocation3], 1 }
 0xe86   :  { %3895 = vsyncpa [#allocation3 + $0x1], 1 }
 0xe87   :  { %3896 = vsyncpa [#allocation6], 1 }
 0xe88   :  { %3897 = vsyncpa [#allocation9], 1 }
 0xe89   :  { %3898 = vsyncpa [#allocation12], 1 }
 0xe8a   :  { %3899 = vsyncpa [#allocation4], 1 }
 0xe8b   :  { %3901 = vsyncpa [#allocation4 + $0x1], 1 }

</bundles_post_ra>
